<compile_context>
chip_gen: v5e
topology: v5e:2x2
jax: 0.10.0
libtpu: 0.0.40
codegen_flags: <defaults>
</compile_context>

<pallas_src>
import functools

import jax
import jax.numpy as jnp
from jax.experimental import pallas as pl
from jax.experimental.pallas import tpu as pltpu


def _round_up(x, m):
    return ((x + m - 1) // m) * m


def hypergraph_conv_kernel(x_ref, h_ref, p_ref, out_ref):
    """One batch tile, batch index on the lane axis.

    x_ref:   (N, F_in, T)   node features, T = tile_b samples on lanes
    h_ref:   (N, E, T)      incidence matrix (0/1), f32
    p_ref:   (P, 128)       packed parameters (theta^T | bias, W1 | b1, W2 | b2)
    out_ref: (N, F_out, T)
    """
    n_nodes, f_in, t = x_ref.shape
    n_edges = h_ref.shape[1]
    f_out = out_ref.shape[1]

    X = x_ref[...]            # (N, F_in, T) f32
    Hm = h_ref[...]           # (N, E, T)   f32

    # --- packed parameters (single lane-padded slab, one DMA) ------------------
    w1 = p_ref[f_out:f_out + f_in, 0:f_in]                     # (F_in, F_in) torch (out,in)
    b1_c = p_ref[f_out:f_out + f_in, f_in:f_in + 1]            # (F_in, 1)
    w2_blk = p_ref[f_out + f_in:f_out + f_in + 8, 0:f_in]      # (8, F_in), rows 1.. are zero
    b2 = p_ref[f_out + f_in:f_out + f_in + 1, f_in:f_in + 1]   # (1, 1)

    # --- degrees (lane-dense (rows, T) slabs) -----------------------------------
    d_node = jnp.sum(Hm, axis=1)                      # (N, T)
    d_edge = jnp.sum(Hm, axis=0)                      # (E, T)
    d_inv = jnp.where(d_node != 0, 1.0 / d_node, 0.0)
    b_inv = jnp.where(d_edge != 0, 1.0 / d_edge, 0.0)
    inv_cnt = 1.0 / jnp.maximum(d_edge, 1.0)          # clamp(min=1)

    # --- H^T X: unrolled broadcast-FMA over nodes (VPU, fully lane-dense) -------
    fth = jnp.zeros((n_edges, f_in, t), jnp.float32)
    for n in range(n_nodes):
        fth = fth + Hm[n][:, None, :] * X[n][None, :, :]        # (E, F_in, T)

    # --- per-hyperedge: attention MLP, weighting, scatter back to nodes ---------
    acc = jnp.zeros((n_nodes, f_in, t), jnp.float32)
    for e in range(n_edges):
        fth_e = fth[e]                                          # (F_in, T)
        emb_e = fth_e * inv_cnt[e][None, :]                     # mean hyperedge embedding
        h_e = jnp.dot(w1, emb_e, preferred_element_type=jnp.float32) + b1_c
        h_e = jnp.where(h_e > 0, h_e, 0.2 * h_e)                # LeakyReLU(0.2)
        s_e = jnp.dot(w2_blk, h_e, preferred_element_type=jnp.float32)[0:1, :] + b2
        coef = jax.nn.sigmoid(s_e) * b_inv[e][None, :]          # (1, T)
        weighted_e = coef * fth_e                               # (F_in, T)
        acc = acc + Hm[:, e, :][:, None, :] * weighted_e[None, :, :]

    # --- node normalization, theta, bias; lane-dense (F_out, T) stores ----------
    theta_t = p_ref[0:f_out, 0:f_in]                            # (F_out, F_in) = theta^T
    bias_c = p_ref[0:f_out, f_in:f_in + 1]                      # (F_out, 1)
    for n in range(n_nodes):
        nn_n = d_inv[n][None, :] * acc[n]                       # (F_in, T)
        out_n = jnp.dot(theta_t, nn_n, preferred_element_type=jnp.float32) + bias_c
        out_ref[n] = out_n


def pack_params(params, f_in, f_out):
    """Pack all six parameters into one (rows, 128) f32 slab (single DMA)."""
    assert f_in + 1 <= 128, "packed layout assumes f_in + 1 <= 128 lanes"
    rows = _round_up(f_out + f_in + 8, 8)
    p = jnp.zeros((rows, 128), jnp.float32)
    p = p.at[0:f_out, 0:f_in].set(params["theta"].T.astype(jnp.float32))          # theta^T
    p = p.at[0:f_out, f_in].set(params["bias"].astype(jnp.float32))               # bias col
    p = p.at[f_out:f_out + f_in, 0:f_in].set(params["w_att1"].astype(jnp.float32))
    p = p.at[f_out:f_out + f_in, f_in].set(params["b_att1"].astype(jnp.float32))
    p = p.at[f_out + f_in, 0:f_in].set(params["w_att2"][0].astype(jnp.float32))
    p = p.at[f_out + f_in, f_in].set(params["b_att2"][0].astype(jnp.float32))
    return p


@functools.partial(jax.jit, static_argnames=("tile_b",))
def hypergraph_conv_forward(x, incidence, params, *, tile_b=128):
    """Forward pass of HypergraphConvLayer (attention enabled) for a whole batch."""
    # TODO(synk): use_attention=False / externally supplied hyperedge weights `w` not wired up.
    x = x.astype(jnp.float32)
    H = incidence.astype(jnp.float32)
    B, N, F_in = x.shape
    E = incidence.shape[2]
    F_out = params["theta"].shape[1]

    num_tiles = pl.cdiv(B, tile_b)
    B_pad = num_tiles * tile_b
    if B_pad != B:
        pad = B_pad - B
        x = jnp.pad(x, ((0, pad), (0, 0), (0, 0)))
        H = jnp.pad(H, ((0, pad), (0, 0), (0, 0)))

    # Batch-in-lanes layout: (B_pad, N, C) -> (num_tiles*N, C, tile_b).
    def to_lane_major(a):
        c = a.shape[-1]
        a = a.reshape(num_tiles, tile_b, N, c)
        a = jnp.transpose(a, (0, 2, 3, 1))
        return a.reshape(num_tiles * N, c, tile_b)

    xl = to_lane_major(x)                 # (tiles*N, F_in, T)
    hl = to_lane_major(H)                 # (tiles*N, E,    T)
    packed = pack_params(params, F_in, F_out)
    p_rows = packed.shape[0]

    flops_per_sample = (4 * N * E * F_in            # two incidence contractions
                        + 2 * E * F_in * F_in       # attention layer 1
                        + 2 * E * F_in              # attention layer 2
                        + 2 * N * F_in * F_out)     # theta
    cost = pl.CostEstimate(
        flops=int(B_pad * flops_per_sample),
        transcendentals=int(B_pad * E),
        bytes_accessed=int(4 * (xl.size + hl.size + packed.size + B_pad * N * F_out)),
    )

    out_lane = pl.pallas_call(
        hypergraph_conv_kernel,
        out_shape=jax.ShapeDtypeStruct((num_tiles * N, F_out, tile_b), jnp.float32),
        grid=(num_tiles,),
        in_specs=[
            pl.BlockSpec((N, F_in, tile_b), lambda i: (i, 0, 0)),   # x tile  (8,128 aligned)
            pl.BlockSpec((N, E, tile_b), lambda i: (i, 0, 0)),      # H tile  (16,128 aligned)
            pl.BlockSpec((p_rows, 128), lambda i: (0, 0)),          # packed params (resident)
        ],
        out_specs=pl.BlockSpec((N, F_out, tile_b), lambda i: (i, 0, 0)),  # (32,128) dense stores
        compiler_params=pltpu.CompilerParams(dimension_semantics=("parallel",)),
        cost_estimate=cost,
    )(xl, hl, packed)

    # Back to (B, N, F_out).
    out = out_lane.reshape(num_tiles, N, F_out, tile_b)
    out = jnp.transpose(out, (0, 3, 1, 2)).reshape(B_pad, N, F_out)
    return out[:B]


def _xavier_uniform(key, fan_in, fan_out, shape):
    bound = (6.0 / (fan_in + fan_out)) ** 0.5
    return jax.random.uniform(key, shape, jnp.float32, -bound, bound)


def make_params(key, f_in, f_out):
    k1, k2, k3, k4, k5, k6 = jax.random.split(key, 6)
    return {
        # theta stored (in, out) as in the module; used as node_norm @ theta.
        "theta": _xavier_uniform(k1, f_in, f_out, (f_in, f_out)),
        "bias": 0.1 * jax.random.normal(k2, (f_out,), jnp.float32),
        # torch Linear weights kept in torch (out, in) orientation.
        "w_att1": _xavier_uniform(k3, f_in, f_in, (f_in, f_in)),
        "b_att1": 0.1 * jax.random.normal(k4, (f_in,), jnp.float32),
        "w_att2": _xavier_uniform(k5, f_in, 1, (1, f_in)),
        "b_att2": 0.1 * jax.random.normal(k6, (1,), jnp.float32),
    }


def reference_forward(x, incidence, params):
    """Pure-JAX mirror of HypergraphConvLayer.forward (use_attention=True)."""
    H = incidence.astype(jnp.float32)
    D = jnp.sum(H, axis=2)
    D_inv = jnp.where(D != 0, 1.0 / D, 0.0)
    Bdeg = jnp.sum(H, axis=1)
    B_inv = jnp.where(Bdeg != 0, 1.0 / Bdeg, 0.0)

    fth = jnp.einsum('bne,bnf->bef', H, x)
    embs = fth / jnp.maximum(Bdeg, 1.0)[..., None]
    h = embs @ params["w_att1"].T + params["b_att1"]
    h = jnp.where(h > 0, h, 0.2 * h)
    scores = (h @ params["w_att2"].T)[..., 0] + params["b_att2"][0]
    w = jax.nn.sigmoid(scores)

    weighted = (w * B_inv)[..., None] * fth
    ftn = jnp.einsum('bne,bef->bnf', H, weighted)
    node_norm = D_inv[..., None] * ftn
    return node_norm @ params["theta"] + params["bias"]


if __name__ == "__main__":
    # Small per-sample graph (8 nodes, 16 hyperedges, 8 in-feats, 32 out-feats).
    # B=512 with tile_b=128 -> 4 lane-dense grid steps (>=2 pipelined steps per TC on v7x).
    B, N, E, F_in, F_out = 512, 8, 16, 8, 32
    key = jax.random.PRNGKey(0)
    kx, kh, kp = jax.random.split(key, 3)

    x = jax.random.normal(kx, (B, N, F_in), jnp.float32)
    H = (jax.random.uniform(kh, (B, N, E)) < 0.4).astype(jnp.float32)
    params = make_params(kp, F_in, F_out)

    out = hypergraph_conv_forward(x, H, params, tile_b=128)
    out = jax.block_until_ready(out)

    ref = reference_forward(x, H, params)
    assert out.shape == (B, N, F_out)
    assert jnp.allclose(out, ref, atol=1e-3, rtol=1e-3), float(jnp.max(jnp.abs(out - ref)))

    print("KERNEL_OK")
</pallas_src>

<mosaic_0001>
module attributes {stable_mosaic.version = 11 : i64} {
  func.func @hypergraph_conv_kernel(%arg0: i32, %arg1: memref<8x8x128xf32, #tpu.memory_space<vmem>>, %arg2: memref<8x16x128xf32, #tpu.memory_space<vmem>>, %arg3: memref<48x128xf32, #tpu.memory_space<vmem>>, %arg4: memref<8x32x128xf32, #tpu.memory_space<vmem>>) attributes {dimension_semantics = [#tpu.dimension_semantics<parallel>], iteration_bounds = array<i64: 4>, scalar_prefetch = 0 : i64, scratch_operands = 0 : i64, tpu.core_type = #tpu.core_type<tc>, window_params = [{transform_indices = @transform_0, window_bounds = array<i64: 8, 8, 128>}, {transform_indices = @transform_1, window_bounds = array<i64: 8, 16, 128>}, {pipeline_mode = #tpu.pipeline_mode<synchronous>, transform_indices = @transform_2, window_bounds = array<i64: 48, 128>}, {transform_indices = @transform_3, window_bounds = array<i64: 8, 32, 128>}]} {
    %c0 = arith.constant 0 : index
    %c0_0 = arith.constant 0 : index
    %c0_1 = arith.constant 0 : index
    %0 = vector.load %arg1[%c0, %c0_0, %c0_1] : memref<8x8x128xf32, #tpu.memory_space<vmem>>, vector<8x8x128xf32>
    %c0_2 = arith.constant 0 : index
    %c0_3 = arith.constant 0 : index
    %c0_4 = arith.constant 0 : index
    %1 = vector.load %arg2[%c0_2, %c0_3, %c0_4] : memref<8x16x128xf32, #tpu.memory_space<vmem>>, vector<8x16x128xf32>
    %c32 = arith.constant 32 : index
    %c0_5 = arith.constant 0 : index
    %2 = vector.load %arg3[%c32, %c0_5] : memref<48x128xf32, #tpu.memory_space<vmem>>, vector<8x8xf32>
    %c32_6 = arith.constant 32 : index
    %c8 = arith.constant 8 : index
    %3 = vector.load %arg3[%c32_6, %c8] : memref<48x128xf32, #tpu.memory_space<vmem>>, vector<8x1xf32>
    %c40 = arith.constant 40 : index
    %c0_7 = arith.constant 0 : index
    %4 = vector.load %arg3[%c40, %c0_7] : memref<48x128xf32, #tpu.memory_space<vmem>>, vector<8x8xf32>
    %c40_8 = arith.constant 40 : index
    %c8_9 = arith.constant 8 : index
    %5 = vector.load %arg3[%c40_8, %c8_9] : memref<48x128xf32, #tpu.memory_space<vmem>>, vector<1x1xf32>
    %cst = arith.constant dense<0.000000e+00> : vector<8x128xf32>
    %6 = vector.multi_reduction <add>, %1, %cst [1] : vector<8x16x128xf32> to vector<8x128xf32>
    %cst_10 = arith.constant dense<0.000000e+00> : vector<16x128xf32>
    %7 = vector.multi_reduction <add>, %1, %cst_10 [0] : vector<8x16x128xf32> to vector<16x128xf32>
    %cst_11 = arith.constant 0.000000e+00 : f32
    %8 = vector.broadcast %cst_11 : f32 to vector<8x128xf32>
    %9 = arith.cmpf one, %6, %8 : vector<8x128xf32>
    %cst_12 = arith.constant 1.000000e+00 : f32
    %10 = vector.broadcast %cst_12 : f32 to vector<8x128xf32>
    %11 = arith.divf %10, %6 : vector<8x128xf32>
    %cst_13 = arith.constant 0.000000e+00 : f32
    %12 = vector.broadcast %cst_13 : f32 to vector<8x128xf32>
    %13 = arith.select %9, %11, %12 : vector<8x128xi1>, vector<8x128xf32>
    %cst_14 = arith.constant 0.000000e+00 : f32
    %14 = vector.broadcast %cst_14 : f32 to vector<16x128xf32>
    %15 = arith.cmpf one, %7, %14 : vector<16x128xf32>
    %cst_15 = arith.constant 1.000000e+00 : f32
    %16 = vector.broadcast %cst_15 : f32 to vector<16x128xf32>
    %17 = arith.divf %16, %7 : vector<16x128xf32>
    %cst_16 = arith.constant 0.000000e+00 : f32
    %18 = vector.broadcast %cst_16 : f32 to vector<16x128xf32>
    %19 = arith.select %15, %17, %18 : vector<16x128xi1>, vector<16x128xf32>
    %cst_17 = arith.constant 1.000000e+00 : f32
    %20 = vector.broadcast %cst_17 : f32 to vector<16x128xf32>
    %21 = arith.maximumf %7, %20 : vector<16x128xf32>
    %cst_18 = arith.constant 1.000000e+00 : f32
    %22 = vector.broadcast %cst_18 : f32 to vector<16x128xf32>
    %23 = arith.divf %22, %21 : vector<16x128xf32>
    %cst_19 = arith.constant 0.000000e+00 : f32
    %24 = vector.broadcast %cst_19 : f32 to vector<16x8x128xf32>
    %25 = vector.extract_strided_slice %1 {offsets = [0, 0, 0], sizes = [1, 16, 128], strides = [1, 1, 1]} : vector<8x16x128xf32> to vector<1x16x128xf32>
    %26 = vector.shape_cast %25 : vector<1x16x128xf32> to vector<16x128xf32>
    %27 = vector.shape_cast %26 : vector<16x128xf32> to vector<16x1x128xf32>
    %28 = vector.extract_strided_slice %0 {offsets = [0, 0, 0], sizes = [1, 8, 128], strides = [1, 1, 1]} : vector<8x8x128xf32> to vector<1x8x128xf32>
    %29 = vector.shape_cast %28 : vector<1x8x128xf32> to vector<8x128xf32>
    %30 = vector.shape_cast %29 : vector<8x128xf32> to vector<1x8x128xf32>
    %31 = vector.broadcast %27 : vector<16x1x128xf32> to vector<16x8x128xf32>
    %32 = vector.broadcast %30 : vector<1x8x128xf32> to vector<16x8x128xf32>
    %33 = arith.mulf %31, %32 : vector<16x8x128xf32>
    %34 = arith.addf %24, %33 : vector<16x8x128xf32>
    %35 = vector.extract_strided_slice %1 {offsets = [1, 0, 0], sizes = [1, 16, 128], strides = [1, 1, 1]} : vector<8x16x128xf32> to vector<1x16x128xf32>
    %36 = vector.shape_cast %35 : vector<1x16x128xf32> to vector<16x128xf32>
    %37 = vector.shape_cast %36 : vector<16x128xf32> to vector<16x1x128xf32>
    %38 = vector.extract_strided_slice %0 {offsets = [1, 0, 0], sizes = [1, 8, 128], strides = [1, 1, 1]} : vector<8x8x128xf32> to vector<1x8x128xf32>
    %39 = vector.shape_cast %38 : vector<1x8x128xf32> to vector<8x128xf32>
    %40 = vector.shape_cast %39 : vector<8x128xf32> to vector<1x8x128xf32>
    %41 = vector.broadcast %37 : vector<16x1x128xf32> to vector<16x8x128xf32>
    %42 = vector.broadcast %40 : vector<1x8x128xf32> to vector<16x8x128xf32>
    %43 = arith.mulf %41, %42 : vector<16x8x128xf32>
    %44 = arith.addf %34, %43 : vector<16x8x128xf32>
    %45 = vector.extract_strided_slice %1 {offsets = [2, 0, 0], sizes = [1, 16, 128], strides = [1, 1, 1]} : vector<8x16x128xf32> to vector<1x16x128xf32>
    %46 = vector.shape_cast %45 : vector<1x16x128xf32> to vector<16x128xf32>
    %47 = vector.shape_cast %46 : vector<16x128xf32> to vector<16x1x128xf32>
    %48 = vector.extract_strided_slice %0 {offsets = [2, 0, 0], sizes = [1, 8, 128], strides = [1, 1, 1]} : vector<8x8x128xf32> to vector<1x8x128xf32>
    %49 = vector.shape_cast %48 : vector<1x8x128xf32> to vector<8x128xf32>
    %50 = vector.shape_cast %49 : vector<8x128xf32> to vector<1x8x128xf32>
    %51 = vector.broadcast %47 : vector<16x1x128xf32> to vector<16x8x128xf32>
    %52 = vector.broadcast %50 : vector<1x8x128xf32> to vector<16x8x128xf32>
    %53 = arith.mulf %51, %52 : vector<16x8x128xf32>
    %54 = arith.addf %44, %53 : vector<16x8x128xf32>
    %55 = vector.extract_strided_slice %1 {offsets = [3, 0, 0], sizes = [1, 16, 128], strides = [1, 1, 1]} : vector<8x16x128xf32> to vector<1x16x128xf32>
    %56 = vector.shape_cast %55 : vector<1x16x128xf32> to vector<16x128xf32>
    %57 = vector.shape_cast %56 : vector<16x128xf32> to vector<16x1x128xf32>
    %58 = vector.extract_strided_slice %0 {offsets = [3, 0, 0], sizes = [1, 8, 128], strides = [1, 1, 1]} : vector<8x8x128xf32> to vector<1x8x128xf32>
    %59 = vector.shape_cast %58 : vector<1x8x128xf32> to vector<8x128xf32>
    %60 = vector.shape_cast %59 : vector<8x128xf32> to vector<1x8x128xf32>
    %61 = vector.broadcast %57 : vector<16x1x128xf32> to vector<16x8x128xf32>
    %62 = vector.broadcast %60 : vector<1x8x128xf32> to vector<16x8x128xf32>
    %63 = arith.mulf %61, %62 : vector<16x8x128xf32>
    %64 = arith.addf %54, %63 : vector<16x8x128xf32>
    %65 = vector.extract_strided_slice %1 {offsets = [4, 0, 0], sizes = [1, 16, 128], strides = [1, 1, 1]} : vector<8x16x128xf32> to vector<1x16x128xf32>
    %66 = vector.shape_cast %65 : vector<1x16x128xf32> to vector<16x128xf32>
    %67 = vector.shape_cast %66 : vector<16x128xf32> to vector<16x1x128xf32>
    %68 = vector.extract_strided_slice %0 {offsets = [4, 0, 0], sizes = [1, 8, 128], strides = [1, 1, 1]} : vector<8x8x128xf32> to vector<1x8x128xf32>
    %69 = vector.shape_cast %68 : vector<1x8x128xf32> to vector<8x128xf32>
    %70 = vector.shape_cast %69 : vector<8x128xf32> to vector<1x8x128xf32>
    %71 = vector.broadcast %67 : vector<16x1x128xf32> to vector<16x8x128xf32>
    %72 = vector.broadcast %70 : vector<1x8x128xf32> to vector<16x8x128xf32>
    %73 = arith.mulf %71, %72 : vector<16x8x128xf32>
    %74 = arith.addf %64, %73 : vector<16x8x128xf32>
    %75 = vector.extract_strided_slice %1 {offsets = [5, 0, 0], sizes = [1, 16, 128], strides = [1, 1, 1]} : vector<8x16x128xf32> to vector<1x16x128xf32>
    %76 = vector.shape_cast %75 : vector<1x16x128xf32> to vector<16x128xf32>
    %77 = vector.shape_cast %76 : vector<16x128xf32> to vector<16x1x128xf32>
    %78 = vector.extract_strided_slice %0 {offsets = [5, 0, 0], sizes = [1, 8, 128], strides = [1, 1, 1]} : vector<8x8x128xf32> to vector<1x8x128xf32>
    %79 = vector.shape_cast %78 : vector<1x8x128xf32> to vector<8x128xf32>
    %80 = vector.shape_cast %79 : vector<8x128xf32> to vector<1x8x128xf32>
    %81 = vector.broadcast %77 : vector<16x1x128xf32> to vector<16x8x128xf32>
    %82 = vector.broadcast %80 : vector<1x8x128xf32> to vector<16x8x128xf32>
    %83 = arith.mulf %81, %82 : vector<16x8x128xf32>
    %84 = arith.addf %74, %83 : vector<16x8x128xf32>
    %85 = vector.extract_strided_slice %1 {offsets = [6, 0, 0], sizes = [1, 16, 128], strides = [1, 1, 1]} : vector<8x16x128xf32> to vector<1x16x128xf32>
    %86 = vector.shape_cast %85 : vector<1x16x128xf32> to vector<16x128xf32>
    %87 = vector.shape_cast %86 : vector<16x128xf32> to vector<16x1x128xf32>
    %88 = vector.extract_strided_slice %0 {offsets = [6, 0, 0], sizes = [1, 8, 128], strides = [1, 1, 1]} : vector<8x8x128xf32> to vector<1x8x128xf32>
    %89 = vector.shape_cast %88 : vector<1x8x128xf32> to vector<8x128xf32>
    %90 = vector.shape_cast %89 : vector<8x128xf32> to vector<1x8x128xf32>
    %91 = vector.broadcast %87 : vector<16x1x128xf32> to vector<16x8x128xf32>
    %92 = vector.broadcast %90 : vector<1x8x128xf32> to vector<16x8x128xf32>
    %93 = arith.mulf %91, %92 : vector<16x8x128xf32>
    %94 = arith.addf %84, %93 : vector<16x8x128xf32>
    %95 = vector.extract_strided_slice %1 {offsets = [7, 0, 0], sizes = [1, 16, 128], strides = [1, 1, 1]} : vector<8x16x128xf32> to vector<1x16x128xf32>
    %96 = vector.shape_cast %95 : vector<1x16x128xf32> to vector<16x128xf32>
    %97 = vector.shape_cast %96 : vector<16x128xf32> to vector<16x1x128xf32>
    %98 = vector.extract_strided_slice %0 {offsets = [7, 0, 0], sizes = [1, 8, 128], strides = [1, 1, 1]} : vector<8x8x128xf32> to vector<1x8x128xf32>
    %99 = vector.shape_cast %98 : vector<1x8x128xf32> to vector<8x128xf32>
    %100 = vector.shape_cast %99 : vector<8x128xf32> to vector<1x8x128xf32>
    %101 = vector.broadcast %97 : vector<16x1x128xf32> to vector<16x8x128xf32>
    %102 = vector.broadcast %100 : vector<1x8x128xf32> to vector<16x8x128xf32>
    %103 = arith.mulf %101, %102 : vector<16x8x128xf32>
    %104 = arith.addf %94, %103 : vector<16x8x128xf32>
    %cst_20 = arith.constant 0.000000e+00 : f32
    %105 = vector.broadcast %cst_20 : f32 to vector<8x8x128xf32>
    %106 = vector.extract_strided_slice %104 {offsets = [0, 0, 0], sizes = [1, 8, 128], strides = [1, 1, 1]} : vector<16x8x128xf32> to vector<1x8x128xf32>
    %107 = vector.shape_cast %106 : vector<1x8x128xf32> to vector<8x128xf32>
    %108 = vector.extract_strided_slice %23 {offsets = [0, 0], sizes = [1, 128], strides = [1, 1]} : vector<16x128xf32> to vector<1x128xf32>
    %109 = vector.shape_cast %108 : vector<1x128xf32> to vector<128xf32>
    %110 = vector.shape_cast %109 : vector<128xf32> to vector<1x128xf32>
    %111 = vector.broadcast %110 : vector<1x128xf32> to vector<8x128xf32>
    %112 = arith.mulf %107, %111 : vector<8x128xf32>
    %cst_21 = arith.constant dense<0.000000e+00> : vector<8x128xf32>
    %113 = tpu.matmul %2, %112, %cst_21 {dimension_numbers = #tpu.dot_dimension_numbers<[1], [0], [0], [1], [0, 0, 1, 1], [], []>} : vector<8x8xf32>, vector<8x128xf32>, vector<8x128xf32> -> vector<8x128xf32>
    %114 = vector.broadcast %3 : vector<8x1xf32> to vector<8x128xf32>
    %115 = arith.addf %113, %114 : vector<8x128xf32>
    %cst_22 = arith.constant 0.000000e+00 : f32
    %116 = vector.broadcast %cst_22 : f32 to vector<8x128xf32>
    %117 = arith.cmpf ogt, %115, %116 : vector<8x128xf32>
    %cst_23 = arith.constant 2.000000e-01 : f32
    %118 = vector.broadcast %cst_23 : f32 to vector<8x128xf32>
    %119 = arith.mulf %118, %115 : vector<8x128xf32>
    %120 = arith.select %117, %115, %119 : vector<8x128xi1>, vector<8x128xf32>
    %cst_24 = arith.constant dense<0.000000e+00> : vector<8x128xf32>
    %121 = tpu.matmul %4, %120, %cst_24 {dimension_numbers = #tpu.dot_dimension_numbers<[1], [0], [0], [1], [0, 0, 1, 1], [], []>} : vector<8x8xf32>, vector<8x128xf32>, vector<8x128xf32> -> vector<8x128xf32>
    %122 = vector.extract_strided_slice %121 {offsets = [0, 0], sizes = [1, 128], strides = [1, 1]} : vector<8x128xf32> to vector<1x128xf32>
    %123 = vector.broadcast %5 : vector<1x1xf32> to vector<1x128xf32>
    %124 = arith.addf %122, %123 : vector<1x128xf32>
    %125 = arith.negf %124 : vector<1x128xf32>
    %126 = math.exp %125 : vector<1x128xf32>
    %cst_25 = arith.constant 1.000000e+00 : f32
    %127 = vector.broadcast %cst_25 : f32 to vector<1x128xf32>
    %128 = arith.addf %127, %126 : vector<1x128xf32>
    %129 = arith.divf %127, %128 : vector<1x128xf32>
    %130 = vector.extract_strided_slice %19 {offsets = [0, 0], sizes = [1, 128], strides = [1, 1]} : vector<16x128xf32> to vector<1x128xf32>
    %131 = vector.shape_cast %130 : vector<1x128xf32> to vector<128xf32>
    %132 = vector.shape_cast %131 : vector<128xf32> to vector<1x128xf32>
    %133 = arith.mulf %129, %132 : vector<1x128xf32>
    %134 = vector.broadcast %133 : vector<1x128xf32> to vector<8x128xf32>
    %135 = arith.mulf %134, %107 : vector<8x128xf32>
    %136 = vector.extract_strided_slice %1 {offsets = [0, 0, 0], sizes = [8, 1, 128], strides = [1, 1, 1]} : vector<8x16x128xf32> to vector<8x1x128xf32>
    %137 = vector.shape_cast %136 : vector<8x1x128xf32> to vector<8x128xf32>
    %138 = vector.shape_cast %137 : vector<8x128xf32> to vector<8x1x128xf32>
    %139 = vector.shape_cast %135 : vector<8x128xf32> to vector<1x8x128xf32>
    %140 = vector.broadcast %138 : vector<8x1x128xf32> to vector<8x8x128xf32>
    %141 = vector.broadcast %139 : vector<1x8x128xf32> to vector<8x8x128xf32>
    %142 = arith.mulf %140, %141 : vector<8x8x128xf32>
    %143 = arith.addf %105, %142 : vector<8x8x128xf32>
    %144 = vector.extract_strided_slice %104 {offsets = [1, 0, 0], sizes = [1, 8, 128], strides = [1, 1, 1]} : vector<16x8x128xf32> to vector<1x8x128xf32>
    %145 = vector.shape_cast %144 : vector<1x8x128xf32> to vector<8x128xf32>
    %146 = vector.extract_strided_slice %23 {offsets = [1, 0], sizes = [1, 128], strides = [1, 1]} : vector<16x128xf32> to vector<1x128xf32>
    %147 = vector.shape_cast %146 : vector<1x128xf32> to vector<128xf32>
    %148 = vector.shape_cast %147 : vector<128xf32> to vector<1x128xf32>
    %149 = vector.broadcast %148 : vector<1x128xf32> to vector<8x128xf32>
    %150 = arith.mulf %145, %149 : vector<8x128xf32>
    %cst_26 = arith.constant dense<0.000000e+00> : vector<8x128xf32>
    %151 = tpu.matmul %2, %150, %cst_26 {dimension_numbers = #tpu.dot_dimension_numbers<[1], [0], [0], [1], [0, 0, 1, 1], [], []>} : vector<8x8xf32>, vector<8x128xf32>, vector<8x128xf32> -> vector<8x128xf32>
    %152 = vector.broadcast %3 : vector<8x1xf32> to vector<8x128xf32>
    %153 = arith.addf %151, %152 : vector<8x128xf32>
    %cst_27 = arith.constant 0.000000e+00 : f32
    %154 = vector.broadcast %cst_27 : f32 to vector<8x128xf32>
    %155 = arith.cmpf ogt, %153, %154 : vector<8x128xf32>
    %cst_28 = arith.constant 2.000000e-01 : f32
    %156 = vector.broadcast %cst_28 : f32 to vector<8x128xf32>
    %157 = arith.mulf %156, %153 : vector<8x128xf32>
    %158 = arith.select %155, %153, %157 : vector<8x128xi1>, vector<8x128xf32>
    %cst_29 = arith.constant dense<0.000000e+00> : vector<8x128xf32>
    %159 = tpu.matmul %4, %158, %cst_29 {dimension_numbers = #tpu.dot_dimension_numbers<[1], [0], [0], [1], [0, 0, 1, 1], [], []>} : vector<8x8xf32>, vector<8x128xf32>, vector<8x128xf32> -> vector<8x128xf32>
    %160 = vector.extract_strided_slice %159 {offsets = [0, 0], sizes = [1, 128], strides = [1, 1]} : vector<8x128xf32> to vector<1x128xf32>
    %161 = vector.broadcast %5 : vector<1x1xf32> to vector<1x128xf32>
    %162 = arith.addf %160, %161 : vector<1x128xf32>
    %163 = arith.negf %162 : vector<1x128xf32>
    %164 = math.exp %163 : vector<1x128xf32>
    %cst_30 = arith.constant 1.000000e+00 : f32
    %165 = vector.broadcast %cst_30 : f32 to vector<1x128xf32>
    %166 = arith.addf %165, %164 : vector<1x128xf32>
    %167 = arith.divf %165, %166 : vector<1x128xf32>
    %168 = vector.extract_strided_slice %19 {offsets = [1, 0], sizes = [1, 128], strides = [1, 1]} : vector<16x128xf32> to vector<1x128xf32>
    %169 = vector.shape_cast %168 : vector<1x128xf32> to vector<128xf32>
    %170 = vector.shape_cast %169 : vector<128xf32> to vector<1x128xf32>
    %171 = arith.mulf %167, %170 : vector<1x128xf32>
    %172 = vector.broadcast %171 : vector<1x128xf32> to vector<8x128xf32>
    %173 = arith.mulf %172, %145 : vector<8x128xf32>
    %174 = vector.extract_strided_slice %1 {offsets = [0, 1, 0], sizes = [8, 1, 128], strides = [1, 1, 1]} : vector<8x16x128xf32> to vector<8x1x128xf32>
    %175 = vector.shape_cast %174 : vector<8x1x128xf32> to vector<8x128xf32>
    %176 = vector.shape_cast %175 : vector<8x128xf32> to vector<8x1x128xf32>
    %177 = vector.shape_cast %173 : vector<8x128xf32> to vector<1x8x128xf32>
    %178 = vector.broadcast %176 : vector<8x1x128xf32> to vector<8x8x128xf32>
    %179 = vector.broadcast %177 : vector<1x8x128xf32> to vector<8x8x128xf32>
    %180 = arith.mulf %178, %179 : vector<8x8x128xf32>
    %181 = arith.addf %143, %180 : vector<8x8x128xf32>
    %182 = vector.extract_strided_slice %104 {offsets = [2, 0, 0], sizes = [1, 8, 128], strides = [1, 1, 1]} : vector<16x8x128xf32> to vector<1x8x128xf32>
    %183 = vector.shape_cast %182 : vector<1x8x128xf32> to vector<8x128xf32>
    %184 = vector.extract_strided_slice %23 {offsets = [2, 0], sizes = [1, 128], strides = [1, 1]} : vector<16x128xf32> to vector<1x128xf32>
    %185 = vector.shape_cast %184 : vector<1x128xf32> to vector<128xf32>
    %186 = vector.shape_cast %185 : vector<128xf32> to vector<1x128xf32>
    %187 = vector.broadcast %186 : vector<1x128xf32> to vector<8x128xf32>
    %188 = arith.mulf %183, %187 : vector<8x128xf32>
    %cst_31 = arith.constant dense<0.000000e+00> : vector<8x128xf32>
    %189 = tpu.matmul %2, %188, %cst_31 {dimension_numbers = #tpu.dot_dimension_numbers<[1], [0], [0], [1], [0, 0, 1, 1], [], []>} : vector<8x8xf32>, vector<8x128xf32>, vector<8x128xf32> -> vector<8x128xf32>
    %190 = vector.broadcast %3 : vector<8x1xf32> to vector<8x128xf32>
    %191 = arith.addf %189, %190 : vector<8x128xf32>
    %cst_32 = arith.constant 0.000000e+00 : f32
    %192 = vector.broadcast %cst_32 : f32 to vector<8x128xf32>
    %193 = arith.cmpf ogt, %191, %192 : vector<8x128xf32>
    %cst_33 = arith.constant 2.000000e-01 : f32
    %194 = vector.broadcast %cst_33 : f32 to vector<8x128xf32>
    %195 = arith.mulf %194, %191 : vector<8x128xf32>
    %196 = arith.select %193, %191, %195 : vector<8x128xi1>, vector<8x128xf32>
    %cst_34 = arith.constant dense<0.000000e+00> : vector<8x128xf32>
    %197 = tpu.matmul %4, %196, %cst_34 {dimension_numbers = #tpu.dot_dimension_numbers<[1], [0], [0], [1], [0, 0, 1, 1], [], []>} : vector<8x8xf32>, vector<8x128xf32>, vector<8x128xf32> -> vector<8x128xf32>
    %198 = vector.extract_strided_slice %197 {offsets = [0, 0], sizes = [1, 128], strides = [1, 1]} : vector<8x128xf32> to vector<1x128xf32>
    %199 = vector.broadcast %5 : vector<1x1xf32> to vector<1x128xf32>
    %200 = arith.addf %198, %199 : vector<1x128xf32>
    %201 = arith.negf %200 : vector<1x128xf32>
    %202 = math.exp %201 : vector<1x128xf32>
    %cst_35 = arith.constant 1.000000e+00 : f32
    %203 = vector.broadcast %cst_35 : f32 to vector<1x128xf32>
    %204 = arith.addf %203, %202 : vector<1x128xf32>
    %205 = arith.divf %203, %204 : vector<1x128xf32>
    %206 = vector.extract_strided_slice %19 {offsets = [2, 0], sizes = [1, 128], strides = [1, 1]} : vector<16x128xf32> to vector<1x128xf32>
    %207 = vector.shape_cast %206 : vector<1x128xf32> to vector<128xf32>
    %208 = vector.shape_cast %207 : vector<128xf32> to vector<1x128xf32>
    %209 = arith.mulf %205, %208 : vector<1x128xf32>
    %210 = vector.broadcast %209 : vector<1x128xf32> to vector<8x128xf32>
    %211 = arith.mulf %210, %183 : vector<8x128xf32>
    %212 = vector.extract_strided_slice %1 {offsets = [0, 2, 0], sizes = [8, 1, 128], strides = [1, 1, 1]} : vector<8x16x128xf32> to vector<8x1x128xf32>
    %213 = vector.shape_cast %212 : vector<8x1x128xf32> to vector<8x128xf32>
    %214 = vector.shape_cast %213 : vector<8x128xf32> to vector<8x1x128xf32>
    %215 = vector.shape_cast %211 : vector<8x128xf32> to vector<1x8x128xf32>
    %216 = vector.broadcast %214 : vector<8x1x128xf32> to vector<8x8x128xf32>
    %217 = vector.broadcast %215 : vector<1x8x128xf32> to vector<8x8x128xf32>
    %218 = arith.mulf %216, %217 : vector<8x8x128xf32>
    %219 = arith.addf %181, %218 : vector<8x8x128xf32>
    %220 = vector.extract_strided_slice %104 {offsets = [3, 0, 0], sizes = [1, 8, 128], strides = [1, 1, 1]} : vector<16x8x128xf32> to vector<1x8x128xf32>
    %221 = vector.shape_cast %220 : vector<1x8x128xf32> to vector<8x128xf32>
    %222 = vector.extract_strided_slice %23 {offsets = [3, 0], sizes = [1, 128], strides = [1, 1]} : vector<16x128xf32> to vector<1x128xf32>
    %223 = vector.shape_cast %222 : vector<1x128xf32> to vector<128xf32>
    %224 = vector.shape_cast %223 : vector<128xf32> to vector<1x128xf32>
    %225 = vector.broadcast %224 : vector<1x128xf32> to vector<8x128xf32>
    %226 = arith.mulf %221, %225 : vector<8x128xf32>
    %cst_36 = arith.constant dense<0.000000e+00> : vector<8x128xf32>
    %227 = tpu.matmul %2, %226, %cst_36 {dimension_numbers = #tpu.dot_dimension_numbers<[1], [0], [0], [1], [0, 0, 1, 1], [], []>} : vector<8x8xf32>, vector<8x128xf32>, vector<8x128xf32> -> vector<8x128xf32>
    %228 = vector.broadcast %3 : vector<8x1xf32> to vector<8x128xf32>
    %229 = arith.addf %227, %228 : vector<8x128xf32>
    %cst_37 = arith.constant 0.000000e+00 : f32
    %230 = vector.broadcast %cst_37 : f32 to vector<8x128xf32>
    %231 = arith.cmpf ogt, %229, %230 : vector<8x128xf32>
    %cst_38 = arith.constant 2.000000e-01 : f32
    %232 = vector.broadcast %cst_38 : f32 to vector<8x128xf32>
    %233 = arith.mulf %232, %229 : vector<8x128xf32>
    %234 = arith.select %231, %229, %233 : vector<8x128xi1>, vector<8x128xf32>
    %cst_39 = arith.constant dense<0.000000e+00> : vector<8x128xf32>
    %235 = tpu.matmul %4, %234, %cst_39 {dimension_numbers = #tpu.dot_dimension_numbers<[1], [0], [0], [1], [0, 0, 1, 1], [], []>} : vector<8x8xf32>, vector<8x128xf32>, vector<8x128xf32> -> vector<8x128xf32>
    %236 = vector.extract_strided_slice %235 {offsets = [0, 0], sizes = [1, 128], strides = [1, 1]} : vector<8x128xf32> to vector<1x128xf32>
    %237 = vector.broadcast %5 : vector<1x1xf32> to vector<1x128xf32>
    %238 = arith.addf %236, %237 : vector<1x128xf32>
    %239 = arith.negf %238 : vector<1x128xf32>
    %240 = math.exp %239 : vector<1x128xf32>
    %cst_40 = arith.constant 1.000000e+00 : f32
    %241 = vector.broadcast %cst_40 : f32 to vector<1x128xf32>
    %242 = arith.addf %241, %240 : vector<1x128xf32>
    %243 = arith.divf %241, %242 : vector<1x128xf32>
    %244 = vector.extract_strided_slice %19 {offsets = [3, 0], sizes = [1, 128], strides = [1, 1]} : vector<16x128xf32> to vector<1x128xf32>
    %245 = vector.shape_cast %244 : vector<1x128xf32> to vector<128xf32>
    %246 = vector.shape_cast %245 : vector<128xf32> to vector<1x128xf32>
    %247 = arith.mulf %243, %246 : vector<1x128xf32>
    %248 = vector.broadcast %247 : vector<1x128xf32> to vector<8x128xf32>
    %249 = arith.mulf %248, %221 : vector<8x128xf32>
    %250 = vector.extract_strided_slice %1 {offsets = [0, 3, 0], sizes = [8, 1, 128], strides = [1, 1, 1]} : vector<8x16x128xf32> to vector<8x1x128xf32>
    %251 = vector.shape_cast %250 : vector<8x1x128xf32> to vector<8x128xf32>
    %252 = vector.shape_cast %251 : vector<8x128xf32> to vector<8x1x128xf32>
    %253 = vector.shape_cast %249 : vector<8x128xf32> to vector<1x8x128xf32>
    %254 = vector.broadcast %252 : vector<8x1x128xf32> to vector<8x8x128xf32>
    %255 = vector.broadcast %253 : vector<1x8x128xf32> to vector<8x8x128xf32>
    %256 = arith.mulf %254, %255 : vector<8x8x128xf32>
    %257 = arith.addf %219, %256 : vector<8x8x128xf32>
    %258 = vector.extract_strided_slice %104 {offsets = [4, 0, 0], sizes = [1, 8, 128], strides = [1, 1, 1]} : vector<16x8x128xf32> to vector<1x8x128xf32>
    %259 = vector.shape_cast %258 : vector<1x8x128xf32> to vector<8x128xf32>
    %260 = vector.extract_strided_slice %23 {offsets = [4, 0], sizes = [1, 128], strides = [1, 1]} : vector<16x128xf32> to vector<1x128xf32>
    %261 = vector.shape_cast %260 : vector<1x128xf32> to vector<128xf32>
    %262 = vector.shape_cast %261 : vector<128xf32> to vector<1x128xf32>
    %263 = vector.broadcast %262 : vector<1x128xf32> to vector<8x128xf32>
    %264 = arith.mulf %259, %263 : vector<8x128xf32>
    %cst_41 = arith.constant dense<0.000000e+00> : vector<8x128xf32>
    %265 = tpu.matmul %2, %264, %cst_41 {dimension_numbers = #tpu.dot_dimension_numbers<[1], [0], [0], [1], [0, 0, 1, 1], [], []>} : vector<8x8xf32>, vector<8x128xf32>, vector<8x128xf32> -> vector<8x128xf32>
    %266 = vector.broadcast %3 : vector<8x1xf32> to vector<8x128xf32>
    %267 = arith.addf %265, %266 : vector<8x128xf32>
    %cst_42 = arith.constant 0.000000e+00 : f32
    %268 = vector.broadcast %cst_42 : f32 to vector<8x128xf32>
    %269 = arith.cmpf ogt, %267, %268 : vector<8x128xf32>
    %cst_43 = arith.constant 2.000000e-01 : f32
    %270 = vector.broadcast %cst_43 : f32 to vector<8x128xf32>
    %271 = arith.mulf %270, %267 : vector<8x128xf32>
    %272 = arith.select %269, %267, %271 : vector<8x128xi1>, vector<8x128xf32>
    %cst_44 = arith.constant dense<0.000000e+00> : vector<8x128xf32>
    %273 = tpu.matmul %4, %272, %cst_44 {dimension_numbers = #tpu.dot_dimension_numbers<[1], [0], [0], [1], [0, 0, 1, 1], [], []>} : vector<8x8xf32>, vector<8x128xf32>, vector<8x128xf32> -> vector<8x128xf32>
    %274 = vector.extract_strided_slice %273 {offsets = [0, 0], sizes = [1, 128], strides = [1, 1]} : vector<8x128xf32> to vector<1x128xf32>
    %275 = vector.broadcast %5 : vector<1x1xf32> to vector<1x128xf32>
    %276 = arith.addf %274, %275 : vector<1x128xf32>
    %277 = arith.negf %276 : vector<1x128xf32>
    %278 = math.exp %277 : vector<1x128xf32>
    %cst_45 = arith.constant 1.000000e+00 : f32
    %279 = vector.broadcast %cst_45 : f32 to vector<1x128xf32>
    %280 = arith.addf %279, %278 : vector<1x128xf32>
    %281 = arith.divf %279, %280 : vector<1x128xf32>
    %282 = vector.extract_strided_slice %19 {offsets = [4, 0], sizes = [1, 128], strides = [1, 1]} : vector<16x128xf32> to vector<1x128xf32>
    %283 = vector.shape_cast %282 : vector<1x128xf32> to vector<128xf32>
    %284 = vector.shape_cast %283 : vector<128xf32> to vector<1x128xf32>
    %285 = arith.mulf %281, %284 : vector<1x128xf32>
    %286 = vector.broadcast %285 : vector<1x128xf32> to vector<8x128xf32>
    %287 = arith.mulf %286, %259 : vector<8x128xf32>
    %288 = vector.extract_strided_slice %1 {offsets = [0, 4, 0], sizes = [8, 1, 128], strides = [1, 1, 1]} : vector<8x16x128xf32> to vector<8x1x128xf32>
    %289 = vector.shape_cast %288 : vector<8x1x128xf32> to vector<8x128xf32>
    %290 = vector.shape_cast %289 : vector<8x128xf32> to vector<8x1x128xf32>
    %291 = vector.shape_cast %287 : vector<8x128xf32> to vector<1x8x128xf32>
    %292 = vector.broadcast %290 : vector<8x1x128xf32> to vector<8x8x128xf32>
    %293 = vector.broadcast %291 : vector<1x8x128xf32> to vector<8x8x128xf32>
    %294 = arith.mulf %292, %293 : vector<8x8x128xf32>
    %295 = arith.addf %257, %294 : vector<8x8x128xf32>
    %296 = vector.extract_strided_slice %104 {offsets = [5, 0, 0], sizes = [1, 8, 128], strides = [1, 1, 1]} : vector<16x8x128xf32> to vector<1x8x128xf32>
    %297 = vector.shape_cast %296 : vector<1x8x128xf32> to vector<8x128xf32>
    %298 = vector.extract_strided_slice %23 {offsets = [5, 0], sizes = [1, 128], strides = [1, 1]} : vector<16x128xf32> to vector<1x128xf32>
    %299 = vector.shape_cast %298 : vector<1x128xf32> to vector<128xf32>
    %300 = vector.shape_cast %299 : vector<128xf32> to vector<1x128xf32>
    %301 = vector.broadcast %300 : vector<1x128xf32> to vector<8x128xf32>
    %302 = arith.mulf %297, %301 : vector<8x128xf32>
    %cst_46 = arith.constant dense<0.000000e+00> : vector<8x128xf32>
    %303 = tpu.matmul %2, %302, %cst_46 {dimension_numbers = #tpu.dot_dimension_numbers<[1], [0], [0], [1], [0, 0, 1, 1], [], []>} : vector<8x8xf32>, vector<8x128xf32>, vector<8x128xf32> -> vector<8x128xf32>
    %304 = vector.broadcast %3 : vector<8x1xf32> to vector<8x128xf32>
    %305 = arith.addf %303, %304 : vector<8x128xf32>
    %cst_47 = arith.constant 0.000000e+00 : f32
    %306 = vector.broadcast %cst_47 : f32 to vector<8x128xf32>
    %307 = arith.cmpf ogt, %305, %306 : vector<8x128xf32>
    %cst_48 = arith.constant 2.000000e-01 : f32
    %308 = vector.broadcast %cst_48 : f32 to vector<8x128xf32>
    %309 = arith.mulf %308, %305 : vector<8x128xf32>
    %310 = arith.select %307, %305, %309 : vector<8x128xi1>, vector<8x128xf32>
    %cst_49 = arith.constant dense<0.000000e+00> : vector<8x128xf32>
    %311 = tpu.matmul %4, %310, %cst_49 {dimension_numbers = #tpu.dot_dimension_numbers<[1], [0], [0], [1], [0, 0, 1, 1], [], []>} : vector<8x8xf32>, vector<8x128xf32>, vector<8x128xf32> -> vector<8x128xf32>
    %312 = vector.extract_strided_slice %311 {offsets = [0, 0], sizes = [1, 128], strides = [1, 1]} : vector<8x128xf32> to vector<1x128xf32>
    %313 = vector.broadcast %5 : vector<1x1xf32> to vector<1x128xf32>
    %314 = arith.addf %312, %313 : vector<1x128xf32>
    %315 = arith.negf %314 : vector<1x128xf32>
    %316 = math.exp %315 : vector<1x128xf32>
    %cst_50 = arith.constant 1.000000e+00 : f32
    %317 = vector.broadcast %cst_50 : f32 to vector<1x128xf32>
    %318 = arith.addf %317, %316 : vector<1x128xf32>
    %319 = arith.divf %317, %318 : vector<1x128xf32>
    %320 = vector.extract_strided_slice %19 {offsets = [5, 0], sizes = [1, 128], strides = [1, 1]} : vector<16x128xf32> to vector<1x128xf32>
    %321 = vector.shape_cast %320 : vector<1x128xf32> to vector<128xf32>
    %322 = vector.shape_cast %321 : vector<128xf32> to vector<1x128xf32>
    %323 = arith.mulf %319, %322 : vector<1x128xf32>
    %324 = vector.broadcast %323 : vector<1x128xf32> to vector<8x128xf32>
    %325 = arith.mulf %324, %297 : vector<8x128xf32>
    %326 = vector.extract_strided_slice %1 {offsets = [0, 5, 0], sizes = [8, 1, 128], strides = [1, 1, 1]} : vector<8x16x128xf32> to vector<8x1x128xf32>
    %327 = vector.shape_cast %326 : vector<8x1x128xf32> to vector<8x128xf32>
    %328 = vector.shape_cast %327 : vector<8x128xf32> to vector<8x1x128xf32>
    %329 = vector.shape_cast %325 : vector<8x128xf32> to vector<1x8x128xf32>
    %330 = vector.broadcast %328 : vector<8x1x128xf32> to vector<8x8x128xf32>
    %331 = vector.broadcast %329 : vector<1x8x128xf32> to vector<8x8x128xf32>
    %332 = arith.mulf %330, %331 : vector<8x8x128xf32>
    %333 = arith.addf %295, %332 : vector<8x8x128xf32>
    %334 = vector.extract_strided_slice %104 {offsets = [6, 0, 0], sizes = [1, 8, 128], strides = [1, 1, 1]} : vector<16x8x128xf32> to vector<1x8x128xf32>
    %335 = vector.shape_cast %334 : vector<1x8x128xf32> to vector<8x128xf32>
    %336 = vector.extract_strided_slice %23 {offsets = [6, 0], sizes = [1, 128], strides = [1, 1]} : vector<16x128xf32> to vector<1x128xf32>
    %337 = vector.shape_cast %336 : vector<1x128xf32> to vector<128xf32>
    %338 = vector.shape_cast %337 : vector<128xf32> to vector<1x128xf32>
    %339 = vector.broadcast %338 : vector<1x128xf32> to vector<8x128xf32>
    %340 = arith.mulf %335, %339 : vector<8x128xf32>
    %cst_51 = arith.constant dense<0.000000e+00> : vector<8x128xf32>
    %341 = tpu.matmul %2, %340, %cst_51 {dimension_numbers = #tpu.dot_dimension_numbers<[1], [0], [0], [1], [0, 0, 1, 1], [], []>} : vector<8x8xf32>, vector<8x128xf32>, vector<8x128xf32> -> vector<8x128xf32>
    %342 = vector.broadcast %3 : vector<8x1xf32> to vector<8x128xf32>
    %343 = arith.addf %341, %342 : vector<8x128xf32>
    %cst_52 = arith.constant 0.000000e+00 : f32
    %344 = vector.broadcast %cst_52 : f32 to vector<8x128xf32>
    %345 = arith.cmpf ogt, %343, %344 : vector<8x128xf32>
    %cst_53 = arith.constant 2.000000e-01 : f32
    %346 = vector.broadcast %cst_53 : f32 to vector<8x128xf32>
    %347 = arith.mulf %346, %343 : vector<8x128xf32>
    %348 = arith.select %345, %343, %347 : vector<8x128xi1>, vector<8x128xf32>
    %cst_54 = arith.constant dense<0.000000e+00> : vector<8x128xf32>
    %349 = tpu.matmul %4, %348, %cst_54 {dimension_numbers = #tpu.dot_dimension_numbers<[1], [0], [0], [1], [0, 0, 1, 1], [], []>} : vector<8x8xf32>, vector<8x128xf32>, vector<8x128xf32> -> vector<8x128xf32>
    %350 = vector.extract_strided_slice %349 {offsets = [0, 0], sizes = [1, 128], strides = [1, 1]} : vector<8x128xf32> to vector<1x128xf32>
    %351 = vector.broadcast %5 : vector<1x1xf32> to vector<1x128xf32>
    %352 = arith.addf %350, %351 : vector<1x128xf32>
    %353 = arith.negf %352 : vector<1x128xf32>
    %354 = math.exp %353 : vector<1x128xf32>
    %cst_55 = arith.constant 1.000000e+00 : f32
    %355 = vector.broadcast %cst_55 : f32 to vector<1x128xf32>
    %356 = arith.addf %355, %354 : vector<1x128xf32>
    %357 = arith.divf %355, %356 : vector<1x128xf32>
    %358 = vector.extract_strided_slice %19 {offsets = [6, 0], sizes = [1, 128], strides = [1, 1]} : vector<16x128xf32> to vector<1x128xf32>
    %359 = vector.shape_cast %358 : vector<1x128xf32> to vector<128xf32>
    %360 = vector.shape_cast %359 : vector<128xf32> to vector<1x128xf32>
    %361 = arith.mulf %357, %360 : vector<1x128xf32>
    %362 = vector.broadcast %361 : vector<1x128xf32> to vector<8x128xf32>
    %363 = arith.mulf %362, %335 : vector<8x128xf32>
    %364 = vector.extract_strided_slice %1 {offsets = [0, 6, 0], sizes = [8, 1, 128], strides = [1, 1, 1]} : vector<8x16x128xf32> to vector<8x1x128xf32>
    %365 = vector.shape_cast %364 : vector<8x1x128xf32> to vector<8x128xf32>
    %366 = vector.shape_cast %365 : vector<8x128xf32> to vector<8x1x128xf32>
    %367 = vector.shape_cast %363 : vector<8x128xf32> to vector<1x8x128xf32>
    %368 = vector.broadcast %366 : vector<8x1x128xf32> to vector<8x8x128xf32>
    %369 = vector.broadcast %367 : vector<1x8x128xf32> to vector<8x8x128xf32>
    %370 = arith.mulf %368, %369 : vector<8x8x128xf32>
    %371 = arith.addf %333, %370 : vector<8x8x128xf32>
    %372 = vector.extract_strided_slice %104 {offsets = [7, 0, 0], sizes = [1, 8, 128], strides = [1, 1, 1]} : vector<16x8x128xf32> to vector<1x8x128xf32>
    %373 = vector.shape_cast %372 : vector<1x8x128xf32> to vector<8x128xf32>
    %374 = vector.extract_strided_slice %23 {offsets = [7, 0], sizes = [1, 128], strides = [1, 1]} : vector<16x128xf32> to vector<1x128xf32>
    %375 = vector.shape_cast %374 : vector<1x128xf32> to vector<128xf32>
    %376 = vector.shape_cast %375 : vector<128xf32> to vector<1x128xf32>
    %377 = vector.broadcast %376 : vector<1x128xf32> to vector<8x128xf32>
    %378 = arith.mulf %373, %377 : vector<8x128xf32>
    %cst_56 = arith.constant dense<0.000000e+00> : vector<8x128xf32>
    %379 = tpu.matmul %2, %378, %cst_56 {dimension_numbers = #tpu.dot_dimension_numbers<[1], [0], [0], [1], [0, 0, 1, 1], [], []>} : vector<8x8xf32>, vector<8x128xf32>, vector<8x128xf32> -> vector<8x128xf32>
    %380 = vector.broadcast %3 : vector<8x1xf32> to vector<8x128xf32>
    %381 = arith.addf %379, %380 : vector<8x128xf32>
    %cst_57 = arith.constant 0.000000e+00 : f32
    %382 = vector.broadcast %cst_57 : f32 to vector<8x128xf32>
    %383 = arith.cmpf ogt, %381, %382 : vector<8x128xf32>
    %cst_58 = arith.constant 2.000000e-01 : f32
    %384 = vector.broadcast %cst_58 : f32 to vector<8x128xf32>
    %385 = arith.mulf %384, %381 : vector<8x128xf32>
    %386 = arith.select %383, %381, %385 : vector<8x128xi1>, vector<8x128xf32>
    %cst_59 = arith.constant dense<0.000000e+00> : vector<8x128xf32>
    %387 = tpu.matmul %4, %386, %cst_59 {dimension_numbers = #tpu.dot_dimension_numbers<[1], [0], [0], [1], [0, 0, 1, 1], [], []>} : vector<8x8xf32>, vector<8x128xf32>, vector<8x128xf32> -> vector<8x128xf32>
    %388 = vector.extract_strided_slice %387 {offsets = [0, 0], sizes = [1, 128], strides = [1, 1]} : vector<8x128xf32> to vector<1x128xf32>
    %389 = vector.broadcast %5 : vector<1x1xf32> to vector<1x128xf32>
    %390 = arith.addf %388, %389 : vector<1x128xf32>
    %391 = arith.negf %390 : vector<1x128xf32>
    %392 = math.exp %391 : vector<1x128xf32>
    %cst_60 = arith.constant 1.000000e+00 : f32
    %393 = vector.broadcast %cst_60 : f32 to vector<1x128xf32>
    %394 = arith.addf %393, %392 : vector<1x128xf32>
    %395 = arith.divf %393, %394 : vector<1x128xf32>
    %396 = vector.extract_strided_slice %19 {offsets = [7, 0], sizes = [1, 128], strides = [1, 1]} : vector<16x128xf32> to vector<1x128xf32>
    %397 = vector.shape_cast %396 : vector<1x128xf32> to vector<128xf32>
    %398 = vector.shape_cast %397 : vector<128xf32> to vector<1x128xf32>
    %399 = arith.mulf %395, %398 : vector<1x128xf32>
    %400 = vector.broadcast %399 : vector<1x128xf32> to vector<8x128xf32>
    %401 = arith.mulf %400, %373 : vector<8x128xf32>
    %402 = vector.extract_strided_slice %1 {offsets = [0, 7, 0], sizes = [8, 1, 128], strides = [1, 1, 1]} : vector<8x16x128xf32> to vector<8x1x128xf32>
    %403 = vector.shape_cast %402 : vector<8x1x128xf32> to vector<8x128xf32>
    %404 = vector.shape_cast %403 : vector<8x128xf32> to vector<8x1x128xf32>
    %405 = vector.shape_cast %401 : vector<8x128xf32> to vector<1x8x128xf32>
    %406 = vector.broadcast %404 : vector<8x1x128xf32> to vector<8x8x128xf32>
    %407 = vector.broadcast %405 : vector<1x8x128xf32> to vector<8x8x128xf32>
    %408 = arith.mulf %406, %407 : vector<8x8x128xf32>
    %409 = arith.addf %371, %408 : vector<8x8x128xf32>
    %410 = vector.extract_strided_slice %104 {offsets = [8, 0, 0], sizes = [1, 8, 128], strides = [1, 1, 1]} : vector<16x8x128xf32> to vector<1x8x128xf32>
    %411 = vector.shape_cast %410 : vector<1x8x128xf32> to vector<8x128xf32>
    %412 = vector.extract_strided_slice %23 {offsets = [8, 0], sizes = [1, 128], strides = [1, 1]} : vector<16x128xf32> to vector<1x128xf32>
    %413 = vector.shape_cast %412 : vector<1x128xf32> to vector<128xf32>
    %414 = vector.shape_cast %413 : vector<128xf32> to vector<1x128xf32>
    %415 = vector.broadcast %414 : vector<1x128xf32> to vector<8x128xf32>
    %416 = arith.mulf %411, %415 : vector<8x128xf32>
    %cst_61 = arith.constant dense<0.000000e+00> : vector<8x128xf32>
    %417 = tpu.matmul %2, %416, %cst_61 {dimension_numbers = #tpu.dot_dimension_numbers<[1], [0], [0], [1], [0, 0, 1, 1], [], []>} : vector<8x8xf32>, vector<8x128xf32>, vector<8x128xf32> -> vector<8x128xf32>
    %418 = vector.broadcast %3 : vector<8x1xf32> to vector<8x128xf32>
    %419 = arith.addf %417, %418 : vector<8x128xf32>
    %cst_62 = arith.constant 0.000000e+00 : f32
    %420 = vector.broadcast %cst_62 : f32 to vector<8x128xf32>
    %421 = arith.cmpf ogt, %419, %420 : vector<8x128xf32>
    %cst_63 = arith.constant 2.000000e-01 : f32
    %422 = vector.broadcast %cst_63 : f32 to vector<8x128xf32>
    %423 = arith.mulf %422, %419 : vector<8x128xf32>
    %424 = arith.select %421, %419, %423 : vector<8x128xi1>, vector<8x128xf32>
    %cst_64 = arith.constant dense<0.000000e+00> : vector<8x128xf32>
    %425 = tpu.matmul %4, %424, %cst_64 {dimension_numbers = #tpu.dot_dimension_numbers<[1], [0], [0], [1], [0, 0, 1, 1], [], []>} : vector<8x8xf32>, vector<8x128xf32>, vector<8x128xf32> -> vector<8x128xf32>
    %426 = vector.extract_strided_slice %425 {offsets = [0, 0], sizes = [1, 128], strides = [1, 1]} : vector<8x128xf32> to vector<1x128xf32>
    %427 = vector.broadcast %5 : vector<1x1xf32> to vector<1x128xf32>
    %428 = arith.addf %426, %427 : vector<1x128xf32>
    %429 = arith.negf %428 : vector<1x128xf32>
    %430 = math.exp %429 : vector<1x128xf32>
    %cst_65 = arith.constant 1.000000e+00 : f32
    %431 = vector.broadcast %cst_65 : f32 to vector<1x128xf32>
    %432 = arith.addf %431, %430 : vector<1x128xf32>
    %433 = arith.divf %431, %432 : vector<1x128xf32>
    %434 = vector.extract_strided_slice %19 {offsets = [8, 0], sizes = [1, 128], strides = [1, 1]} : vector<16x128xf32> to vector<1x128xf32>
    %435 = vector.shape_cast %434 : vector<1x128xf32> to vector<128xf32>
    %436 = vector.shape_cast %435 : vector<128xf32> to vector<1x128xf32>
    %437 = arith.mulf %433, %436 : vector<1x128xf32>
    %438 = vector.broadcast %437 : vector<1x128xf32> to vector<8x128xf32>
    %439 = arith.mulf %438, %411 : vector<8x128xf32>
    %440 = vector.extract_strided_slice %1 {offsets = [0, 8, 0], sizes = [8, 1, 128], strides = [1, 1, 1]} : vector<8x16x128xf32> to vector<8x1x128xf32>
    %441 = vector.shape_cast %440 : vector<8x1x128xf32> to vector<8x128xf32>
    %442 = vector.shape_cast %441 : vector<8x128xf32> to vector<8x1x128xf32>
    %443 = vector.shape_cast %439 : vector<8x128xf32> to vector<1x8x128xf32>
    %444 = vector.broadcast %442 : vector<8x1x128xf32> to vector<8x8x128xf32>
    %445 = vector.broadcast %443 : vector<1x8x128xf32> to vector<8x8x128xf32>
    %446 = arith.mulf %444, %445 : vector<8x8x128xf32>
    %447 = arith.addf %409, %446 : vector<8x8x128xf32>
    %448 = vector.extract_strided_slice %104 {offsets = [9, 0, 0], sizes = [1, 8, 128], strides = [1, 1, 1]} : vector<16x8x128xf32> to vector<1x8x128xf32>
    %449 = vector.shape_cast %448 : vector<1x8x128xf32> to vector<8x128xf32>
    %450 = vector.extract_strided_slice %23 {offsets = [9, 0], sizes = [1, 128], strides = [1, 1]} : vector<16x128xf32> to vector<1x128xf32>
    %451 = vector.shape_cast %450 : vector<1x128xf32> to vector<128xf32>
    %452 = vector.shape_cast %451 : vector<128xf32> to vector<1x128xf32>
    %453 = vector.broadcast %452 : vector<1x128xf32> to vector<8x128xf32>
    %454 = arith.mulf %449, %453 : vector<8x128xf32>
    %cst_66 = arith.constant dense<0.000000e+00> : vector<8x128xf32>
    %455 = tpu.matmul %2, %454, %cst_66 {dimension_numbers = #tpu.dot_dimension_numbers<[1], [0], [0], [1], [0, 0, 1, 1], [], []>} : vector<8x8xf32>, vector<8x128xf32>, vector<8x128xf32> -> vector<8x128xf32>
    %456 = vector.broadcast %3 : vector<8x1xf32> to vector<8x128xf32>
    %457 = arith.addf %455, %456 : vector<8x128xf32>
    %cst_67 = arith.constant 0.000000e+00 : f32
    %458 = vector.broadcast %cst_67 : f32 to vector<8x128xf32>
    %459 = arith.cmpf ogt, %457, %458 : vector<8x128xf32>
    %cst_68 = arith.constant 2.000000e-01 : f32
    %460 = vector.broadcast %cst_68 : f32 to vector<8x128xf32>
    %461 = arith.mulf %460, %457 : vector<8x128xf32>
    %462 = arith.select %459, %457, %461 : vector<8x128xi1>, vector<8x128xf32>
    %cst_69 = arith.constant dense<0.000000e+00> : vector<8x128xf32>
    %463 = tpu.matmul %4, %462, %cst_69 {dimension_numbers = #tpu.dot_dimension_numbers<[1], [0], [0], [1], [0, 0, 1, 1], [], []>} : vector<8x8xf32>, vector<8x128xf32>, vector<8x128xf32> -> vector<8x128xf32>
    %464 = vector.extract_strided_slice %463 {offsets = [0, 0], sizes = [1, 128], strides = [1, 1]} : vector<8x128xf32> to vector<1x128xf32>
    %465 = vector.broadcast %5 : vector<1x1xf32> to vector<1x128xf32>
    %466 = arith.addf %464, %465 : vector<1x128xf32>
    %467 = arith.negf %466 : vector<1x128xf32>
    %468 = math.exp %467 : vector<1x128xf32>
    %cst_70 = arith.constant 1.000000e+00 : f32
    %469 = vector.broadcast %cst_70 : f32 to vector<1x128xf32>
    %470 = arith.addf %469, %468 : vector<1x128xf32>
    %471 = arith.divf %469, %470 : vector<1x128xf32>
    %472 = vector.extract_strided_slice %19 {offsets = [9, 0], sizes = [1, 128], strides = [1, 1]} : vector<16x128xf32> to vector<1x128xf32>
    %473 = vector.shape_cast %472 : vector<1x128xf32> to vector<128xf32>
    %474 = vector.shape_cast %473 : vector<128xf32> to vector<1x128xf32>
    %475 = arith.mulf %471, %474 : vector<1x128xf32>
    %476 = vector.broadcast %475 : vector<1x128xf32> to vector<8x128xf32>
    %477 = arith.mulf %476, %449 : vector<8x128xf32>
    %478 = vector.extract_strided_slice %1 {offsets = [0, 9, 0], sizes = [8, 1, 128], strides = [1, 1, 1]} : vector<8x16x128xf32> to vector<8x1x128xf32>
    %479 = vector.shape_cast %478 : vector<8x1x128xf32> to vector<8x128xf32>
    %480 = vector.shape_cast %479 : vector<8x128xf32> to vector<8x1x128xf32>
    %481 = vector.shape_cast %477 : vector<8x128xf32> to vector<1x8x128xf32>
    %482 = vector.broadcast %480 : vector<8x1x128xf32> to vector<8x8x128xf32>
    %483 = vector.broadcast %481 : vector<1x8x128xf32> to vector<8x8x128xf32>
    %484 = arith.mulf %482, %483 : vector<8x8x128xf32>
    %485 = arith.addf %447, %484 : vector<8x8x128xf32>
    %486 = vector.extract_strided_slice %104 {offsets = [10, 0, 0], sizes = [1, 8, 128], strides = [1, 1, 1]} : vector<16x8x128xf32> to vector<1x8x128xf32>
    %487 = vector.shape_cast %486 : vector<1x8x128xf32> to vector<8x128xf32>
    %488 = vector.extract_strided_slice %23 {offsets = [10, 0], sizes = [1, 128], strides = [1, 1]} : vector<16x128xf32> to vector<1x128xf32>
    %489 = vector.shape_cast %488 : vector<1x128xf32> to vector<128xf32>
    %490 = vector.shape_cast %489 : vector<128xf32> to vector<1x128xf32>
    %491 = vector.broadcast %490 : vector<1x128xf32> to vector<8x128xf32>
    %492 = arith.mulf %487, %491 : vector<8x128xf32>
    %cst_71 = arith.constant dense<0.000000e+00> : vector<8x128xf32>
    %493 = tpu.matmul %2, %492, %cst_71 {dimension_numbers = #tpu.dot_dimension_numbers<[1], [0], [0], [1], [0, 0, 1, 1], [], []>} : vector<8x8xf32>, vector<8x128xf32>, vector<8x128xf32> -> vector<8x128xf32>
    %494 = vector.broadcast %3 : vector<8x1xf32> to vector<8x128xf32>
    %495 = arith.addf %493, %494 : vector<8x128xf32>
    %cst_72 = arith.constant 0.000000e+00 : f32
    %496 = vector.broadcast %cst_72 : f32 to vector<8x128xf32>
    %497 = arith.cmpf ogt, %495, %496 : vector<8x128xf32>
    %cst_73 = arith.constant 2.000000e-01 : f32
    %498 = vector.broadcast %cst_73 : f32 to vector<8x128xf32>
    %499 = arith.mulf %498, %495 : vector<8x128xf32>
    %500 = arith.select %497, %495, %499 : vector<8x128xi1>, vector<8x128xf32>
    %cst_74 = arith.constant dense<0.000000e+00> : vector<8x128xf32>
    %501 = tpu.matmul %4, %500, %cst_74 {dimension_numbers = #tpu.dot_dimension_numbers<[1], [0], [0], [1], [0, 0, 1, 1], [], []>} : vector<8x8xf32>, vector<8x128xf32>, vector<8x128xf32> -> vector<8x128xf32>
    %502 = vector.extract_strided_slice %501 {offsets = [0, 0], sizes = [1, 128], strides = [1, 1]} : vector<8x128xf32> to vector<1x128xf32>
    %503 = vector.broadcast %5 : vector<1x1xf32> to vector<1x128xf32>
    %504 = arith.addf %502, %503 : vector<1x128xf32>
    %505 = arith.negf %504 : vector<1x128xf32>
    %506 = math.exp %505 : vector<1x128xf32>
    %cst_75 = arith.constant 1.000000e+00 : f32
    %507 = vector.broadcast %cst_75 : f32 to vector<1x128xf32>
    %508 = arith.addf %507, %506 : vector<1x128xf32>
    %509 = arith.divf %507, %508 : vector<1x128xf32>
    %510 = vector.extract_strided_slice %19 {offsets = [10, 0], sizes = [1, 128], strides = [1, 1]} : vector<16x128xf32> to vector<1x128xf32>
    %511 = vector.shape_cast %510 : vector<1x128xf32> to vector<128xf32>
    %512 = vector.shape_cast %511 : vector<128xf32> to vector<1x128xf32>
    %513 = arith.mulf %509, %512 : vector<1x128xf32>
    %514 = vector.broadcast %513 : vector<1x128xf32> to vector<8x128xf32>
    %515 = arith.mulf %514, %487 : vector<8x128xf32>
    %516 = vector.extract_strided_slice %1 {offsets = [0, 10, 0], sizes = [8, 1, 128], strides = [1, 1, 1]} : vector<8x16x128xf32> to vector<8x1x128xf32>
    %517 = vector.shape_cast %516 : vector<8x1x128xf32> to vector<8x128xf32>
    %518 = vector.shape_cast %517 : vector<8x128xf32> to vector<8x1x128xf32>
    %519 = vector.shape_cast %515 : vector<8x128xf32> to vector<1x8x128xf32>
    %520 = vector.broadcast %518 : vector<8x1x128xf32> to vector<8x8x128xf32>
    %521 = vector.broadcast %519 : vector<1x8x128xf32> to vector<8x8x128xf32>
    %522 = arith.mulf %520, %521 : vector<8x8x128xf32>
    %523 = arith.addf %485, %522 : vector<8x8x128xf32>
    %524 = vector.extract_strided_slice %104 {offsets = [11, 0, 0], sizes = [1, 8, 128], strides = [1, 1, 1]} : vector<16x8x128xf32> to vector<1x8x128xf32>
    %525 = vector.shape_cast %524 : vector<1x8x128xf32> to vector<8x128xf32>
    %526 = vector.extract_strided_slice %23 {offsets = [11, 0], sizes = [1, 128], strides = [1, 1]} : vector<16x128xf32> to vector<1x128xf32>
    %527 = vector.shape_cast %526 : vector<1x128xf32> to vector<128xf32>
    %528 = vector.shape_cast %527 : vector<128xf32> to vector<1x128xf32>
    %529 = vector.broadcast %528 : vector<1x128xf32> to vector<8x128xf32>
    %530 = arith.mulf %525, %529 : vector<8x128xf32>
    %cst_76 = arith.constant dense<0.000000e+00> : vector<8x128xf32>
    %531 = tpu.matmul %2, %530, %cst_76 {dimension_numbers = #tpu.dot_dimension_numbers<[1], [0], [0], [1], [0, 0, 1, 1], [], []>} : vector<8x8xf32>, vector<8x128xf32>, vector<8x128xf32> -> vector<8x128xf32>
    %532 = vector.broadcast %3 : vector<8x1xf32> to vector<8x128xf32>
    %533 = arith.addf %531, %532 : vector<8x128xf32>
    %cst_77 = arith.constant 0.000000e+00 : f32
    %534 = vector.broadcast %cst_77 : f32 to vector<8x128xf32>
    %535 = arith.cmpf ogt, %533, %534 : vector<8x128xf32>
    %cst_78 = arith.constant 2.000000e-01 : f32
    %536 = vector.broadcast %cst_78 : f32 to vector<8x128xf32>
    %537 = arith.mulf %536, %533 : vector<8x128xf32>
    %538 = arith.select %535, %533, %537 : vector<8x128xi1>, vector<8x128xf32>
    %cst_79 = arith.constant dense<0.000000e+00> : vector<8x128xf32>
    %539 = tpu.matmul %4, %538, %cst_79 {dimension_numbers = #tpu.dot_dimension_numbers<[1], [0], [0], [1], [0, 0, 1, 1], [], []>} : vector<8x8xf32>, vector<8x128xf32>, vector<8x128xf32> -> vector<8x128xf32>
    %540 = vector.extract_strided_slice %539 {offsets = [0, 0], sizes = [1, 128], strides = [1, 1]} : vector<8x128xf32> to vector<1x128xf32>
    %541 = vector.broadcast %5 : vector<1x1xf32> to vector<1x128xf32>
    %542 = arith.addf %540, %541 : vector<1x128xf32>
    %543 = arith.negf %542 : vector<1x128xf32>
    %544 = math.exp %543 : vector<1x128xf32>
    %cst_80 = arith.constant 1.000000e+00 : f32
    %545 = vector.broadcast %cst_80 : f32 to vector<1x128xf32>
    %546 = arith.addf %545, %544 : vector<1x128xf32>
    %547 = arith.divf %545, %546 : vector<1x128xf32>
    %548 = vector.extract_strided_slice %19 {offsets = [11, 0], sizes = [1, 128], strides = [1, 1]} : vector<16x128xf32> to vector<1x128xf32>
    %549 = vector.shape_cast %548 : vector<1x128xf32> to vector<128xf32>
    %550 = vector.shape_cast %549 : vector<128xf32> to vector<1x128xf32>
    %551 = arith.mulf %547, %550 : vector<1x128xf32>
    %552 = vector.broadcast %551 : vector<1x128xf32> to vector<8x128xf32>
    %553 = arith.mulf %552, %525 : vector<8x128xf32>
    %554 = vector.extract_strided_slice %1 {offsets = [0, 11, 0], sizes = [8, 1, 128], strides = [1, 1, 1]} : vector<8x16x128xf32> to vector<8x1x128xf32>
    %555 = vector.shape_cast %554 : vector<8x1x128xf32> to vector<8x128xf32>
    %556 = vector.shape_cast %555 : vector<8x128xf32> to vector<8x1x128xf32>
    %557 = vector.shape_cast %553 : vector<8x128xf32> to vector<1x8x128xf32>
    %558 = vector.broadcast %556 : vector<8x1x128xf32> to vector<8x8x128xf32>
    %559 = vector.broadcast %557 : vector<1x8x128xf32> to vector<8x8x128xf32>
    %560 = arith.mulf %558, %559 : vector<8x8x128xf32>
    %561 = arith.addf %523, %560 : vector<8x8x128xf32>
    %562 = vector.extract_strided_slice %104 {offsets = [12, 0, 0], sizes = [1, 8, 128], strides = [1, 1, 1]} : vector<16x8x128xf32> to vector<1x8x128xf32>
    %563 = vector.shape_cast %562 : vector<1x8x128xf32> to vector<8x128xf32>
    %564 = vector.extract_strided_slice %23 {offsets = [12, 0], sizes = [1, 128], strides = [1, 1]} : vector<16x128xf32> to vector<1x128xf32>
    %565 = vector.shape_cast %564 : vector<1x128xf32> to vector<128xf32>
    %566 = vector.shape_cast %565 : vector<128xf32> to vector<1x128xf32>
    %567 = vector.broadcast %566 : vector<1x128xf32> to vector<8x128xf32>
    %568 = arith.mulf %563, %567 : vector<8x128xf32>
    %cst_81 = arith.constant dense<0.000000e+00> : vector<8x128xf32>
    %569 = tpu.matmul %2, %568, %cst_81 {dimension_numbers = #tpu.dot_dimension_numbers<[1], [0], [0], [1], [0, 0, 1, 1], [], []>} : vector<8x8xf32>, vector<8x128xf32>, vector<8x128xf32> -> vector<8x128xf32>
    %570 = vector.broadcast %3 : vector<8x1xf32> to vector<8x128xf32>
    %571 = arith.addf %569, %570 : vector<8x128xf32>
    %cst_82 = arith.constant 0.000000e+00 : f32
    %572 = vector.broadcast %cst_82 : f32 to vector<8x128xf32>
    %573 = arith.cmpf ogt, %571, %572 : vector<8x128xf32>
    %cst_83 = arith.constant 2.000000e-01 : f32
    %574 = vector.broadcast %cst_83 : f32 to vector<8x128xf32>
    %575 = arith.mulf %574, %571 : vector<8x128xf32>
    %576 = arith.select %573, %571, %575 : vector<8x128xi1>, vector<8x128xf32>
    %cst_84 = arith.constant dense<0.000000e+00> : vector<8x128xf32>
    %577 = tpu.matmul %4, %576, %cst_84 {dimension_numbers = #tpu.dot_dimension_numbers<[1], [0], [0], [1], [0, 0, 1, 1], [], []>} : vector<8x8xf32>, vector<8x128xf32>, vector<8x128xf32> -> vector<8x128xf32>
    %578 = vector.extract_strided_slice %577 {offsets = [0, 0], sizes = [1, 128], strides = [1, 1]} : vector<8x128xf32> to vector<1x128xf32>
    %579 = vector.broadcast %5 : vector<1x1xf32> to vector<1x128xf32>
    %580 = arith.addf %578, %579 : vector<1x128xf32>
    %581 = arith.negf %580 : vector<1x128xf32>
    %582 = math.exp %581 : vector<1x128xf32>
    %cst_85 = arith.constant 1.000000e+00 : f32
    %583 = vector.broadcast %cst_85 : f32 to vector<1x128xf32>
    %584 = arith.addf %583, %582 : vector<1x128xf32>
    %585 = arith.divf %583, %584 : vector<1x128xf32>
    %586 = vector.extract_strided_slice %19 {offsets = [12, 0], sizes = [1, 128], strides = [1, 1]} : vector<16x128xf32> to vector<1x128xf32>
    %587 = vector.shape_cast %586 : vector<1x128xf32> to vector<128xf32>
    %588 = vector.shape_cast %587 : vector<128xf32> to vector<1x128xf32>
    %589 = arith.mulf %585, %588 : vector<1x128xf32>
    %590 = vector.broadcast %589 : vector<1x128xf32> to vector<8x128xf32>
    %591 = arith.mulf %590, %563 : vector<8x128xf32>
    %592 = vector.extract_strided_slice %1 {offsets = [0, 12, 0], sizes = [8, 1, 128], strides = [1, 1, 1]} : vector<8x16x128xf32> to vector<8x1x128xf32>
    %593 = vector.shape_cast %592 : vector<8x1x128xf32> to vector<8x128xf32>
    %594 = vector.shape_cast %593 : vector<8x128xf32> to vector<8x1x128xf32>
    %595 = vector.shape_cast %591 : vector<8x128xf32> to vector<1x8x128xf32>
    %596 = vector.broadcast %594 : vector<8x1x128xf32> to vector<8x8x128xf32>
    %597 = vector.broadcast %595 : vector<1x8x128xf32> to vector<8x8x128xf32>
    %598 = arith.mulf %596, %597 : vector<8x8x128xf32>
    %599 = arith.addf %561, %598 : vector<8x8x128xf32>
    %600 = vector.extract_strided_slice %104 {offsets = [13, 0, 0], sizes = [1, 8, 128], strides = [1, 1, 1]} : vector<16x8x128xf32> to vector<1x8x128xf32>
    %601 = vector.shape_cast %600 : vector<1x8x128xf32> to vector<8x128xf32>
    %602 = vector.extract_strided_slice %23 {offsets = [13, 0], sizes = [1, 128], strides = [1, 1]} : vector<16x128xf32> to vector<1x128xf32>
    %603 = vector.shape_cast %602 : vector<1x128xf32> to vector<128xf32>
    %604 = vector.shape_cast %603 : vector<128xf32> to vector<1x128xf32>
    %605 = vector.broadcast %604 : vector<1x128xf32> to vector<8x128xf32>
    %606 = arith.mulf %601, %605 : vector<8x128xf32>
    %cst_86 = arith.constant dense<0.000000e+00> : vector<8x128xf32>
    %607 = tpu.matmul %2, %606, %cst_86 {dimension_numbers = #tpu.dot_dimension_numbers<[1], [0], [0], [1], [0, 0, 1, 1], [], []>} : vector<8x8xf32>, vector<8x128xf32>, vector<8x128xf32> -> vector<8x128xf32>
    %608 = vector.broadcast %3 : vector<8x1xf32> to vector<8x128xf32>
    %609 = arith.addf %607, %608 : vector<8x128xf32>
    %cst_87 = arith.constant 0.000000e+00 : f32
    %610 = vector.broadcast %cst_87 : f32 to vector<8x128xf32>
    %611 = arith.cmpf ogt, %609, %610 : vector<8x128xf32>
    %cst_88 = arith.constant 2.000000e-01 : f32
    %612 = vector.broadcast %cst_88 : f32 to vector<8x128xf32>
    %613 = arith.mulf %612, %609 : vector<8x128xf32>
    %614 = arith.select %611, %609, %613 : vector<8x128xi1>, vector<8x128xf32>
    %cst_89 = arith.constant dense<0.000000e+00> : vector<8x128xf32>
    %615 = tpu.matmul %4, %614, %cst_89 {dimension_numbers = #tpu.dot_dimension_numbers<[1], [0], [0], [1], [0, 0, 1, 1], [], []>} : vector<8x8xf32>, vector<8x128xf32>, vector<8x128xf32> -> vector<8x128xf32>
    %616 = vector.extract_strided_slice %615 {offsets = [0, 0], sizes = [1, 128], strides = [1, 1]} : vector<8x128xf32> to vector<1x128xf32>
    %617 = vector.broadcast %5 : vector<1x1xf32> to vector<1x128xf32>
    %618 = arith.addf %616, %617 : vector<1x128xf32>
    %619 = arith.negf %618 : vector<1x128xf32>
    %620 = math.exp %619 : vector<1x128xf32>
    %cst_90 = arith.constant 1.000000e+00 : f32
    %621 = vector.broadcast %cst_90 : f32 to vector<1x128xf32>
    %622 = arith.addf %621, %620 : vector<1x128xf32>
    %623 = arith.divf %621, %622 : vector<1x128xf32>
    %624 = vector.extract_strided_slice %19 {offsets = [13, 0], sizes = [1, 128], strides = [1, 1]} : vector<16x128xf32> to vector<1x128xf32>
    %625 = vector.shape_cast %624 : vector<1x128xf32> to vector<128xf32>
    %626 = vector.shape_cast %625 : vector<128xf32> to vector<1x128xf32>
    %627 = arith.mulf %623, %626 : vector<1x128xf32>
    %628 = vector.broadcast %627 : vector<1x128xf32> to vector<8x128xf32>
    %629 = arith.mulf %628, %601 : vector<8x128xf32>
    %630 = vector.extract_strided_slice %1 {offsets = [0, 13, 0], sizes = [8, 1, 128], strides = [1, 1, 1]} : vector<8x16x128xf32> to vector<8x1x128xf32>
    %631 = vector.shape_cast %630 : vector<8x1x128xf32> to vector<8x128xf32>
    %632 = vector.shape_cast %631 : vector<8x128xf32> to vector<8x1x128xf32>
    %633 = vector.shape_cast %629 : vector<8x128xf32> to vector<1x8x128xf32>
    %634 = vector.broadcast %632 : vector<8x1x128xf32> to vector<8x8x128xf32>
    %635 = vector.broadcast %633 : vector<1x8x128xf32> to vector<8x8x128xf32>
    %636 = arith.mulf %634, %635 : vector<8x8x128xf32>
    %637 = arith.addf %599, %636 : vector<8x8x128xf32>
    %638 = vector.extract_strided_slice %104 {offsets = [14, 0, 0], sizes = [1, 8, 128], strides = [1, 1, 1]} : vector<16x8x128xf32> to vector<1x8x128xf32>
    %639 = vector.shape_cast %638 : vector<1x8x128xf32> to vector<8x128xf32>
    %640 = vector.extract_strided_slice %23 {offsets = [14, 0], sizes = [1, 128], strides = [1, 1]} : vector<16x128xf32> to vector<1x128xf32>
    %641 = vector.shape_cast %640 : vector<1x128xf32> to vector<128xf32>
    %642 = vector.shape_cast %641 : vector<128xf32> to vector<1x128xf32>
    %643 = vector.broadcast %642 : vector<1x128xf32> to vector<8x128xf32>
    %644 = arith.mulf %639, %643 : vector<8x128xf32>
    %cst_91 = arith.constant dense<0.000000e+00> : vector<8x128xf32>
    %645 = tpu.matmul %2, %644, %cst_91 {dimension_numbers = #tpu.dot_dimension_numbers<[1], [0], [0], [1], [0, 0, 1, 1], [], []>} : vector<8x8xf32>, vector<8x128xf32>, vector<8x128xf32> -> vector<8x128xf32>
    %646 = vector.broadcast %3 : vector<8x1xf32> to vector<8x128xf32>
    %647 = arith.addf %645, %646 : vector<8x128xf32>
    %cst_92 = arith.constant 0.000000e+00 : f32
    %648 = vector.broadcast %cst_92 : f32 to vector<8x128xf32>
    %649 = arith.cmpf ogt, %647, %648 : vector<8x128xf32>
    %cst_93 = arith.constant 2.000000e-01 : f32
    %650 = vector.broadcast %cst_93 : f32 to vector<8x128xf32>
    %651 = arith.mulf %650, %647 : vector<8x128xf32>
    %652 = arith.select %649, %647, %651 : vector<8x128xi1>, vector<8x128xf32>
    %cst_94 = arith.constant dense<0.000000e+00> : vector<8x128xf32>
    %653 = tpu.matmul %4, %652, %cst_94 {dimension_numbers = #tpu.dot_dimension_numbers<[1], [0], [0], [1], [0, 0, 1, 1], [], []>} : vector<8x8xf32>, vector<8x128xf32>, vector<8x128xf32> -> vector<8x128xf32>
    %654 = vector.extract_strided_slice %653 {offsets = [0, 0], sizes = [1, 128], strides = [1, 1]} : vector<8x128xf32> to vector<1x128xf32>
    %655 = vector.broadcast %5 : vector<1x1xf32> to vector<1x128xf32>
    %656 = arith.addf %654, %655 : vector<1x128xf32>
    %657 = arith.negf %656 : vector<1x128xf32>
    %658 = math.exp %657 : vector<1x128xf32>
    %cst_95 = arith.constant 1.000000e+00 : f32
    %659 = vector.broadcast %cst_95 : f32 to vector<1x128xf32>
    %660 = arith.addf %659, %658 : vector<1x128xf32>
    %661 = arith.divf %659, %660 : vector<1x128xf32>
    %662 = vector.extract_strided_slice %19 {offsets = [14, 0], sizes = [1, 128], strides = [1, 1]} : vector<16x128xf32> to vector<1x128xf32>
    %663 = vector.shape_cast %662 : vector<1x128xf32> to vector<128xf32>
    %664 = vector.shape_cast %663 : vector<128xf32> to vector<1x128xf32>
    %665 = arith.mulf %661, %664 : vector<1x128xf32>
    %666 = vector.broadcast %665 : vector<1x128xf32> to vector<8x128xf32>
    %667 = arith.mulf %666, %639 : vector<8x128xf32>
    %668 = vector.extract_strided_slice %1 {offsets = [0, 14, 0], sizes = [8, 1, 128], strides = [1, 1, 1]} : vector<8x16x128xf32> to vector<8x1x128xf32>
    %669 = vector.shape_cast %668 : vector<8x1x128xf32> to vector<8x128xf32>
    %670 = vector.shape_cast %669 : vector<8x128xf32> to vector<8x1x128xf32>
    %671 = vector.shape_cast %667 : vector<8x128xf32> to vector<1x8x128xf32>
    %672 = vector.broadcast %670 : vector<8x1x128xf32> to vector<8x8x128xf32>
    %673 = vector.broadcast %671 : vector<1x8x128xf32> to vector<8x8x128xf32>
    %674 = arith.mulf %672, %673 : vector<8x8x128xf32>
    %675 = arith.addf %637, %674 : vector<8x8x128xf32>
    %676 = vector.extract_strided_slice %104 {offsets = [15, 0, 0], sizes = [1, 8, 128], strides = [1, 1, 1]} : vector<16x8x128xf32> to vector<1x8x128xf32>
    %677 = vector.shape_cast %676 : vector<1x8x128xf32> to vector<8x128xf32>
    %678 = vector.extract_strided_slice %23 {offsets = [15, 0], sizes = [1, 128], strides = [1, 1]} : vector<16x128xf32> to vector<1x128xf32>
    %679 = vector.shape_cast %678 : vector<1x128xf32> to vector<128xf32>
    %680 = vector.shape_cast %679 : vector<128xf32> to vector<1x128xf32>
    %681 = vector.broadcast %680 : vector<1x128xf32> to vector<8x128xf32>
    %682 = arith.mulf %677, %681 : vector<8x128xf32>
    %cst_96 = arith.constant dense<0.000000e+00> : vector<8x128xf32>
    %683 = tpu.matmul %2, %682, %cst_96 {dimension_numbers = #tpu.dot_dimension_numbers<[1], [0], [0], [1], [0, 0, 1, 1], [], []>} : vector<8x8xf32>, vector<8x128xf32>, vector<8x128xf32> -> vector<8x128xf32>
    %684 = vector.broadcast %3 : vector<8x1xf32> to vector<8x128xf32>
    %685 = arith.addf %683, %684 : vector<8x128xf32>
    %cst_97 = arith.constant 0.000000e+00 : f32
    %686 = vector.broadcast %cst_97 : f32 to vector<8x128xf32>
    %687 = arith.cmpf ogt, %685, %686 : vector<8x128xf32>
    %cst_98 = arith.constant 2.000000e-01 : f32
    %688 = vector.broadcast %cst_98 : f32 to vector<8x128xf32>
    %689 = arith.mulf %688, %685 : vector<8x128xf32>
    %690 = arith.select %687, %685, %689 : vector<8x128xi1>, vector<8x128xf32>
    %cst_99 = arith.constant dense<0.000000e+00> : vector<8x128xf32>
    %691 = tpu.matmul %4, %690, %cst_99 {dimension_numbers = #tpu.dot_dimension_numbers<[1], [0], [0], [1], [0, 0, 1, 1], [], []>} : vector<8x8xf32>, vector<8x128xf32>, vector<8x128xf32> -> vector<8x128xf32>
    %692 = vector.extract_strided_slice %691 {offsets = [0, 0], sizes = [1, 128], strides = [1, 1]} : vector<8x128xf32> to vector<1x128xf32>
    %693 = vector.broadcast %5 : vector<1x1xf32> to vector<1x128xf32>
    %694 = arith.addf %692, %693 : vector<1x128xf32>
    %695 = arith.negf %694 : vector<1x128xf32>
    %696 = math.exp %695 : vector<1x128xf32>
    %cst_100 = arith.constant 1.000000e+00 : f32
    %697 = vector.broadcast %cst_100 : f32 to vector<1x128xf32>
    %698 = arith.addf %697, %696 : vector<1x128xf32>
    %699 = arith.divf %697, %698 : vector<1x128xf32>
    %700 = vector.extract_strided_slice %19 {offsets = [15, 0], sizes = [1, 128], strides = [1, 1]} : vector<16x128xf32> to vector<1x128xf32>
    %701 = vector.shape_cast %700 : vector<1x128xf32> to vector<128xf32>
    %702 = vector.shape_cast %701 : vector<128xf32> to vector<1x128xf32>
    %703 = arith.mulf %699, %702 : vector<1x128xf32>
    %704 = vector.broadcast %703 : vector<1x128xf32> to vector<8x128xf32>
    %705 = arith.mulf %704, %677 : vector<8x128xf32>
    %706 = vector.extract_strided_slice %1 {offsets = [0, 15, 0], sizes = [8, 1, 128], strides = [1, 1, 1]} : vector<8x16x128xf32> to vector<8x1x128xf32>
    %707 = vector.shape_cast %706 : vector<8x1x128xf32> to vector<8x128xf32>
    %708 = vector.shape_cast %707 : vector<8x128xf32> to vector<8x1x128xf32>
    %709 = vector.shape_cast %705 : vector<8x128xf32> to vector<1x8x128xf32>
    %710 = vector.broadcast %708 : vector<8x1x128xf32> to vector<8x8x128xf32>
    %711 = vector.broadcast %709 : vector<1x8x128xf32> to vector<8x8x128xf32>
    %712 = arith.mulf %710, %711 : vector<8x8x128xf32>
    %713 = arith.addf %675, %712 : vector<8x8x128xf32>
    %c0_101 = arith.constant 0 : index
    %c0_102 = arith.constant 0 : index
    %714 = vector.load %arg3[%c0_101, %c0_102] : memref<48x128xf32, #tpu.memory_space<vmem>>, vector<32x8xf32>
    %c0_103 = arith.constant 0 : index
    %c8_104 = arith.constant 8 : index
    %715 = vector.load %arg3[%c0_103, %c8_104] : memref<48x128xf32, #tpu.memory_space<vmem>>, vector<32x1xf32>
    %716 = vector.extract_strided_slice %13 {offsets = [0, 0], sizes = [1, 128], strides = [1, 1]} : vector<8x128xf32> to vector<1x128xf32>
    %717 = vector.shape_cast %716 : vector<1x128xf32> to vector<128xf32>
    %718 = vector.shape_cast %717 : vector<128xf32> to vector<1x128xf32>
    %719 = vector.extract_strided_slice %713 {offsets = [0, 0, 0], sizes = [1, 8, 128], strides = [1, 1, 1]} : vector<8x8x128xf32> to vector<1x8x128xf32>
    %720 = vector.shape_cast %719 : vector<1x8x128xf32> to vector<8x128xf32>
    %721 = vector.broadcast %718 : vector<1x128xf32> to vector<8x128xf32>
    %722 = arith.mulf %721, %720 : vector<8x128xf32>
    %cst_105 = arith.constant dense<0.000000e+00> : vector<32x128xf32>
    %723 = tpu.matmul %714, %722, %cst_105 {dimension_numbers = #tpu.dot_dimension_numbers<[1], [0], [0], [1], [0, 0, 1, 1], [], []>} : vector<32x8xf32>, vector<8x128xf32>, vector<32x128xf32> -> vector<32x128xf32>
    %724 = vector.broadcast %715 : vector<32x1xf32> to vector<32x128xf32>
    %725 = arith.addf %723, %724 : vector<32x128xf32>
    %c0_106 = arith.constant 0 : index
    %c0_107 = arith.constant 0 : index
    %c0_108 = arith.constant 0 : index
    %726 = vector.load %arg4[%c0_106, %c0_107, %c0_108] : memref<8x32x128xf32, #tpu.memory_space<vmem>>, vector<1x32x128xf32>
    %727 = vector.shape_cast %726 : vector<1x32x128xf32> to vector<32x128xf32>
    %728 = vector.shape_cast %725 : vector<32x128xf32> to vector<1x32x128xf32>
    tpu.vector_store %arg4[%c0_106, %c0_107, %c0_108], %728 {strides = array<i32>} : memref<8x32x128xf32, #tpu.memory_space<vmem>>, vector<1x32x128xf32>,
    %729 = vector.extract_strided_slice %13 {offsets = [1, 0], sizes = [1, 128], strides = [1, 1]} : vector<8x128xf32> to vector<1x128xf32>
    %730 = vector.shape_cast %729 : vector<1x128xf32> to vector<128xf32>
    %731 = vector.shape_cast %730 : vector<128xf32> to vector<1x128xf32>
    %732 = vector.extract_strided_slice %713 {offsets = [1, 0, 0], sizes = [1, 8, 128], strides = [1, 1, 1]} : vector<8x8x128xf32> to vector<1x8x128xf32>
    %733 = vector.shape_cast %732 : vector<1x8x128xf32> to vector<8x128xf32>
    %734 = vector.broadcast %731 : vector<1x128xf32> to vector<8x128xf32>
    %735 = arith.mulf %734, %733 : vector<8x128xf32>
    %cst_109 = arith.constant dense<0.000000e+00> : vector<32x128xf32>
    %736 = tpu.matmul %714, %735, %cst_109 {dimension_numbers = #tpu.dot_dimension_numbers<[1], [0], [0], [1], [0, 0, 1, 1], [], []>} : vector<32x8xf32>, vector<8x128xf32>, vector<32x128xf32> -> vector<32x128xf32>
    %737 = vector.broadcast %715 : vector<32x1xf32> to vector<32x128xf32>
    %738 = arith.addf %736, %737 : vector<32x128xf32>
    %c1 = arith.constant 1 : index
    %c0_110 = arith.constant 0 : index
    %c0_111 = arith.constant 0 : index
    %739 = vector.load %arg4[%c1, %c0_110, %c0_111] : memref<8x32x128xf32, #tpu.memory_space<vmem>>, vector<1x32x128xf32>
    %740 = vector.shape_cast %739 : vector<1x32x128xf32> to vector<32x128xf32>
    %741 = vector.shape_cast %738 : vector<32x128xf32> to vector<1x32x128xf32>
    tpu.vector_store %arg4[%c1, %c0_110, %c0_111], %741 {strides = array<i32>} : memref<8x32x128xf32, #tpu.memory_space<vmem>>, vector<1x32x128xf32>,
    %742 = vector.extract_strided_slice %13 {offsets = [2, 0], sizes = [1, 128], strides = [1, 1]} : vector<8x128xf32> to vector<1x128xf32>
    %743 = vector.shape_cast %742 : vector<1x128xf32> to vector<128xf32>
    %744 = vector.shape_cast %743 : vector<128xf32> to vector<1x128xf32>
    %745 = vector.extract_strided_slice %713 {offsets = [2, 0, 0], sizes = [1, 8, 128], strides = [1, 1, 1]} : vector<8x8x128xf32> to vector<1x8x128xf32>
    %746 = vector.shape_cast %745 : vector<1x8x128xf32> to vector<8x128xf32>
    %747 = vector.broadcast %744 : vector<1x128xf32> to vector<8x128xf32>
    %748 = arith.mulf %747, %746 : vector<8x128xf32>
    %cst_112 = arith.constant dense<0.000000e+00> : vector<32x128xf32>
    %749 = tpu.matmul %714, %748, %cst_112 {dimension_numbers = #tpu.dot_dimension_numbers<[1], [0], [0], [1], [0, 0, 1, 1], [], []>} : vector<32x8xf32>, vector<8x128xf32>, vector<32x128xf32> -> vector<32x128xf32>
    %750 = vector.broadcast %715 : vector<32x1xf32> to vector<32x128xf32>
    %751 = arith.addf %749, %750 : vector<32x128xf32>
    %c2 = arith.constant 2 : index
    %c0_113 = arith.constant 0 : index
    %c0_114 = arith.constant 0 : index
    %752 = vector.load %arg4[%c2, %c0_113, %c0_114] : memref<8x32x128xf32, #tpu.memory_space<vmem>>, vector<1x32x128xf32>
    %753 = vector.shape_cast %752 : vector<1x32x128xf32> to vector<32x128xf32>
    %754 = vector.shape_cast %751 : vector<32x128xf32> to vector<1x32x128xf32>
    tpu.vector_store %arg4[%c2, %c0_113, %c0_114], %754 {strides = array<i32>} : memref<8x32x128xf32, #tpu.memory_space<vmem>>, vector<1x32x128xf32>,
    %755 = vector.extract_strided_slice %13 {offsets = [3, 0], sizes = [1, 128], strides = [1, 1]} : vector<8x128xf32> to vector<1x128xf32>
    %756 = vector.shape_cast %755 : vector<1x128xf32> to vector<128xf32>
    %757 = vector.shape_cast %756 : vector<128xf32> to vector<1x128xf32>
    %758 = vector.extract_strided_slice %713 {offsets = [3, 0, 0], sizes = [1, 8, 128], strides = [1, 1, 1]} : vector<8x8x128xf32> to vector<1x8x128xf32>
    %759 = vector.shape_cast %758 : vector<1x8x128xf32> to vector<8x128xf32>
    %760 = vector.broadcast %757 : vector<1x128xf32> to vector<8x128xf32>
    %761 = arith.mulf %760, %759 : vector<8x128xf32>
    %cst_115 = arith.constant dense<0.000000e+00> : vector<32x128xf32>
    %762 = tpu.matmul %714, %761, %cst_115 {dimension_numbers = #tpu.dot_dimension_numbers<[1], [0], [0], [1], [0, 0, 1, 1], [], []>} : vector<32x8xf32>, vector<8x128xf32>, vector<32x128xf32> -> vector<32x128xf32>
    %763 = vector.broadcast %715 : vector<32x1xf32> to vector<32x128xf32>
    %764 = arith.addf %762, %763 : vector<32x128xf32>
    %c3 = arith.constant 3 : index
    %c0_116 = arith.constant 0 : index
    %c0_117 = arith.constant 0 : index
    %765 = vector.load %arg4[%c3, %c0_116, %c0_117] : memref<8x32x128xf32, #tpu.memory_space<vmem>>, vector<1x32x128xf32>
    %766 = vector.shape_cast %765 : vector<1x32x128xf32> to vector<32x128xf32>
    %767 = vector.shape_cast %764 : vector<32x128xf32> to vector<1x32x128xf32>
    tpu.vector_store %arg4[%c3, %c0_116, %c0_117], %767 {strides = array<i32>} : memref<8x32x128xf32, #tpu.memory_space<vmem>>, vector<1x32x128xf32>,
    %768 = vector.extract_strided_slice %13 {offsets = [4, 0], sizes = [1, 128], strides = [1, 1]} : vector<8x128xf32> to vector<1x128xf32>
    %769 = vector.shape_cast %768 : vector<1x128xf32> to vector<128xf32>
    %770 = vector.shape_cast %769 : vector<128xf32> to vector<1x128xf32>
    %771 = vector.extract_strided_slice %713 {offsets = [4, 0, 0], sizes = [1, 8, 128], strides = [1, 1, 1]} : vector<8x8x128xf32> to vector<1x8x128xf32>
    %772 = vector.shape_cast %771 : vector<1x8x128xf32> to vector<8x128xf32>
    %773 = vector.broadcast %770 : vector<1x128xf32> to vector<8x128xf32>
    %774 = arith.mulf %773, %772 : vector<8x128xf32>
    %cst_118 = arith.constant dense<0.000000e+00> : vector<32x128xf32>
    %775 = tpu.matmul %714, %774, %cst_118 {dimension_numbers = #tpu.dot_dimension_numbers<[1], [0], [0], [1], [0, 0, 1, 1], [], []>} : vector<32x8xf32>, vector<8x128xf32>, vector<32x128xf32> -> vector<32x128xf32>
    %776 = vector.broadcast %715 : vector<32x1xf32> to vector<32x128xf32>
    %777 = arith.addf %775, %776 : vector<32x128xf32>
    %c4 = arith.constant 4 : index
    %c0_119 = arith.constant 0 : index
    %c0_120 = arith.constant 0 : index
    %778 = vector.load %arg4[%c4, %c0_119, %c0_120] : memref<8x32x128xf32, #tpu.memory_space<vmem>>, vector<1x32x128xf32>
    %779 = vector.shape_cast %778 : vector<1x32x128xf32> to vector<32x128xf32>
    %780 = vector.shape_cast %777 : vector<32x128xf32> to vector<1x32x128xf32>
    tpu.vector_store %arg4[%c4, %c0_119, %c0_120], %780 {strides = array<i32>} : memref<8x32x128xf32, #tpu.memory_space<vmem>>, vector<1x32x128xf32>,
    %781 = vector.extract_strided_slice %13 {offsets = [5, 0], sizes = [1, 128], strides = [1, 1]} : vector<8x128xf32> to vector<1x128xf32>
    %782 = vector.shape_cast %781 : vector<1x128xf32> to vector<128xf32>
    %783 = vector.shape_cast %782 : vector<128xf32> to vector<1x128xf32>
    %784 = vector.extract_strided_slice %713 {offsets = [5, 0, 0], sizes = [1, 8, 128], strides = [1, 1, 1]} : vector<8x8x128xf32> to vector<1x8x128xf32>
    %785 = vector.shape_cast %784 : vector<1x8x128xf32> to vector<8x128xf32>
    %786 = vector.broadcast %783 : vector<1x128xf32> to vector<8x128xf32>
    %787 = arith.mulf %786, %785 : vector<8x128xf32>
    %cst_121 = arith.constant dense<0.000000e+00> : vector<32x128xf32>
    %788 = tpu.matmul %714, %787, %cst_121 {dimension_numbers = #tpu.dot_dimension_numbers<[1], [0], [0], [1], [0, 0, 1, 1], [], []>} : vector<32x8xf32>, vector<8x128xf32>, vector<32x128xf32> -> vector<32x128xf32>
    %789 = vector.broadcast %715 : vector<32x1xf32> to vector<32x128xf32>
    %790 = arith.addf %788, %789 : vector<32x128xf32>
    %c5 = arith.constant 5 : index
    %c0_122 = arith.constant 0 : index
    %c0_123 = arith.constant 0 : index
    %791 = vector.load %arg4[%c5, %c0_122, %c0_123] : memref<8x32x128xf32, #tpu.memory_space<vmem>>, vector<1x32x128xf32>
    %792 = vector.shape_cast %791 : vector<1x32x128xf32> to vector<32x128xf32>
    %793 = vector.shape_cast %790 : vector<32x128xf32> to vector<1x32x128xf32>
    tpu.vector_store %arg4[%c5, %c0_122, %c0_123], %793 {strides = array<i32>} : memref<8x32x128xf32, #tpu.memory_space<vmem>>, vector<1x32x128xf32>,
    %794 = vector.extract_strided_slice %13 {offsets = [6, 0], sizes = [1, 128], strides = [1, 1]} : vector<8x128xf32> to vector<1x128xf32>
    %795 = vector.shape_cast %794 : vector<1x128xf32> to vector<128xf32>
    %796 = vector.shape_cast %795 : vector<128xf32> to vector<1x128xf32>
    %797 = vector.extract_strided_slice %713 {offsets = [6, 0, 0], sizes = [1, 8, 128], strides = [1, 1, 1]} : vector<8x8x128xf32> to vector<1x8x128xf32>
    %798 = vector.shape_cast %797 : vector<1x8x128xf32> to vector<8x128xf32>
    %799 = vector.broadcast %796 : vector<1x128xf32> to vector<8x128xf32>
    %800 = arith.mulf %799, %798 : vector<8x128xf32>
    %cst_124 = arith.constant dense<0.000000e+00> : vector<32x128xf32>
    %801 = tpu.matmul %714, %800, %cst_124 {dimension_numbers = #tpu.dot_dimension_numbers<[1], [0], [0], [1], [0, 0, 1, 1], [], []>} : vector<32x8xf32>, vector<8x128xf32>, vector<32x128xf32> -> vector<32x128xf32>
    %802 = vector.broadcast %715 : vector<32x1xf32> to vector<32x128xf32>
    %803 = arith.addf %801, %802 : vector<32x128xf32>
    %c6 = arith.constant 6 : index
    %c0_125 = arith.constant 0 : index
    %c0_126 = arith.constant 0 : index
    %804 = vector.load %arg4[%c6, %c0_125, %c0_126] : memref<8x32x128xf32, #tpu.memory_space<vmem>>, vector<1x32x128xf32>
    %805 = vector.shape_cast %804 : vector<1x32x128xf32> to vector<32x128xf32>
    %806 = vector.shape_cast %803 : vector<32x128xf32> to vector<1x32x128xf32>
    tpu.vector_store %arg4[%c6, %c0_125, %c0_126], %806 {strides = array<i32>} : memref<8x32x128xf32, #tpu.memory_space<vmem>>, vector<1x32x128xf32>,
    %807 = vector.extract_strided_slice %13 {offsets = [7, 0], sizes = [1, 128], strides = [1, 1]} : vector<8x128xf32> to vector<1x128xf32>
    %808 = vector.shape_cast %807 : vector<1x128xf32> to vector<128xf32>
    %809 = vector.shape_cast %808 : vector<128xf32> to vector<1x128xf32>
    %810 = vector.extract_strided_slice %713 {offsets = [7, 0, 0], sizes = [1, 8, 128], strides = [1, 1, 1]} : vector<8x8x128xf32> to vector<1x8x128xf32>
    %811 = vector.shape_cast %810 : vector<1x8x128xf32> to vector<8x128xf32>
    %812 = vector.broadcast %809 : vector<1x128xf32> to vector<8x128xf32>
    %813 = arith.mulf %812, %811 : vector<8x128xf32>
    %cst_127 = arith.constant dense<0.000000e+00> : vector<32x128xf32>
    %814 = tpu.matmul %714, %813, %cst_127 {dimension_numbers = #tpu.dot_dimension_numbers<[1], [0], [0], [1], [0, 0, 1, 1], [], []>} : vector<32x8xf32>, vector<8x128xf32>, vector<32x128xf32> -> vector<32x128xf32>
    %815 = vector.broadcast %715 : vector<32x1xf32> to vector<32x128xf32>
    %816 = arith.addf %814, %815 : vector<32x128xf32>
    %c7 = arith.constant 7 : index
    %c0_128 = arith.constant 0 : index
    %c0_129 = arith.constant 0 : index
    %817 = vector.load %arg4[%c7, %c0_128, %c0_129] : memref<8x32x128xf32, #tpu.memory_space<vmem>>, vector<1x32x128xf32>
    %818 = vector.shape_cast %817 : vector<1x32x128xf32> to vector<32x128xf32>
    %819 = vector.shape_cast %816 : vector<32x128xf32> to vector<1x32x128xf32>
    tpu.vector_store %arg4[%c7, %c0_128, %c0_129], %819 {strides = array<i32>} : memref<8x32x128xf32, #tpu.memory_space<vmem>>, vector<1x32x128xf32>,
    return
  }
  func.func @transform_0(%arg0: i32) -> (i32, i32, i32) {
    %c0_i32 = arith.constant 0 : i32
    %c0_i32_0 = arith.constant 0 : i32
    %c0_i32_1 = arith.constant 0 : i32
    return %arg0, %c0_i32, %c0_i32_0 : i32, i32, i32
  }
  func.func @transform_1(%arg0: i32) -> (i32, i32, i32) {
    %c0_i32 = arith.constant 0 : i32
    %c0_i32_0 = arith.constant 0 : i32
    %c0_i32_1 = arith.constant 0 : i32
    return %arg0, %c0_i32, %c0_i32_0 : i32, i32, i32
  }
  func.func @transform_2(%arg0: i32) -> (i32, i32) {
    %c0_i32 = arith.constant 0 : i32
    %c0_i32_0 = arith.constant 0 : i32
    %c0_i32_1 = arith.constant 0 : i32
    return %c0_i32, %c0_i32_0 : i32, i32
  }
  func.func @transform_3(%arg0: i32) -> (i32, i32, i32) {
    %c0_i32 = arith.constant 0 : i32
    %c0_i32_0 = arith.constant 0 : i32
    %c0_i32_1 = arith.constant 0 : i32
    return %arg0, %c0_i32, %c0_i32_0 : i32, i32, i32
  }
}

</mosaic_0001>

<bundles_post_ra>
// kernel: hypergraph_conv_forward.1
= control target key start
LH: loop header
LB: loop body
LE: loop exit
PB: predicated region body
PF: predicated region fallthrough
CT: control target
= control target key end

     0   :  { %s3317_s12 = smov 0   ;;  %s5078_s0 = inlined_call_operand.vmem [shape: f32[32,8,128], index: 0, kind: input, shape index: {}]   ;;  %s5079_s1 = inlined_call_operand.vmem [shape: f32[32,16,128], index: 1, kind: input, shape index: {}]   ;;  %s5080_s2 = inlined_call_operand.vmem [shape: f32[48,128], index: 2, kind: input, shape index: {}]   ;;  %s5081_s3 = inlined_call_operand.vmem [shape: f32[32,32,128], index: 3, kind: output, shape index: {}]  }
   0x1 LB: > { %s3039_s13 = sadd.s32 4294967295, %s3294_s12   ;;  %p3043_p0 = scmp.ge.s32.totalorder %s3294_s12, 1  ;;  %s3294_s12 = sphi %s3317_s12, %s13_s12  }
   0x2   : > { %p150_p1 = scmp.lt.s32.totalorder %s3294_s12, 5 }
   0x4   : > { %p151_p2 = pnand %p3043_p0, %p150_p1 }
   0x6   : > { %154 = sbr.rel (%p151_p2) target bundleno = 748 (0x2ec), region = 32 }
   0xb   : > { %s3044_s14 = sshll.u32 %s3039_s13, 3  ;;  %vm1147_vm3 = vcmask 64512  }
   0xc   : > { %p182_p3 = scmp.lt.s32.totalorder %s3044_s14, 31 }
   0xe   : > { %s5217_s14 = smov (!%p182_p3, %s3044_s14), 31 }
   0xf   : > { %s3045_s15 = sshll.u32 %s5217_s14, 3  ;;  %s3162_s16 = sshll.u32 %s5217_s14, 4 }
  0x10   : > { %s3332_s19 = scalar_lea.vmem %s5078_s0, %s3045_s15  ;;  %s3337_s22 = scalar_lea.vmem %s5079_s1, %s3162_s16 }
  0x11   : > { %v3340_v0 = vld [vmem:[%s3332_s19] sm:$0xff]  ;;  %v3343_v1 = vld [vmem:[%s3332_s19 + $0x8] sm:$0xff]  ;;  %v3346_v2 = vld [vmem:[%s3332_s19 + $0x10] sm:$0xff]  ;;  %s3163_s10 = sshll.u32 %s5217_s14, 5 }
  0x12   : > { %v3349_v3 = vld [vmem:[%s3332_s19 + $0x18] sm:$0xff]  ;;  %v3352_v4 = vld [vmem:[%s3332_s19 + $0x20] sm:$0xff]  ;;  %v3358_v6 = vld [vmem:[%s3337_s22 + $0x10] sm:$0xff]  ;;  %s5011_s15 = scalar_lea.vmem %s5081_s3, %s3163_s10 }
  0x13   : > { %v3355_v5 = vld [vmem:[%s3337_s22] sm:$0xff]  ;;  %v3364_v8 = vld [vmem:[%s3337_s22 + $0x30] sm:$0xff]  ;;  %v3369_v11 = vld [vmem:[%s3332_s19 + $0x28] sm:$0xff]  ;;  %v5096_v15 = vperm.slane %v3358_v6, 0  ;;  %v582_v34 = vrot.slane %v3358_v6, 1 }
  0x14   : > { %v3361_v7 = vld [vmem:[%s3337_s22 + $0x20] sm:$0xff]  ;;  %v5097_v9 = vperm.slane %v3355_v5, 0  ;;  %v502_v10 = vrot.slane %v3355_v5, 1  ;;  %v3375_v13 = vld [vmem:[%s3337_s22 + $0x50] sm:$0xff]  ;;  %v284_v14 = vadd.f32 %v3358_v6, %v3355_v5  ;;  %v5090_v17 = vperm.slane %v3364_v8, 0  ;;  %v3424_v48 = vld [vmem:[%s3332_s19 + $0x38] sm:$0xff] }
  0x15   : > { %v3372_v12 = vld [vmem:[%s3337_s22 + $0x40] sm:$0xff]  ;;  %5102 = vst [vmem:[#allocation2_spill] sm:$0xff] %v3375_v13  ;;  %v5095_v16 = vperm.slane %v3361_v7, 0  ;;  %v5084_v20 = vperm.slane %v3375_v13, 0  ;;  %v628_v23 = vmul.f32 %v5096_v15, %v3343_v1  ;;  %v503_v25 = vrot.slane %v3355_v5, 2  ;;  %v3409_v30 = vld [vmem:[%s3337_s22 + $0x70] sm:$0xff] }
  0x16   : > { %v548_v18 = vmul.f32 %v5097_v9, %v3340_v0  ;;  %v5087_v19 = vperm.slane %v3372_v12, 0  ;;  %v3388_v21 = vld [vmem:[%s3337_s22 + $0x60] sm:$0xff]  ;;  %v285_v22 = vadd.f32 %v284_v14, %v3361_v7  ;;  %v788_v26 = vmul.f32 %v5090_v17, %v3349_v3  ;;  %5104 = vst [vmem:[#allocation4_spill] sm:$0xff] %v3409_v30  ;;  %v3418_v39 = vld [vmem:[%s3332_s19 + $0x30] sm:$0xff] }
  0x17   : > { %5103 = vst [vmem:[#allocation3_spill] sm:$0xff] %v3388_v21  ;;  %v708_v24 = vmul.f32 %v5095_v16, %v3346_v2  ;;  %v948_v28 = vmul.f32 %v5084_v20, %v3369_v11  ;;  %v5083_v29 = vperm.slane %v3388_v21, 0  ;;  %v517_v33 = vperm.slane %v502_v10, 0 }
  0x18   : > { %v868_v27 = vmul.f32 %v5087_v19, %v3352_v4  ;;  %v286_v31 = vadd.f32 %v285_v22, %v3364_v8  ;;  %v644_v32 = vadd.f32 %v628_v23, %v548_v18  ;;  %v5082_v35 = vperm.slane %v3409_v30, 0 }
  0x19   : > { %v662_v36 = vrot.slane %v3361_v7, 1  ;;  %v742_v37 = vrot.slane %v3364_v8, 1  ;;  %v822_v38 = vrot.slane %v3372_v12, 1  ;;  %v549_v42 = vmul.f32 %v517_v33, %v3340_v0 }
  0x1a   : > { %v287_v40 = vadd.f32 %v286_v31, %v3372_v12  ;;  %v724_v41 = vadd.f32 %v708_v24, %v644_v32  ;;  %v597_v43 = vperm.slane %v582_v34, 0  ;;  %v902_v47 = vrot.slane %v3375_v13, 1 }
  0x1b   : > { %v677_v44 = vperm.slane %v662_v36, 0  ;;  %v757_v45 = vperm.slane %v742_v37, 0  ;;  %v837_v46 = vperm.slane %v822_v38, 0  ;;  %v982_v52 = vrot.slane %v3388_v21, 1 }
  0x1c   : > { %v288_v49 = vadd.f32 %v287_v40, %v3375_v13  ;;  %v804_v50 = vadd.f32 %v788_v26, %v724_v41  ;;  %v629_v51 = vmul.f32 %v597_v43, %v3343_v1  ;;  %v1028_v53 = vmul.f32 %v5083_v29, %v3418_v39 }
  0x1d   : > { %v709_v54 = vmul.f32 %v677_v44, %v3346_v2  ;;  %v917_v55 = vperm.slane %v902_v47, 0  ;;  %v789_v59 = vmul.f32 %v757_v45, %v3349_v3  ;;  %v1108_v60 = vmul.f32 %v5082_v35, %v3424_v48 }
  0x1e   : > { %v289_v56 = vadd.f32 %v288_v49, %v3388_v21  ;;  %v884_v57 = vadd.f32 %v868_v27, %v804_v50  ;;  %v645_v58 = vadd.f32 %v629_v51, %v549_v42  ;;  %v869_v61 = vmul.f32 %v837_v46, %v3352_v4 }
  0x1f   : > { %v1062_v62 = vrot.slane %v3409_v30, 1  ;;  %v518_v63 = vperm.slane %v503_v25, 0  ;;  %v997_v22 = vperm.slane %v982_v52, 0  ;;  %v949_v23 = vmul.f32 %v917_v55, %v3369_v11 }
  0x20   : > { %v3441_v10 = vadd.f32 %v289_v56, %v3409_v30  ;;  %v964_v14 = vadd.f32 %v948_v28, %v884_v57  ;;  %v725_v18 = vadd.f32 %v709_v54, %v645_v58  ;;  %v583_v26 = vrot.slane %v3358_v6, 2 }
  0x21   : > { %v1077_v24 = vperm.slane %v1062_v62, 0  ;;  %v663_v27 = vrot.slane %v3361_v7, 2  ;;  %v743_v34 = vrot.slane %v3364_v8, 2  ;;  %v550_v25 = vmul.f32 %v518_v63, %v3340_v0 }
  0x22   : > { %v468_v31 = vmax.f32 %v3441_v10, 1.0  ;;  %v1044_v32 = vadd.f32 %v1028_v53, %v964_v14  ;;  %v805_v33 = vadd.f32 %v789_v59, %v725_v18  ;;  %v598_v36 = vperm.slane %v583_v26, 0 }
  0x23   : > { %v678_v37 = vperm.slane %v663_v27, 0  ;;  %v823_v28 = vrot.slane %v3372_v12, 2  ;;  %v1029_v40 = vmul.f32 %v997_v22, %v3418_v39  ;;  %v1109_v41 = vmul.f32 %v1077_v24, %v3424_v48 }
  0x24   : > { %3176 = vrcp.f32 %v468_v31  ;;  %v481_v38 = vand.u32 2147483648, %v468_v31  ;;  %vm475_vm0 = vweird.f32 %v468_v31  ;;  %v479_v42 = vand.u32 2147483647, %v468_v31 }
  0x25   : > { %v885_v43 = vadd.f32 %v869_v61, %v805_v33  ;;  %v630_v44 = vmul.f32 %v598_v36, %v3343_v1  ;;  %v710_v45 = vmul.f32 %v678_v37, %v3346_v2  ;;  %v3454_v47 = vadd.f32 %v1108_v60, %v1044_v32 }
  0x26   : > { %v482_v46 = vor.u32 1.1754944e-38, %v481_v38  ;;  %v758_v49 = vperm.slane %v743_v34, 0  ;;  %v838_v50 = vperm.slane %v823_v28, 0  ;;  %v903_v53 = vrot.slane %v3375_v13, 2 }
  0x27   : > { %v965_v51 = vadd.f32 %v949_v23, %v885_v43  ;;  %v646_v52 = vadd.f32 %v630_v44, %v550_v25  ;;  %v983_v54 = vrot.slane %v3388_v21, 2  ;;  %v1063_v57 = vrot.slane %v3409_v30, 2 }
  0x28   : > { %v790_v55 = vmul.f32 %v758_v49, %v3349_v3  ;;  %v870_v56 = vmul.f32 %v838_v50, %v3352_v4  ;;  %v504_v58 = vrot.slane %v3355_v5, 3  ;;  %vm3462_vm1 = vcmp.eq.f32.partialorder %v479_v42, 8.507059e+37 }
  0x29   : > { %v1045_v60 = vadd.f32 %v1029_v40, %v965_v51  ;;  %v726_v61 = vadd.f32 %v710_v45, %v646_v52  ;;  %v918_v62 = vperm.slane %v903_v53, 0  ;;  %v998_v63 = vperm.slane %v983_v54, 0 }
  0x2a   : > { %v3177_v14 = vpop.eup %3176  ;;  %v1078_v18 = vperm.slane %v1063_v57, 0  ;;  %v519_v22 = vperm.slane %v504_v58, 0  ;;  %v584_v23 = vrot.slane %v3358_v6, 3  ;;  %v664_v24 = vrot.slane %v3361_v7, 3 }
  0x2b   : > { %v471_v26 = vmul.f32 %v3177_v14, %v468_v31  ;;  %vm476_vm2 = vweird.f32 %v3177_v14  ;;  %v3468_v27 = vadd.f32 %v1109_v41, %v1045_v60  ;;  %v806_v32 = vadd.f32 %v790_v55, %v726_v61 }
  0x2c   : > { %v950_v33 = vmul.f32 %v918_v62, %v3369_v11  ;;  %v1030_v34 = vmul.f32 %v998_v63, %v3418_v39  ;;  %v1110_v25 = vmul.f32 %v1078_v18, %v3424_v48  ;;  %v551_v36 = vmul.f32 %v519_v22, %v3340_v0  ;;  %vm3482_vm4 = vmor %vm475_vm0, %vm476_vm2 }
  0x2d   : > { %v472_v37 = vsub.f32 1.0, %v471_v26  ;;  %v886_v28 = vadd.f32 %v870_v56, %v806_v32  ;;  %v599_v38 = vperm.slane %v584_v23, 0  ;;  %v679_v40 = vperm.slane %v664_v24, 0 }
  0x2e   : > { %v744_v42 = vrot.slane %v3364_v8, 3  ;;  %v824_v43 = vrot.slane %v3372_v12, 3  ;;  %v904_v41 = vrot.slane %v3375_v13, 3  ;;  %v984_v44 = vrot.slane %v3388_v21, 3 }
  0x2f   : > { %v473_v45 = vmul.f32 %v3177_v14, %v472_v37  ;;  %v966_v49 = vadd.f32 %v950_v33, %v886_v28  ;;  %v631_v50 = vmul.f32 %v599_v38, %v3343_v1  ;;  %v711_v51 = vmul.f32 %v679_v40, %v3346_v2 }
  0x30   : > { %v759_v53 = vperm.slane %v744_v42, 0  ;;  %v839_v54 = vperm.slane %v824_v43, 0  ;;  %v919_v55 = vperm.slane %v904_v41, 0  ;;  %v999_v56 = vperm.slane %v984_v44, 0 }
  0x31   : > { %v474_v57 = vadd.f32 %v3177_v14, %v473_v45  ;;  %v1046_v58 = vadd.f32 %v1030_v34, %v966_v49  ;;  %v647_v60 = vadd.f32 %v631_v50, %v551_v36  ;;  %v1064_v61 = vrot.slane %v3409_v30, 3 }
  0x32   : > { %v791_v62 = vmul.f32 %v759_v53, %v3349_v3  ;;  %v871_v63 = vmul.f32 %v839_v54, %v3352_v4  ;;  %v951_v18 = vmul.f32 %v919_v55, %v3369_v11  ;;  %v1031_v31 = vmul.f32 %v999_v56, %v3418_v39 }
  0x33   : > { %v478_v22 = vsel %vm3482_vm4, %v3177_v14, %v474_v57  ;;  %v3493_v23 = vadd.f32 %v1110_v25, %v1046_v58  ;;  %v727_v24 = vadd.f32 %v711_v51, %v647_v60  ;;  %v1079_v26 = vperm.slane %v1064_v61, 0  ;;  %v3506_v14 = vld [vmem:[%s5080_s2 + $0x20] sm:$0xff] }
  0x34   : > { %v3497_v32 = vsel %vm3462_vm1, %v482_v46, %v478_v22  ;;  %v505_v33 = vrot.slane %v3355_v5, 4  ;;  %v585_v34 = vrot.slane %v3358_v6, 4  ;;  %v3296_v38 = vmov 8  }
  0x35   : > { %v1140_v36 = vperm.slane %v3497_v32, 0  ;;  %v1248_v37 = vperm.slane %v3497_v32, 1  ;;  %v1343_v25 = vperm.slane %v3497_v32, 2  ;;  %v807_v28 = vadd.f32 %v791_v62, %v727_v24  ;;  %3173 = vset.pattern.permute.xlu0 %v3296_v38  ;;  %3174 = vset.pattern.permute.xlu1 %v3296_v38  ;;  %v227_v24 = vld [vmem:[%s5080_s2 + $0x28] sm:$0x1] }
  0x36   : > { %v1111_v46 = vmul.f32 %v1079_v26, %v3424_v48  ;;  %v1437_v59 = vperm.slane %v3497_v32, 3  ;;  %1144 = vperm.xlu0 %3173, %v3506_v14   ;;  %v520_v40 = vperm.slane %v505_v33, 0  ;;  %v600_v42 = vperm.slane %v585_v34, 0  ;;  %3175 = vset.pattern.permute.xlu2 %v3296_v38 }
  0x37   : > { %v1141_v43 = vmul.f32 %v1140_v36, %v3454_v47  ;;  %v1249_v41 = vmul.f32 %v1248_v37, %v3468_v27  ;;  %v1344_v44 = vmul.f32 %v1343_v25, %v3493_v23  ;;  %v887_v45 = vadd.f32 %v871_v63, %v807_v28 }
  0x38   : > { %v552_v49 = vmul.f32 %v520_v40, %v3340_v0  ;;  %v632_v50 = vmul.f32 %v600_v42, %v3343_v1  ;;  %v665_v51 = vrot.slane %v3361_v7, 4  ;;  %v745_v52 = vrot.slane %v3364_v8, 4 }
  0x39   : > { %1165 = vmatpush.msra.mxu0 %v1141_v43  ;;  %1265 = vmatpush.msra.mxu2 %v1249_v41  ;;  %v967_v53 = vadd.f32 %v951_v18, %v887_v45  ;;  %v825_v54 = vrot.slane %v3372_v12, 4  ;;  %v905_v55 = vrot.slane %v3375_v13, 4  ;;  %v985_v56 = vrot.slane %v3388_v21, 4 }
  0x3a   : > { %3052 = vmatmul.msk.f32.vlgmr.msra.gmra.mxu0 %vm1147_vm3, %v3506_v14  ;;  %3055 = vmatmul.msk.f32.vlgmr.msra.gmra.mxu2 %vm1147_vm3, %v3506_v14  ;;  %v648_v57 = vadd.f32 %v632_v50, %v552_v49  ;;  %v680_v58 = vperm.slane %v665_v51, 0  ;;  %v760_v60 = vperm.slane %v745_v52, 0  ;;  %v1065_v61 = vrot.slane %v3409_v30, 4 }
  0x3b   : > { %1360 = vmatpush.msrb.mxu0 %v1344_v44  ;;  %v1047_v62 = vadd.f32 %v1031_v31, %v967_v53  ;;  %v840_v63 = vperm.slane %v825_v54, 0  ;;  %v920_v18 = vperm.slane %v905_v55, 0  ;;  %v1000_v22 = vperm.slane %v985_v56, 0 }
  0x3c   : > { %v712_v26 = vmul.f32 %v680_v58, %v3346_v2  ;;  %v792_v33 = vmul.f32 %v760_v60, %v3349_v3  ;;  %v1080_v34 = vperm.slane %v1065_v61, 0  ;;  %v1531_v31 = vperm.slane %v3497_v32, 4 }
  0x3d   : > { %v3532_v36 = vadd.f32 %v1111_v46, %v1047_v62  ;;  %v872_v37 = vmul.f32 %v840_v63, %v3352_v4  ;;  %v952_v25 = vmul.f32 %v920_v18, %v3369_v11  ;;  %v1032_v38 = vmul.f32 %v1000_v22, %v3418_v39 }
  0x3e   : > { %v728_v28 = vadd.f32 %v712_v26, %v648_v57  ;;  %v506_v40 = vrot.slane %v3355_v5, 5  ;;  %v586_v42 = vrot.slane %v3358_v6, 5  ;;  %1198 = vperm.xlu0 %3173, %v227_v24   ;;  %v666_v41 = vrot.slane %v3361_v7, 5 }
  0x3f   : > { %v1438_v43 = vmul.f32 %v1437_v59, %v3532_v36  ;;  %v746_v46 = vrot.slane %v3364_v8, 5  ;;  %v826_v44 = vrot.slane %v3372_v12, 5  ;;  %v906_v51 = vrot.slane %v3375_v13, 5 }
  0x40   : > { %v808_v45 = vadd.f32 %v792_v33, %v728_v28  ;;  %v521_v49 = vperm.slane %v506_v40, 0  ;;  %v601_v50 = vperm.slane %v586_v42, 0  ;;  %v681_v52 = vperm.slane %v666_v41, 0 }
  0x41   : > { %1454 = vmatpush.msrb.mxu2 %v1438_v43  ;;  %v761_v53 = vperm.slane %v746_v46, 0  ;;  %v841_v54 = vperm.slane %v826_v44, 0  ;;  %v986_v55 = vrot.slane %v3388_v21, 5  ;;  %v921_v58 = vperm.slane %v906_v51, 0 }
  0x42   : > { %3058 = vmatmul.msk.f32.vlgmr.msrb.gmra.mxu0 %vm1147_vm3, %v3506_v14  ;;  %3061 = vmatmul.msk.f32.vlgmr.msrb.gmra.mxu2 %vm1147_vm3, %v3506_v14  ;;  %v888_v59 = vadd.f32 %v872_v37, %v808_v45  ;;  %v553_v56 = vmul.f32 %v521_v49, %v3340_v0  ;;  %v633_v57 = vmul.f32 %v601_v50, %v3343_v1  ;;  %v1066_v26 = vrot.slane %v3409_v30, 5 }
  0x43   : > { %v1112_v60 = vmul.f32 %v1080_v34, %v3424_v48  ;;  %v713_v61 = vmul.f32 %v681_v52, %v3346_v2  ;;  %v793_v62 = vmul.f32 %v761_v53, %v3349_v3  ;;  %v1001_v63 = vperm.slane %v986_v55, 0 }
  0x44   : > { %v968_v18 = vadd.f32 %v952_v25, %v888_v59  ;;  %v649_v22 = vadd.f32 %v633_v57, %v553_v56  ;;  %v873_v24 = vmul.f32 %v841_v54, %v3352_v4  ;;  %v953_v33 = vmul.f32 %v921_v58, %v3369_v11 }
  0x45   : > { %v1033_v37 = vmul.f32 %v1001_v63, %v3418_v39  ;;  %v507_v28 = vrot.slane %v3355_v5, 6  ;;  %v587_v40 = vrot.slane %v3358_v6, 6  ;;  %v1081_v43 = vperm.slane %v1066_v26, 0 }
  0x46   : > { %v1048_v34 = vadd.f32 %v1032_v38, %v968_v18  ;;  %v729_v42 = vadd.f32 %v713_v61, %v649_v22  ;;  %v667_v41 = vrot.slane %v3361_v7, 6  ;;  %v747_v44 = vrot.slane %v3364_v8, 6 }
  0x47   : > { %v522_v46 = vperm.slane %v507_v28, 0  ;;  %v602_v25 = vperm.slane %v587_v40, 0  ;;  %v827_v45 = vrot.slane %v3372_v12, 6  ;;  %v1625_v51 = vperm.slane %v3497_v32, 5 }
  0x48   : > { %v3564_v49 = vadd.f32 %v1112_v60, %v1048_v34  ;;  %v809_v50 = vadd.f32 %v793_v62, %v729_v42  ;;  %v682_v52 = vperm.slane %v667_v41, 0  ;;  %v762_v54 = vperm.slane %v747_v44, 0 }
  0x49   : > { %v554_v53 = vmul.f32 %v522_v46, %v3340_v0  ;;  %v634_v38 = vmul.f32 %v602_v25, %v3343_v1  ;;  %v842_v55 = vperm.slane %v827_v45, 0  ;;  %v907_v58 = vrot.slane %v3375_v13, 6 }
  0x4a   : > { %v1532_v59 = vmul.f32 %v1531_v31, %v3564_v49  ;;  %v889_v56 = vadd.f32 %v873_v24, %v809_v50  ;;  %v714_v57 = vmul.f32 %v682_v52, %v3346_v2  ;;  %v1113_v60 = vmul.f32 %v1081_v43, %v3424_v48 }
  0x4b   : > { %v650_v61 = vadd.f32 %v634_v38, %v554_v53  ;;  %v794_v62 = vmul.f32 %v762_v54, %v3349_v3  ;;  %v987_v63 = vrot.slane %v3388_v21, 6  ;;  %v874_v22 = vmul.f32 %v842_v55, %v3352_v4 }
  0x4c   : > { %1548 = vmatpush.msra.mxu0 %v1532_v59  ;;  %v969_v18 = vadd.f32 %v953_v33, %v889_v56  ;;  %v922_v26 = vperm.slane %v907_v58, 0  ;;  %v1067_v28 = vrot.slane %v3409_v30, 6  ;;  %v508_v40 = vrot.slane %v3355_v5, 7 }
  0x4d   : > { %3064 = vmatmul.msk.f32.vlgmr.msra.gmra.mxu0 %vm1147_vm3, %v3506_v14  ;;  %v730_v31 = vadd.f32 %v714_v57, %v650_v61  ;;  %v1002_v24 = vperm.slane %v987_v63, 0  ;;  %v588_v34 = vrot.slane %v3358_v6, 7  ;;  %v668_v33 = vrot.slane %v3361_v7, 7 }
  0x4e   : > { %v1049_v42 = vadd.f32 %v1033_v37, %v969_v18  ;;  %v954_v43 = vmul.f32 %v922_v26, %v3369_v11  ;;  %v1082_v41 = vperm.slane %v1067_v28, 0  ;;  %v523_v44 = vperm.slane %v508_v40, 0  ;;  %v3599_v26 = vld [vmem:[%s3337_s22 + $0x18] sm:$0xff] }
  0x4f   : > { %v810_v46 = vadd.f32 %v794_v62, %v730_v31  ;;  %v1034_v25 = vmul.f32 %v1002_v24, %v3418_v39  ;;  %v603_v45 = vperm.slane %v588_v34, 0  ;;  %v683_v53 = vperm.slane %v668_v33, 0 }
  0x50   : > { %v3584_v50 = vadd.f32 %v1113_v60, %v1049_v42  ;;  %v1114_v52 = vmul.f32 %v1082_v41, %v3424_v48  ;;  %v748_v38 = vrot.slane %v3364_v8, 7  ;;  %v555_v54 = vmul.f32 %v523_v44, %v3340_v0  ;;  %v3608_v41 = vld [vmem:[%s3337_s22 + $0x28] sm:$0xff] }
  0x51   : > { %v890_v37 = vadd.f32 %v874_v22, %v810_v46  ;;  %v635_v55 = vmul.f32 %v603_v45, %v3343_v1  ;;  %v828_v59 = vrot.slane %v3372_v12, 7  ;;  %v715_v57 = vmul.f32 %v683_v53, %v3346_v2  ;;  %v3596_v22 = vld [vmem:[%s3337_s22 + $0x8] sm:$0xff] }
  0x52   : > { %v1626_v56 = vmul.f32 %v1625_v51, %v3584_v50  ;;  %v763_v58 = vperm.slane %v748_v38, 0  ;;  %v908_v60 = vrot.slane %v3375_v13, 7  ;;  %v988_v18 = vrot.slane %v3388_v21, 7 }
  0x53   : > { %v970_v61 = vadd.f32 %v954_v43, %v890_v37  ;;  %v651_v62 = vadd.f32 %v635_v55, %v555_v54  ;;  %v843_v63 = vperm.slane %v828_v59, 0  ;;  %v1719_v28 = vperm.slane %v3497_v32, 6  ;;  %v3618_v37 = vld [vmem:[%s3337_s22 + $0x38] sm:$0xff] }
  0x54   : > { %1642 = vmatpush.msra.mxu2 %v1626_v56  ;;  %v795_v51 = vmul.f32 %v763_v58, %v3349_v3  ;;  %v923_v31 = vperm.slane %v908_v60, 0  ;;  %v1068_v24 = vrot.slane %v3409_v30, 7  ;;  %v1003_v43 = vperm.slane %v988_v18, 0  ;;  %v3629_v60 = vld [vmem:[%s3337_s22 + $0x48] sm:$0xff] }
  0x55   : > { %3067 = vmatmul.msk.f32.vlgmr.msra.gmra.mxu2 %vm1147_vm3, %v3506_v14  ;;  %v1050_v40 = vadd.f32 %v1034_v25, %v970_v61  ;;  %v731_v34 = vadd.f32 %v715_v57, %v651_v62  ;;  %v875_v42 = vmul.f32 %v843_v63, %v3352_v4  ;;  %v291_v44 = vadd.f32 %v3599_v26, %v3596_v22  ;;  %v3632_v61 = vld [vmem:[%s3337_s22 + $0x58] sm:$0xff]  ;;  %v3639_v18 = vld [vmem:[%s3337_s22 + $0x68] sm:$0xff] }
  0x56   : > { %v955_v33 = vmul.f32 %v923_v31, %v3369_v11  ;;  %v1083_v46 = vperm.slane %v1068_v24, 0  ;;  %v5094_v45 = vperm.slane %v3596_v22, 0  ;;  %v1035_v38 = vmul.f32 %v1003_v43, %v3418_v39 }
  0x57   : > { %v3614_v53 = vadd.f32 %v1114_v52, %v1050_v40  ;;  %v811_v25 = vadd.f32 %v795_v51, %v731_v34  ;;  %v5093_v54 = vperm.slane %v3599_v26, 0  ;;  %v292_v59 = vadd.f32 %v291_v44, %v3608_v41  ;;  %v3655_v44 = vld [vmem:[%s3337_s22 + $0x78] sm:$0xff] }
  0x58   : > { %v1115_v55 = vmul.f32 %v1083_v46, %v3424_v48  ;;  %v556_v56 = vmul.f32 %v5094_v45, %v3340_v0  ;;  %v5091_v57 = vperm.slane %v3608_v41, 0  ;;  %v5088_v63 = vperm.slane %v3618_v37, 0  ;;  %5109 = vst [vmem:[#allocation5_spill] sm:$0xff] %v3655_v44 }
  0x59   : > { %v1720_v52 = vmul.f32 %v1719_v28, %v3614_v53  ;;  %v891_v58 = vadd.f32 %v875_v42, %v811_v25  ;;  %v636_v62 = vmul.f32 %v5093_v54, %v3343_v1  ;;  %v293_v51 = vadd.f32 %v292_v59, %v3618_v37 }
  0x5a   : > { %v716_v28 = vmul.f32 %v5091_v57, %v3346_v2  ;;  %v5085_v31 = vperm.slane %v3629_v60, 0  ;;  %v5086_v24 = vperm.slane %v3632_v61, 0  ;;  %v796_v42 = vmul.f32 %v5088_v63, %v3349_v3 }
  0x5b   : > { %1736 = vmatpush.msrb.mxu0 %v1720_v52  ;;  %v971_v40 = vadd.f32 %v955_v33, %v891_v58  ;;  %v652_v34 = vadd.f32 %v636_v62, %v556_v56  ;;  %v5089_v43 = vperm.slane %v3639_v18, 0  ;;  %v1813_v46 = vperm.slane %v3497_v32, 7 }
  0x5c   : > { %3070 = vmatmul.msk.f32.vlgmr.msrb.gmra.mxu0 %vm1147_vm3, %v3506_v14  ;;  %v294_v25 = vadd.f32 %v293_v51, %v3629_v60  ;;  %v876_v33 = vmul.f32 %v5085_v31, %v3352_v4  ;;  %v956_v59 = vmul.f32 %v5086_v24, %v3369_v11  ;;  %v5092_v58 = vperm.slane %v3655_v44, 0 }
  0x5d   : > { %v1051_v56 = vadd.f32 %v1035_v38, %v971_v40  ;;  %v732_v52 = vadd.f32 %v716_v28, %v652_v34  ;;  %v509_v32 = vrot.slane %v3596_v22, 1  ;;  %v1036_v51 = vmul.f32 %v5089_v43, %v3418_v39 }
  0x5e   : > { %v295_v62 = vadd.f32 %v294_v25, %v3632_v61  ;;  %v589_v35 = vrot.slane %v3599_v26, 1  ;;  %v669_v29 = vrot.slane %v3608_v41, 1  ;;  %v749_v38 = vrot.slane %v3618_v37, 1 }
  0x5f   : > { %v3672_v20 = vadd.f32 %v1115_v55, %v1051_v56  ;;  %v812_v31 = vadd.f32 %v796_v42, %v732_v52  ;;  %v525_v24 = vperm.slane %v509_v32, 0  ;;  %v829_v25 = vrot.slane %v3629_v60, 1 }
  0x60   : > { %v296_v28 = vadd.f32 %v295_v62, %v3639_v18  ;;  %v605_v40 = vperm.slane %v589_v35, 0  ;;  %v685_v34 = vperm.slane %v669_v29, 0  ;;  %v765_v17 = vperm.slane %v749_v38, 0 }
  0x61   : > { %v1814_v19 = vmul.f32 %v1813_v46, %v3672_v20  ;;  %v892_v63 = vadd.f32 %v876_v33, %v812_v31  ;;  %v557_v43 = vmul.f32 %v525_v24, %v3340_v0  ;;  %v1116_v55 = vmul.f32 %v5092_v58, %v3424_v48 }
  0x62   : > { %v3680_v57 = vadd.f32 %v296_v28, %v3655_v44  ;;  %v637_v42 = vmul.f32 %v605_v40, %v3343_v1  ;;  %v845_v56 = vperm.slane %v829_v25, 0  ;;  %v717_v35 = vmul.f32 %v685_v34, %v3346_v2 }
  0x63   : > { %1830 = vmatpush.msrb.mxu2 %v1814_v19  ;;  %v972_v29 = vadd.f32 %v956_v59, %v892_v63  ;;  %v909_v46 = vrot.slane %v3632_v61, 1  ;;  %v989_v31 = vrot.slane %v3639_v18, 1  ;;  %v797_v52 = vmul.f32 %v765_v17, %v3349_v3 }
  0x64   : > { %3073 = vmatmul.msk.f32.vlgmr.msrb.gmra.mxu2 %vm1147_vm3, %v3506_v14  ;;  %v469_v24 = vmax.f32 %v3680_v57, 1.0  ;;  %v653_v33 = vadd.f32 %v637_v42, %v557_v43  ;;  %v1069_v32 = vrot.slane %v3655_v44, 1  ;;  %v510_v63 = vrot.slane %v3596_v22, 2 }
  0x65   : > { %v1052_v62 = vadd.f32 %v1036_v51, %v972_v29  ;;  %v925_v38 = vperm.slane %v909_v46, 0  ;;  %v1005_v19 = vperm.slane %v989_v31, 0  ;;  %v877_v28 = vmul.f32 %v845_v56, %v3352_v4 }
  0x66   : > { %3178 = vrcp.f32 %v469_v24  ;;  %v496_v59 = vand.u32 2147483648, %v469_v24  ;;  %vm490_vm5 = vweird.f32 %v469_v24  ;;  %v494_v40 = vand.u32 2147483647, %v469_v24 }
  0x67   : > { %v3696_v34 = vadd.f32 %v1116_v55, %v1052_v62  ;;  %v733_v25 = vadd.f32 %v717_v35, %v653_v33  ;;  %v957_v43 = vmul.f32 %v925_v38, %v3369_v11  ;;  %v1037_v17 = vmul.f32 %v1005_v19, %v3418_v39 }
  0x68   : > { %v1085_v42 = vperm.slane %v1069_v32, 0  ;;  %v526_v58 = vperm.slane %v510_v63, 0  ;;  %v590_v29 = vrot.slane %v3599_v26, 2  ;;  %v670_v46 = vrot.slane %v3608_v41, 2 }
  0x69   : > { %v813_v51 = vadd.f32 %v797_v52, %v733_v25  ;;  %v750_v31 = vrot.slane %v3618_v37, 2  ;;  %v497_v54 = vor.u32 1.1754944e-38, %v496_v59  ;;  %v830_v55 = vrot.slane %v3629_v60, 2 }
  0x6a   : > { %v558_v56 = vmul.f32 %v526_v58, %v3340_v0  ;;  %v910_v35 = vrot.slane %v3632_v61, 2  ;;  %vm3706_vm6 = vcmp.eq.f32.partialorder %v494_v40, 8.507059e+37  ;;  %v606_v62 = vperm.slane %v590_v29, 0 }
  0x6b   : > { %v893_v32 = vadd.f32 %v877_v28, %v813_v51  ;;  %v686_v52 = vperm.slane %v670_v46, 0  ;;  %v766_v38 = vperm.slane %v750_v31, 0  ;;  %v1117_v63 = vmul.f32 %v1085_v42, %v3424_v48 }
  0x6c   : > { %v3179_v19 = vpop.eup %3178  ;;  %v846_v25 = vperm.slane %v830_v55, 0  ;;  %v926_v45 = vperm.slane %v910_v35, 0  ;;  %v990_v59 = vrot.slane %v3639_v18, 2  ;;  %v638_v15 = vmul.f32 %v606_v62, %v3343_v1 }
  0x6d   : > { %v486_v58 = vmul.f32 %v3179_v19, %v469_v24  ;;  %v973_v16 = vadd.f32 %v957_v43, %v893_v32  ;;  %v1070_v40 = vrot.slane %v3655_v44, 2  ;;  %vm491_vm7 = vweird.f32 %v3179_v19 }
  0x6e   : > { %v718_v9 = vmul.f32 %v686_v52, %v3346_v2  ;;  %v798_v28 = vmul.f32 %v766_v38, %v3349_v3  ;;  %v878_v51 = vmul.f32 %v846_v25, %v3352_v4  ;;  %v654_v42 = vadd.f32 %v638_v15, %v558_v56  ;;  %vm3725_vm8 = vmor %vm490_vm5, %vm491_vm7 }
  0x6f   : > { %v487_v29 = vsub.f32 1.0, %v486_v58  ;;  %v1053_v46 = vadd.f32 %v1037_v17, %v973_v16  ;;  %v1006_v31 = vperm.slane %v990_v59, 0  ;;  %v958_v55 = vmul.f32 %v926_v45, %v3369_v11 }
  0x70   : > { %v511_v35 = vrot.slane %v3596_v22, 3  ;;  %v591_v43 = vrot.slane %v3599_v26, 3  ;;  %v671_v32 = vrot.slane %v3608_v41, 3  ;;  %v734_v52 = vadd.f32 %v718_v9, %v654_v42 }
  0x71   : > { %v488_v62 = vmul.f32 %v3179_v19, %v487_v29  ;;  %v3721_v30 = vadd.f32 %v1117_v63, %v1053_v46  ;;  %v1086_v21 = vperm.slane %v1070_v40, 0  ;;  %v1038_v15 = vmul.f32 %v1006_v31, %v3418_v39 }
  0x72   : > { %v527_v16 = vperm.slane %v511_v35, 0  ;;  %v607_v45 = vperm.slane %v591_v43, 0  ;;  %v687_v17 = vperm.slane %v671_v32, 0  ;;  %v814_v25 = vadd.f32 %v798_v28, %v734_v52 }
  0x73   : > { %v489_v56 = vadd.f32 %v3179_v19, %v488_v62  ;;  %v751_v59 = vrot.slane %v3618_v37, 3  ;;  %v831_v63 = vrot.slane %v3629_v60, 3  ;;  %v911_v40 = vrot.slane %v3632_v61, 3 }
  0x74   : > { %v559_v9 = vmul.f32 %v527_v16, %v3340_v0  ;;  %v639_v58 = vmul.f32 %v607_v45, %v3343_v1  ;;  %v719_v24 = vmul.f32 %v687_v17, %v3346_v2  ;;  %v894_v46 = vadd.f32 %v878_v51, %v814_v25 }
  0x75   : > { %v493_v29 = vsel %vm3725_vm8, %v3179_v19, %v489_v56  ;;  %v767_v42 = vperm.slane %v751_v59, 0  ;;  %v847_v31 = vperm.slane %v831_v63, 0  ;;  %v927_v43 = vperm.slane %v911_v40, 0 }
  0x76   : > { %v3740_v28 = vsel %vm3706_vm6, %v497_v54, %v493_v29  ;;  %v655_v35 = vadd.f32 %v639_v58, %v559_v9  ;;  %v991_v32 = vrot.slane %v3639_v18, 3  ;;  %v974_v16 = vadd.f32 %v958_v55, %v894_v46 }
  0x77   : > { %v1907_v62 = vperm.slane %v3740_v28, 0  ;;  %v1999_v52 = vperm.slane %v3740_v28, 1  ;;  %v1118_v45 = vmul.f32 %v1086_v21, %v3424_v48  ;;  %v2094_v19 = vperm.slane %v3740_v28, 2 }
  0x78   : > { %v735_v51 = vadd.f32 %v719_v24, %v655_v35  ;;  %v799_v38 = vmul.f32 %v767_v42, %v3349_v3  ;;  %v879_v33 = vmul.f32 %v847_v31, %v3352_v4  ;;  %v1054_v56 = vadd.f32 %v1038_v15, %v974_v16 }
  0x79   : > { %v1908_v54 = vmul.f32 %v1907_v62, %v3696_v34  ;;  %v2000_v17 = vmul.f32 %v1999_v52, %v3721_v30  ;;  %v1007_v25 = vperm.slane %v991_v32, 0  ;;  %v959_v63 = vmul.f32 %v927_v43, %v3369_v11 }
  0x7a   : > { %v815_v59 = vadd.f32 %v799_v38, %v735_v51  ;;  %v1071_v55 = vrot.slane %v3655_v44, 3  ;;  %v512_v21 = vrot.slane %v3596_v22, 4  ;;  %v3754_v9 = vadd.f32 %v1118_v45, %v1054_v56 }
  0x7b   : > { %1924 = vmatpush.msra.mxu0 %v1908_v54  ;;  %2016 = vmatpush.msra.mxu2 %v2000_v17  ;;  %v1039_v58 = vmul.f32 %v1007_v25, %v3418_v39  ;;  %v592_v24 = vrot.slane %v3599_v26, 4  ;;  %v672_v40 = vrot.slane %v3608_v41, 4  ;;  %v752_v42 = vrot.slane %v3618_v37, 4 }
  0x7c   : > { %3076 = vmatmul.msk.f32.vlgmr.msra.gmra.mxu0 %vm1147_vm3, %v3506_v14  ;;  %3079 = vmatmul.msk.f32.vlgmr.msra.gmra.mxu2 %vm1147_vm3, %v3506_v14  ;;  %v895_v15 = vadd.f32 %v879_v33, %v815_v59  ;;  %v1087_v29 = vperm.slane %v1071_v55, 0  ;;  %v528_v46 = vperm.slane %v512_v21, 0  ;;  %v2095_v31 = vmul.f32 %v2094_v19, %v3754_v9 }
  0x7d   : > { %v608_v35 = vperm.slane %v592_v24, 0  ;;  %v688_v43 = vperm.slane %v672_v40, 0  ;;  %v832_v32 = vrot.slane %v3629_v60, 4  ;;  %v768_v45 = vperm.slane %v752_v42, 0 }
  0x7e   : > { %v975_v62 = vadd.f32 %v959_v63, %v895_v15  ;;  %v1119_v52 = vmul.f32 %v1087_v29, %v3424_v48  ;;  %v560_v16 = vmul.f32 %v528_v46, %v3340_v0  ;;  %2111 = vmatpush.msrb.mxu0 %v2095_v31  ;;  %v912_v54 = vrot.slane %v3632_v61, 4 }
  0x7f   : > { %v640_v51 = vmul.f32 %v608_v35, %v3343_v1  ;;  %v720_v38 = vmul.f32 %v688_v43, %v3346_v2  ;;  %v848_v33 = vperm.slane %v832_v32, 0  ;;  %v2188_v19 = vperm.slane %v3740_v28, 3 }
  0x80   : > { %v1055_v17 = vadd.f32 %v1039_v58, %v975_v62  ;;  %v992_v56 = vrot.slane %v3639_v18, 4  ;;  %v1072_v25 = vrot.slane %v3655_v44, 4  ;;  %v800_v63 = vmul.f32 %v768_v45, %v3349_v3  ;;  %v3789_v62 = vld [vmem:[%s3332_s19] sm:$0xff] }
  0x81   : > { %v656_v59 = vadd.f32 %v640_v51, %v560_v16  ;;  %v880_v0 = vmul.f32 %v848_v33, %v3352_v4  ;;  %v928_v55 = vperm.slane %v912_v54, 0  ;;  %v2282_v2 = vperm.slane %v3740_v28, 4  ;;  %v3802_v54 = vld [vmem:[%s3332_s19 + $0x10] sm:$0xff] }
  0x82   : > { %v3776_v21 = vadd.f32 %v1119_v52, %v1055_v17  ;;  %v1008_v1 = vperm.slane %v992_v56, 0  ;;  %v513_v58 = vrot.slane %v3596_v22, 5  ;;  %v1088_v40 = vperm.slane %v1072_v25, 0 }
  0x83   : > { %v736_v24 = vadd.f32 %v720_v38, %v656_v59  ;;  %v593_v15 = vrot.slane %v3599_v26, 5  ;;  %v673_v29 = vrot.slane %v3608_v41, 5  ;;  %v960_v3 = vmul.f32 %v928_v55, %v3369_v11  ;;  %v3798_v38 = vld [vmem:[%s3332_s19 + $0x8] sm:$0xff] }
  0x84   : > { %v2189_v46 = vmul.f32 %v2188_v19, %v3776_v21  ;;  %3082 = vmatmul.msk.f32.vlgmr.msrb.gmra.mxu0 %vm1147_vm3, %v3506_v14  ;;  %v1040_v4 = vmul.f32 %v1008_v1, %v3418_v39  ;;  %v529_v42 = vperm.slane %v513_v58, 0  ;;  %v753_v32 = vrot.slane %v3618_v37, 5 }
  0x85   : > { %v816_v31 = vadd.f32 %v800_v63, %v736_v24  ;;  %v609_v35 = vperm.slane %v593_v15, 0  ;;  %v689_v43 = vperm.slane %v673_v29, 0  ;;  %v833_v16 = vrot.slane %v3629_v60, 5  ;;  %v3812_v15 = vld [vmem:[%s3332_s19 + $0x20] sm:$0xff] }
  0x86   : > { %2205 = vmatpush.msrb.mxu2 %v2189_v46  ;;  %v561_v52 = vmul.f32 %v3789_v62, %v529_v42  ;;  %v913_v45 = vrot.slane %v3632_v61, 5  ;;  %v993_v11 = vrot.slane %v3639_v18, 5  ;;  %v769_v19 = vperm.slane %v753_v32, 0  ;;  %v3816_v46 = vld [vmem:[%s3332_s19 + $0x28] sm:$0xff] }
  0x87   : > { %3085 = vmatmul.msk.f32.vlgmr.msrb.gmra.mxu2 %vm1147_vm3, %v3506_v14  ;;  %v896_v51 = vadd.f32 %v880_v0, %v816_v31  ;;  %v641_v33 = vmul.f32 %v3798_v38, %v609_v35  ;;  %v721_v17 = vmul.f32 %v3802_v54, %v689_v43  ;;  %v849_v56 = vperm.slane %v833_v16, 0  ;;  %v3808_v0 = vld [vmem:[%s3332_s19 + $0x18] sm:$0xff] }
  0x88   : > { %v929_v25 = vperm.slane %v913_v45, 0  ;;  %v1009_v59 = vperm.slane %v993_v11, 0  ;;  %v1073_v63 = vrot.slane %v3655_v44, 5  ;;  %v1120_v1 = vmul.f32 %v1088_v40, %v3424_v48 }
  0x89   : > { %v976_v55 = vadd.f32 %v960_v3, %v896_v51  ;;  %v657_v58 = vadd.f32 %v641_v33, %v561_v52  ;;  %v801_v24 = vmul.f32 %v3808_v0, %v769_v19  ;;  %v881_v29 = vmul.f32 %v3812_v15, %v849_v56 }
  0x8a   : > { %v961_v42 = vmul.f32 %v3816_v46, %v929_v25  ;;  %v1041_v31 = vmul.f32 %v1009_v59, %v3418_v39  ;;  %v2376_v35 = vperm.slane %v3740_v28, 5  ;;  %v514_v40 = vrot.slane %v3596_v22, 6 }
  0x8b   : > { %v1056_v3 = vadd.f32 %v1040_v4, %v976_v55  ;;  %v737_v43 = vadd.f32 %v721_v17, %v657_v58  ;;  %v594_v32 = vrot.slane %v3599_v26, 6  ;;  %v1089_v52 = vperm.slane %v1073_v63, 0 }
  0x8c   : > { %v674_v16 = vrot.slane %v3608_v41, 6  ;;  %v754_v45 = vrot.slane %v3618_v37, 6  ;;  %v834_v11 = vrot.slane %v3629_v60, 6  ;;  %v530_v19 = vperm.slane %v514_v40, 0 }
  0x8d   : > { %v3826_v51 = vadd.f32 %v1120_v1, %v1056_v3  ;;  %v817_v33 = vadd.f32 %v801_v24, %v737_v43  ;;  %v610_v39 = vperm.slane %v594_v32, 0  ;;  %v914_v17 = vrot.slane %v3632_v61, 6 }
  0x8e   : > { %v690_v56 = vperm.slane %v674_v16, 0  ;;  %v770_v25 = vperm.slane %v754_v45, 0  ;;  %v850_v4 = vperm.slane %v834_v11, 0  ;;  %v562_v63 = vmul.f32 %v3789_v62, %v530_v19 }
  0x8f   : > { %v2283_v59 = vmul.f32 %v2282_v2, %v3826_v51  ;;  %v897_v55 = vadd.f32 %v881_v29, %v817_v33  ;;  %v642_v58 = vmul.f32 %v3798_v38, %v610_v39  ;;  %v1121_v13 = vmul.f32 %v1089_v52, %v3424_v48 }
  0x90   : > { %v722_v1 = vmul.f32 %v3802_v54, %v690_v56  ;;  %v802_v24 = vmul.f32 %v3808_v0, %v770_v25  ;;  %v930_v3 = vperm.slane %v914_v17, 0  ;;  %v994_v32 = vrot.slane %v3639_v18, 6 }
  0x91   : > { %2299 = vmatpush.msra.mxu0 %v2283_v59  ;;  %v977_v43 = vadd.f32 %v961_v42, %v897_v55  ;;  %v658_v40 = vadd.f32 %v642_v58, %v562_v63  ;;  %v1074_v16 = vrot.slane %v3655_v44, 6  ;;  %v882_v2 = vmul.f32 %v3812_v15, %v850_v4  ;;  %v3270_v59 = vld [vmem:[%s3332_s19 + $0x30] sm:$0xff]  ;;  %v3271_v63 = vld [vmem:[%s3332_s19 + $0x38] sm:$0xff] }
  0x92   : > { %3088 = vmatmul.msk.f32.vlgmr.msra.gmra.mxu0 %vm1147_vm3, %v3506_v14  ;;  %v962_v48 = vmul.f32 %v3816_v46, %v930_v3  ;;  %v515_v29 = vrot.slane %v3596_v22, 7  ;;  %v595_v52 = vrot.slane %v3599_v26, 7  ;;  %v1010_v11 = vperm.slane %v994_v32, 0 }
  0x93   : > { %v1057_v45 = vadd.f32 %v1041_v31, %v977_v43  ;;  %v738_v42 = vadd.f32 %v722_v1, %v658_v40  ;;  %v1090_v33 = vperm.slane %v1074_v16, 0  ;;  %v675_v56 = vrot.slane %v3608_v41, 7 }
  0x94   : > { %v531_v19 = vperm.slane %v515_v29, 0  ;;  %v611_v39 = vperm.slane %v595_v52, 0  ;;  %v755_v25 = vrot.slane %v3618_v37, 7  ;;  %v1042_v55 = vmul.f32 %v3270_v59, %v1010_v11 }
  0x95   : > { %v3845_v17 = vadd.f32 %v1121_v13, %v1057_v45  ;;  %v818_v4 = vadd.f32 %v802_v24, %v738_v42  ;;  %v1122_v58 = vmul.f32 %v3271_v63, %v1090_v33  ;;  %v691_v1 = vperm.slane %v675_v56, 0 }
  0x96   : > { %v563_v3 = vmul.f32 %v3789_v62, %v531_v19  ;;  %v643_v31 = vmul.f32 %v3798_v38, %v611_v39  ;;  %v771_v43 = vperm.slane %v755_v25, 0  ;;  %v835_v16 = vrot.slane %v3629_v60, 7 }
  0x97   : > { %v2377_v40 = vmul.f32 %v2376_v35, %v3845_v17  ;;  %v898_v32 = vadd.f32 %v882_v2, %v818_v4  ;;  %v915_v29 = vrot.slane %v3632_v61, 7  ;;  %v723_v24 = vmul.f32 %v3802_v54, %v691_v1 }
  0x98   : > { %v659_v13 = vadd.f32 %v643_v31, %v563_v3  ;;  %v803_v52 = vmul.f32 %v3808_v0, %v771_v43  ;;  %v995_v45 = vrot.slane %v3639_v18, 7  ;;  %v851_v42 = vperm.slane %v835_v16, 0 }
  0x99   : > { %2393 = vmatpush.msra.mxu2 %v2377_v40  ;;  %v978_v62 = vadd.f32 %v962_v48, %v898_v32  ;;  %v931_v38 = vperm.slane %v915_v29, 0  ;;  %v1075_v11 = vrot.slane %v3655_v44, 7  ;;  %v2470_v19 = vperm.slane %v3740_v28, 6 }
  0x9a   : > { %3091 = vmatmul.msk.f32.vlgmr.msra.gmra.mxu2 %vm1147_vm3, %v3506_v14  ;;  %v739_v35 = vadd.f32 %v723_v24, %v659_v13  ;;  %v1011_v2 = vperm.slane %v995_v45, 0  ;;  %v883_v54 = vmul.f32 %v3812_v15, %v851_v42 }
  0x9b   : > { %v1058_v33 = vadd.f32 %v1042_v55, %v978_v62  ;;  %v963_v0 = vmul.f32 %v3816_v46, %v931_v38  ;;  %v1091_v56 = vperm.slane %v1075_v11, 0  ;;  %v2564_v55 = vperm.slane %v3740_v28, 7  ;;  %v3880_v28 = vld [vmem:[%s5080_s2 + $0x28] sm:$0xff] }
  0x9c   : > { %v819_v39 = vadd.f32 %v803_v52, %v739_v35  ;;  %v1043_v4 = vmul.f32 %v3270_v59, %v1011_v2 }
  0x9d   : > { %v3863_v25 = vadd.f32 %v1122_v58, %v1058_v33  ;;  %v1123_v1 = vmul.f32 %v3271_v63, %v1091_v56 }
  0x9e   : > { %v899_v48 = vadd.f32 %v883_v54, %v819_v39 }
  0x9f   : > { %v2471_v3 = vmul.f32 %v2470_v19, %v3863_v25 }
  0xa0   : > { %v979_v31 = vadd.f32 %v963_v0, %v899_v48 }
  0xa1   : > { %2487 = vmatpush.msrb.mxu0 %v2471_v3 }
  0xa2   : > { %v1059_v43 = vadd.f32 %v1043_v4, %v979_v31  ;;  %3094 = vmatmul.msk.f32.vlgmr.msrb.gmra.mxu0 %vm1147_vm3, %v3506_v14 }
  0xa4   : > { %v3869_v15 = vadd.f32 %v1123_v1, %v1059_v43 }
  0xa6   : > { %v2565_v46 = vmul.f32 %v2564_v55, %v3869_v15 }
  0xa8   : > { %2581 = vmatpush.msrb.mxu2 %v2565_v46  ;;  %v3874_v59 = vpop.permute.xlu0 %1144 }
  0xa9   : > { %3097 = vmatmul.msk.f32.vlgmr.msrb.gmra.mxu2 %vm1147_vm3, %v3506_v14 }
  0xb7   : > { %v1167_v58 = vpop.f32.mrf.mxu0 }
  0xb8   : > { %v1168_v63 = vadd.f32 %v1167_v58, %v3874_v59 }
  0xba   : > { %vm1170_vm9 = vcmp.gt.f32.partialorder %v1168_v63, 0.0  ;;  %v1171_v40 = vmul.f32 0.2, %v1168_v63 }
  0xbc   : > { %v1172_v32 = vsel %vm1170_vm9, %v1168_v63, %v1171_v40 }
  0xbd   : > { %1191 = vmatpush.msra.mxu1 %v1172_v32  ;;  %v1267_v16 = vpop.f32.mrf.mxu2 }
  0xbe   : > { %v1268_v29 = vadd.f32 %v1267_v16, %v3874_v59  ;;  %3053 = vmatmul.msk.f32.vlgmr.msra.gmra.mxu1 %vm1147_vm3, %v3880_v28 }
  0xbf   : > { %v1362_v14 = vpop.f32.mrf.mxu0 }
  0xc0   : > { %v1363_v13 = vadd.f32 %v1362_v14, %v3874_v59  ;;  %vm1270_vm10 = vcmp.gt.f32.partialorder %v1268_v29, 0.0  ;;  %v1271_v24 = vmul.f32 0.2, %v1268_v29 }
  0xc2   : > { %v1272_v52 = vsel %vm1270_vm10, %v1268_v29, %v1271_v24  ;;  %vm1365_vm11 = vcmp.gt.f32.partialorder %v1363_v13, 0.0  ;;  %v1366_v45 = vmul.f32 0.2, %v1363_v13  ;;  %vm441_vm10 = vweird.f32 %v3441_v10 }
  0xc3   : > { %1288 = vmatpush.msra.mxu3 %v1272_v52 }
  0xc4   : > { %3056 = vmatmul.msk.f32.vlgmr.msra.gmra.mxu3 %vm1147_vm3, %v3880_v28  ;;  %v1367_v62 = vsel %vm1365_vm11, %v1363_v13, %v1366_v45 }
  0xc5   : > { %1383 = vmatpush.msrb.mxu1 %v1367_v62  ;;  %v1456_v42 = vpop.f32.mrf.mxu2 }
  0xc6   : > { %v1457_v38 = vadd.f32 %v1456_v42, %v3874_v59  ;;  %3059 = vmatmul.msk.f32.vlgmr.msrb.gmra.mxu1 %vm1147_vm3, %v3880_v28 }
  0xc8   : > { %vm1459_vm12 = vcmp.gt.f32.partialorder %v1457_v38, 0.0  ;;  %v1460_v11 = vmul.f32 0.2, %v1457_v38 }
  0xca   : > { %v1550_v35 = vpop.f32.mrf.mxu0  ;;  %v1461_v2 = vsel %vm1459_vm12, %v1457_v38, %v1460_v11 }
  0xcb   : > { %v1551_v33 = vadd.f32 %v1550_v35, %v3874_v59  ;;  %1477 = vmatpush.msrb.mxu3 %v1461_v2 }
  0xcc   : > { %3062 = vmatmul.msk.f32.vlgmr.msrb.gmra.mxu3 %vm1147_vm3, %v3880_v28 }
  0xcd   : > { %vm1553_vm13 = vcmp.gt.f32.partialorder %v1551_v33, 0.0  ;;  %v1554_v19 = vmul.f32 0.2, %v1551_v33 }
  0xcf   : > { %v1555_v54 = vsel %vm1553_vm13, %v1551_v33, %v1554_v19 }
  0xd0   : > { %1571 = vmatpush.msra.mxu1 %v1555_v54 }
  0xd1   : > { %3065 = vmatmul.msk.f32.vlgmr.msra.gmra.mxu1 %vm1147_vm3, %v3880_v28 }
  0xd8   : > { %v1644_v39 = vpop.f32.mrf.mxu2 }
  0xd9   : > { %v1645_v0 = vadd.f32 %v1644_v39, %v3874_v59  ;;  %v1738_v56 = vpop.f32.mrf.mxu0 }
  0xda   : > { %v1739_v48 = vadd.f32 %v1738_v56, %v3874_v59 }
  0xdb   : > { %vm1647_vm14 = vcmp.gt.f32.partialorder %v1645_v0, 0.0  ;;  %v1648_v4 = vmul.f32 0.2, %v1645_v0 }
  0xdc   : > { %vm1741_vm15 = vcmp.gt.f32.partialorder %v1739_v48, 0.0  ;;  %v1742_v3 = vmul.f32 0.2, %v1739_v48 }
  0xdd   : > { %v1649_v31 = vsel %vm1647_vm14, %v1645_v0, %v1648_v4  ;;  %vm434_vm14 = vcmp.ne.f32.partialorder %v3441_v10, 0.0 }
  0xde   : > { %1665 = vmatpush.msra.mxu3 %v1649_v31  ;;  %v1743_v1 = vsel %vm1741_vm15, %v1739_v48, %v1742_v3 }
  0xdf   : > { %3068 = vmatmul.msk.f32.vlgmr.msra.gmra.mxu3 %vm1147_vm3, %v3880_v28  ;;  %1759 = vmatpush.msrb.mxu1 %v1743_v1 }
  0xe0   : > { %3071 = vmatmul.msk.f32.vlgmr.msrb.gmra.mxu1 %vm1147_vm3, %v3880_v28 }
  0xe7   : > { %v1832_v43 = vpop.f32.mrf.mxu2 }
  0xe8   : > { %v1833_v55 = vadd.f32 %v1832_v43, %v3874_v59 }
  0xea   : > { %vm1835_vm0 = vcmp.gt.f32.partialorder %v1833_v55, 0.0  ;;  %v1836_v46 = vmul.f32 0.2, %v1833_v55 }
  0xec   : > { %v1837_v58 = vsel %vm1835_vm0, %v1833_v55, %v1836_v46 }
  0xed   : > { %1853 = vmatpush.msrb.mxu3 %v1837_v58 }
  0xee   : > { %3074 = vmatmul.msk.f32.vlgmr.msrb.gmra.mxu3 %vm1147_vm3, %v3880_v28 }
  0xf9   : > { %v1926_v63 = vpop.f32.mrf.mxu0 }
  0xfa   : > { %v1927_v40 = vadd.f32 %v1926_v63, %v3874_v59 }
  0xfc   : > { %vm1929_vm1 = vcmp.gt.f32.partialorder %v1927_v40, 0.0  ;;  %v1930_v32 = vmul.f32 0.2, %v1927_v40 }
  0xfe   : > { %v1931_v16 = vsel %vm1929_vm1, %v1927_v40, %v1930_v32  ;;  %v3929_v40 = vpop.permute.xlu0 %1198 }
  0xff   : > { %1947 = vmatpush.msra.mxu1 %v1931_v16  ;;  %v2018_v29 = vpop.f32.mrf.mxu2 }
 0x100   : > { %v2019_v14 = vadd.f32 %v2018_v29, %v3874_v59  ;;  %3077 = vmatmul.msk.f32.vlgmr.msra.gmra.mxu1 %vm1147_vm3, %v3880_v28 }
 0x101   : > { %v2113_v13 = vpop.f32.mrf.mxu0 }
 0x102   : > { %vm2021_vm2 = vcmp.gt.f32.partialorder %v2019_v14, 0.0  ;;  %v2022_v24 = vmul.f32 0.2, %v2019_v14  ;;  %v2114_v52 = vadd.f32 %v2113_v13, %v3874_v59 }
 0x104   : > { %vm2116_vm4 = vcmp.gt.f32.partialorder %v2114_v52, 0.0  ;;  %v2117_v45 = vmul.f32 0.2, %v2114_v52  ;;  %v2023_v62 = vsel %vm2021_vm2, %v2019_v14, %v2022_v24 }
 0x105   : > { %2039 = vmatpush.msra.mxu3 %v2023_v62 }
 0x106   : > { %3080 = vmatmul.msk.f32.vlgmr.msra.gmra.mxu3 %vm1147_vm3, %v3880_v28  ;;  %v2118_v42 = vsel %vm2116_vm4, %v2114_v52, %v2117_v45 }
 0x107   : > { %2134 = vmatpush.msrb.mxu1 %v2118_v42 }
 0x108   : > { %3083 = vmatmul.msk.f32.vlgmr.msrb.gmra.mxu1 %vm1147_vm3, %v3880_v28 }
 0x10a   : > { %v2207_v38 = vpop.f32.mrf.mxu2 }
 0x10b   : > { %v2208_v11 = vadd.f32 %v2207_v38, %v3874_v59 }
 0x10d   : > { %vm2210_vm5 = vcmp.gt.f32.partialorder %v2208_v11, 0.0  ;;  %v2211_v35 = vmul.f32 0.2, %v2208_v11 }
 0x10f   : > { %v2301_v2 = vpop.f32.mrf.mxu0  ;;  %v2212_v33 = vsel %vm2210_vm5, %v2208_v11, %v2211_v35 }
 0x110   : > { %v2302_v19 = vadd.f32 %v2301_v2, %v3874_v59  ;;  %2228 = vmatpush.msrb.mxu3 %v2212_v33 }
 0x111   : > { %3086 = vmatmul.msk.f32.vlgmr.msrb.gmra.mxu3 %vm1147_vm3, %v3880_v28 }
 0x112   : > { %vm2304_vm6 = vcmp.gt.f32.partialorder %v2302_v19, 0.0  ;;  %v2305_v54 = vmul.f32 0.2, %v2302_v19 }
 0x114   : > { %v2306_v39 = vsel %vm2304_vm6, %v2302_v19, %v2305_v54 }
 0x115   : > { %2322 = vmatpush.msra.mxu1 %v2306_v39 }
 0x116   : > { %3089 = vmatmul.msk.f32.vlgmr.msra.gmra.mxu1 %vm1147_vm3, %v3880_v28 }
 0x11d   : > { %v2395_v0 = vpop.f32.mrf.mxu2 }
 0x11e   : > { %v2396_v56 = vadd.f32 %v2395_v0, %v3874_v59 }
 0x11f   : > { %v2489_v48 = vpop.f32.mrf.mxu0 }
 0x120   : > { %vm2398_vm7 = vcmp.gt.f32.partialorder %v2396_v56, 0.0  ;;  %v2399_v4 = vmul.f32 0.2, %v2396_v56  ;;  %v2490_v3 = vadd.f32 %v2489_v48, %v3874_v59 }
 0x122   : > { %vm2492_vm8 = vcmp.gt.f32.partialorder %v2490_v3, 0.0  ;;  %v2493_v31 = vmul.f32 0.2, %v2490_v3  ;;  %v2400_v1 = vsel %vm2398_vm7, %v2396_v56, %v2399_v4 }
 0x123   : > { %2416 = vmatpush.msra.mxu3 %v2400_v1 }
 0x124   : > { %3092 = vmatmul.msk.f32.vlgmr.msra.gmra.mxu3 %vm1147_vm3, %v3880_v28  ;;  %v2494_v43 = vsel %vm2492_vm8, %v2490_v3, %v2493_v31 }
 0x125   : > { %2510 = vmatpush.msrb.mxu1 %v2494_v43 }
 0x126   : > { %3095 = vmatmul.msk.f32.vlgmr.msrb.gmra.mxu1 %vm1147_vm3, %v3880_v28 }
 0x12c   : > { %v2583_v55 = vpop.f32.mrf.mxu2 }
 0x12d   : > { %v2584_v46 = vadd.f32 %v2583_v55, %v3874_v59 }
 0x12f   : > { %vm2586_vm9 = vcmp.gt.f32.partialorder %v2584_v46, 0.0  ;;  %v2587_v58 = vmul.f32 0.2, %v2584_v46 }
 0x131   : > { %v2588_v63 = vsel %vm2586_vm9, %v2584_v46, %v2587_v58  ;;  %v447_v58 = vand.u32 2147483648, %v3441_v10 }
 0x132   : > { %2604 = vmatpush.msrb.mxu3 %v2588_v63 }
 0x133   : > { %3098 = vmatmul.msk.f32.vlgmr.msrb.gmra.mxu3 %vm1147_vm3, %v3880_v28 }
 0x13b   : > { %v1193_v32 = vpop.f32.mrf.mxu1 }
 0x13c   : > { %v1201_v16 = vadd.f32 %v3929_v40, %v1193_v32 }
 0x13e   : > { %v3054_v29 = vmul.f32 -1.442695, %v1201_v16 }
 0x140   : > { %3180 = vpow2.f32 %v3054_v29  ;;  %v445_v29 = vand.u32 2147483647, %v3441_v10 }
 0x141   : > { %3182 = vrcp.f32 %v3441_v10 }
 0x142   : > { %vm446_vm13 = vcmp.eq.f32.partialorder %v445_v29, 8.507059e+37 }
 0x143   : > { %v1385_v14 = vpop.f32.mrf.mxu1 }
 0x144   : > { %v1388_v13 = vadd.f32 %v1385_v14, %v3929_v40 }
 0x146   : > { %v3181_v24 = vpop.eup %3180  ;;  %v3060_v52 = vmul.f32 -1.442695, %v1388_v13 }
 0x147   : > { %v1290_v59 = vpop.f32.mrf.mxu3  ;;  %v3935_v62 = vadd.f32 1.0, %v3181_v24  ;;  %v3183_v42 = vpop.eup %3182 }
 0x148   : > { %3184 = vpow2.f32 %v3060_v52  ;;  %v1293_v45 = vadd.f32 %v1290_v59, %v3929_v40  ;;  %v437_v2 = vmul.f32 %v3183_v42, %v3441_v10  ;;  %vm442_vm11 = vweird.f32 %v3183_v42 }
 0x149   : > { %vm3960_vm12 = vmor %vm441_vm10, %vm442_vm11  ;;  %vm1211_vm0 = vweird.f32 %v3935_v62 }
 0x14a   : > { %v3057_v28 = vmul.f32 -1.442695, %v1293_v45  ;;  %v438_v4 = vsub.f32 1.0, %v437_v2 }
 0x14c   : > { %3186 = vpow2.f32 %v3057_v28  ;;  %v439_v1 = vmul.f32 %v3183_v42, %v438_v4  ;;  %v448_v28 = vor.u32 1.1754944e-38, %v447_v58 }
 0x14d   : > { %3188 = vrcp.f32 %v3935_v62 }
 0x14e   : > { %v3185_v38 = vpop.eup %3184  ;;  %v1573_v11 = vpop.f32.mrf.mxu1  ;;  %v440_v16 = vadd.f32 %v3183_v42, %v439_v1  ;;  %v1215_v1 = vand.u32 2147483647, %v3935_v62 }
 0x14f   : > { %v1576_v35 = vadd.f32 %v1573_v11, %v3929_v40  ;;  %v3940_v33 = vadd.f32 1.0, %v3185_v38  ;;  %v1479_v39 = vpop.f32.mrf.mxu3 }
 0x150   : > { %v1482_v48 = vadd.f32 %v1479_v39, %v3929_v40  ;;  %vm1216_vm2 = vcmp.eq.f32.partialorder %v1215_v1, 8.507059e+37 }
 0x151   : > { %v3066_v54 = vmul.f32 -1.442695, %v1576_v35  ;;  %v444_v35 = vsel %vm3960_vm12, %v3183_v42, %v440_v16  ;;  %vm1398_vm6 = vweird.f32 %v3940_v33 }
 0x152   : > { %v3187_v19 = vpop.eup %3186  ;;  %v3063_v31 = vmul.f32 -1.442695, %v1482_v48  ;;  %v449_v4 = vsel %vm446_vm13, %v448_v28, %v444_v35  ;;  %v1402_v28 = vand.u32 2147483647, %v3940_v33 }
 0x153   : > { %v3942_v0 = vpop.eup %3188  ;;  %v3944_v56 = vadd.f32 1.0, %v3187_v19  ;;  %3190 = vpow2.f32 %v3066_v54  ;;  %v3991_v58 = vsel %vm434_vm14, %v449_v4, 0.0 }
 0x154   : > { %3192 = vrcp.f32 %v3940_v33  ;;  %v1207_v3 = vmul.f32 %v3942_v0, %v3935_v62  ;;  %vm1212_vm15 = vweird.f32 %v3942_v0  ;;  %vm4027_vm8 = vcmp.eq.f32.partialorder %v1402_v28, 8.507059e+37 }
 0x155   : > { %3194 = vrcp.f32 %v3944_v56  ;;  %vm3985_vm1 = vmor %vm1211_vm0, %vm1212_vm15  ;;  %v1309_v4 = vand.u32 2147483648, %v3944_v56  ;;  %vm1303_vm9 = vweird.f32 %v3944_v56 }
 0x156   : > { %3196 = vpow2.f32 %v3063_v31  ;;  %v1208_v55 = vsub.f32 1.0, %v1207_v3  ;;  %v1217_v3 = vand.u32 2147483648, %v3935_v62 }
 0x158   : > { %v1209_v52 = vmul.f32 %v3942_v0, %v1208_v55  ;;  %v1218_v62 = vor.u32 1.1754944e-38, %v1217_v3 }
 0x159   : > { %v3191_v43 = vpop.eup %3190 }
 0x15a   : > { %v3952_v46 = vpop.eup %3192  ;;  %v3955_v63 = vadd.f32 1.0, %v3191_v43  ;;  %v1210_v19 = vadd.f32 %v3942_v0, %v1209_v52 }
 0x15b   : > { %v3957_v32 = vpop.eup %3194  ;;  %v1394_v59 = vmul.f32 %v3952_v46, %v3940_v33  ;;  %vm1399_vm4 = vweird.f32 %v3952_v46 }
 0x15c   : > { %3198 = vrcp.f32 %v3955_v63  ;;  %v3197_v24 = vpop.eup %3196  ;;  %v1299_v38 = vmul.f32 %v3957_v32, %v3944_v56  ;;  %v1214_v16 = vsel %vm3985_vm1, %v3942_v0, %v1210_v19  ;;  %v1307_v19 = vand.u32 2147483647, %v3944_v56  ;;  %vm4023_vm7 = vmor %vm1398_vm6, %vm1399_vm4 }
 0x15d   : > { %v1761_v13 = vpop.f32.mrf.mxu1  ;;  %v3971_v11 = vadd.f32 1.0, %v3197_v24  ;;  %v1395_v54 = vsub.f32 1.0, %v1394_v59  ;;  %v1408_v24 = vrot.slane %v3991_v58, 2  ;;  %v1314_v59 = vrot.slane %v3991_v58, 1 }
 0x15e   : > { %v1764_v45 = vadd.f32 %v1761_v13, %v3929_v40  ;;  %v1300_v31 = vsub.f32 1.0, %v1299_v38  ;;  %v1404_v38 = vand.u32 2147483648, %v3940_v33  ;;  %vm1304_vm5 = vweird.f32 %v3957_v32 }
 0x15f   : > { %3200 = vrcp.f32 %v3971_v11  ;;  %v1396_v29 = vmul.f32 %v3952_v46, %v1395_v54  ;;  %vm4040_vm10 = vmor %vm1303_vm9, %vm1304_vm5  ;;  %vm4044_vm11 = vcmp.eq.f32.partialorder %v1307_v19, 8.507059e+37  ;;  %v1592_v28 = vand.u32 2147483648, %v3955_v63 }
 0x160   : > { %v3072_v2 = vmul.f32 -1.442695, %v1764_v45  ;;  %v1301_v52 = vmul.f32 %v3957_v32, %v1300_v31  ;;  %v1219_v45 = vsel %vm1216_vm2, %v1218_v62, %v1214_v16  ;;  %v1596_v31 = vrot.slane %v3991_v58, 4 }
 0x161   : > { %v4019_v3 = vmul.f32 %v1219_v45, %v3991_v58  ;;  %v1405_v16 = vor.u32 1.1754944e-38, %v1404_v38  ;;  %v1310_v45 = vor.u32 1.1754944e-38, %v1309_v4  ;;  %v1496_v43 = vand.u32 2147483647, %v3971_v11 }
 0x162   : > { %3202 = vpow2.f32 %v3072_v2  ;;  %v1667_v39 = vpop.f32.mrf.mxu3  ;;  %v3979_v48 = vpop.eup %3198  ;;  %v1397_v2 = vadd.f32 %v3952_v46, %v1396_v29  ;;  %vm1586_vm13 = vweird.f32 %v3955_v63  ;;  %vm1492_vm15 = vweird.f32 %v3971_v11 }
 0x163   : > { %v1670_v42 = vadd.f32 %v1667_v39, %v3929_v40  ;;  %v1582_v14 = vmul.f32 %v3979_v48, %v3955_v63  ;;  %v1302_v39 = vadd.f32 %v3957_v32, %v1301_v52  ;;  %v1222_v38 = vperm.slane %v4019_v3, 0 }
 0x164   : > { %v1401_v33 = vsel %vm4023_vm7, %v3952_v46, %v1397_v2  ;;  %v1590_v46 = vand.u32 2147483647, %v3955_v63  ;;  %vm1587_vm12 = vweird.f32 %v3979_v48  ;;  %vm4087_vm2 = vcmp.eq.f32.partialorder %v1496_v43, 8.507059e+37 }
 0x165   : > { %v3069_v55 = vmul.f32 -1.442695, %v1670_v42  ;;  %v3999_v13 = vpop.eup %3200  ;;  %v1583_v54 = vsub.f32 1.0, %v1582_v14  ;;  %vm4083_vm1 = vmor %vm1586_vm13, %vm1587_vm12  ;;  %vm456_vm6 = vweird.f32 %v3680_v57  ;;  %v1690_v3 = vrot.slane %v3991_v58, 5 }
 0x166   : > { %v1488_v0 = vmul.f32 %v3999_v13, %v3971_v11  ;;  %vm4072_vm14 = vcmp.eq.f32.partialorder %v1590_v46, 8.507059e+37  ;;  %vm1493_vm0 = vweird.f32 %v3999_v13 }
 0x167   : > { %3204 = vpow2.f32 %v3069_v55  ;;  %v1584_v56 = vmul.f32 %v3979_v48, %v1583_v54  ;;  %vm4097_vm5 = vmor %vm1492_vm15, %vm1493_vm0 }
 0x168   : > { %v3203_v10 = vpop.eup %3202  ;;  %3206 = vrcp.f32 %v3680_v57  ;;  %v1489_v42 = vsub.f32 1.0, %v1488_v0  ;;  %v1306_v0 = vsel %vm4040_vm10, %v3957_v32, %v1302_v39  ;;  %v1498_v32 = vand.u32 2147483648, %v3971_v11 }
 0x169   : > { %v4009_v35 = vadd.f32 1.0, %v3203_v10  ;;  %v1311_v4 = vsel %vm4044_vm11, %v1310_v45, %v1306_v0 }
 0x16a   : > { %v1490_v2 = vmul.f32 %v3999_v13, %v1489_v42  ;;  %v1585_v42 = vadd.f32 %v3979_v48, %v1584_v56  ;;  %v4081_v0 = vmul.f32 %v1314_v59, %v1311_v4  ;;  %v1499_v46 = vor.u32 1.1754944e-38, %v1498_v32 }
 0x16b   : > { %3208 = vrcp.f32 %v4009_v35  ;;  %v1780_v59 = vand.u32 2147483648, %v4009_v35  ;;  %v460_v32 = vand.u32 2147483647, %v3680_v57  ;;  %vm1774_vm7 = vweird.f32 %v4009_v35 }
 0x16c   : > { %v1491_v52 = vadd.f32 %v3999_v13, %v1490_v2  ;;  %v1778_v11 = vand.u32 2147483647, %v4009_v35 }
 0x16d   : > { %v3205_v1 = vpop.eup %3204  ;;  %vm461_vm0 = vcmp.eq.f32.partialorder %v460_v32, 8.507059e+37 }
 0x16e   : > { %v4033_v14 = vpop.eup %3206  ;;  %v4049_v10 = vadd.f32 1.0, %v3205_v1  ;;  %v1406_v1 = vsel %vm4027_vm8, %v1405_v16, %v1401_v33  ;;  %v1593_v16 = vor.u32 1.1754944e-38, %v1592_v28  ;;  %vm1779_vm11 = vcmp.eq.f32.partialorder %v1778_v11, 8.507059e+37 }
 0x16f   : > { %v452_v39 = vmul.f32 %v4033_v14, %v3680_v57  ;;  %v4077_v33 = vmul.f32 %v1408_v24, %v1406_v1  ;;  %v1589_v24 = vsel %vm4083_vm1, %v3979_v48, %v1585_v42  ;;  %v1495_v48 = vsel %vm4097_vm5, %v3999_v13, %v1491_v52 }
 0x170   : > { %3210 = vrcp.f32 %v4049_v10  ;;  %v1781_v13 = vor.u32 1.1754944e-38, %v1780_v59  ;;  %vm457_vm9 = vweird.f32 %v4033_v14  ;;  %v462_v52 = vand.u32 2147483648, %v3680_v57 }
 0x171   : > { %v3209_v54 = vpop.eup %3208  ;;  %v453_v28 = vsub.f32 1.0, %v452_v39  ;;  %v1855_v1 = vpop.f32.mrf.mxu3  ;;  %vm1680_vm12 = vweird.f32 %v4049_v10  ;;  %vm4131_vm13 = vmor %vm456_vm6, %vm457_vm9  ;;  %vm435_vm1 = vcmp.ne.f32.partialorder %v3680_v57, 0.0 }
 0x172   : > { %v1770_v62 = vmul.f32 %v3209_v54, %v4009_v35  ;;  %vm1775_vm4 = vweird.f32 %v3209_v54  ;;  %v1858_v39 = vadd.f32 %v1855_v1, %v3929_v40  ;;  %v1500_v35 = vsel %vm4087_vm2, %v1499_v46, %v1495_v48 }
 0x173   : > { %vm4112_vm8 = vmor %vm1774_vm7, %vm1775_vm4  ;;  %v454_v29 = vmul.f32 %v4033_v14, %v453_v28  ;;  %v1686_v28 = vand.u32 2147483648, %v4049_v10 }
 0x174   : > { %v1771_v56 = vsub.f32 1.0, %v1770_v62  ;;  %v1594_v62 = vsel %vm4072_vm14, %v1593_v16, %v1589_v24  ;;  %v3075_v1 = vmul.f32 -1.442695, %v1858_v39 }
 0x175   : > { %v1598_v16 = vmul.f32 %v1596_v31, %v1594_v62  ;;  %v455_v59 = vadd.f32 %v4033_v14, %v454_v29  ;;  %v4138_v31 = vmul.f32 %v1222_v38, %v3454_v47  ;;  %v5141_v47 = vrot.slane %v3991_v58, 6 }
 0x176   : > { %v3211_v19 = vpop.eup %3210  ;;  %v1772_v2 = vmul.f32 %v3209_v54, %v1771_v56  ;;  %3212 = vpow2.f32 %v3075_v1  ;;  %v1687_v62 = vor.u32 1.1754944e-38, %v1686_v28  ;;  %v463_v56 = vor.u32 1.1754944e-38, %v462_v52 }
 0x177   : > { %v1676_v43 = vmul.f32 %v3211_v19, %v4049_v10  ;;  %vm1681_vm10 = vweird.f32 %v3211_v19 }
 0x178   : > { %v1773_v42 = vadd.f32 %v3209_v54, %v1772_v2  ;;  %v1684_v2 = vand.u32 2147483647, %v4049_v10  ;;  %vm4142_vm14 = vmor %vm1680_vm12, %vm1681_vm10  ;;  %v1411_v10 = vperm.slane %v4077_v33, 0  ;;  %v459_v33 = vsel %vm4131_vm13, %v4033_v14, %v455_v59 }
 0x179   : > { %v1677_v45 = vsub.f32 1.0, %v1676_v43  ;;  %v5138_v43 = vrot.slane %v3991_v58, 3  ;;  %v464_v32 = vsel %vm461_vm0, %v463_v56, %v459_v33 }
 0x17a   : > { %v1777_v4 = vsel %vm4112_vm8, %v3209_v54, %v1773_v42  ;;  %v1317_v42 = vperm.slane %v4081_v0, 0  ;;  %vm1685_vm15 = vcmp.eq.f32.partialorder %v1684_v2, 8.507059e+37  ;;  %v4173_v2 = vld [vmem:[%s3337_s22 + $0x10] sm:$0xff] }
 0x17b   : > { %v1678_v55 = vmul.f32 %v3211_v19, %v1677_v45  ;;  %v1782_v54 = vsel %vm1779_vm11, %v1781_v13, %v1777_v4  ;;  %v1504_v39 = vmul.f32 %v5138_v43, %v1500_v35  ;;  %v1599_v4 = vperm.slane %v1598_v16, 0 }
 0x17c   : > { %v1786_v38 = vmul.f32 %v5141_v47, %v1782_v54  ;;  %v3213_v1 = vpop.eup %3212  ;;  %v4160_v35 = vmul.f32 %v1411_v10, %v3493_v23  ;;  %v4163_v52 = vmul.f32 %v1317_v42, %v3468_v27  ;;  %v1320_v23 = vperm.slane %v4173_v2, 1 }
 0x17d   : > { %v1679_v24 = vadd.f32 %v3211_v19, %v1678_v55  ;;  %v1949_v46 = vpop.f32.mrf.mxu1  ;;  %v1505_v0 = vperm.slane %v1504_v39, 0  ;;  %v4157_v13 = vadd.f32 1.0, %v3213_v1  ;;  %v4167_v55 = vld [vmem:[%s3337_s22] sm:$0xff]  ;;  %v1414_v27 = vperm.slane %v4173_v2, 2 }
 0x17e   : > { %v1952_v29 = vadd.f32 %v1949_v46, %v3929_v40  ;;  %v1319_v16 = vperm.slane %v4167_v55, 1  ;;  %v1787_v14 = vperm.slane %v1786_v38, 0  ;;  %v1413_v28 = vperm.slane %v4167_v55, 2 }
 0x17f   : > { %v1683_v11 = vsel %vm4142_vm14, %v3211_v19, %v1679_v24  ;;  %v4178_v57 = vmul.f32 %v1599_v4, %v3564_v49  ;;  %v4181_v59 = vmul.f32 %v1505_v0, %v3532_v36  ;;  %v4184_v46 = vsel %vm435_vm1, %v464_v32, 0.0 }
 0x180   : > { %v3078_v45 = vmul.f32 -1.442695, %v1952_v29  ;;  %v1688_v19 = vsel %vm1685_vm15, %v1687_v62, %v1683_v11  ;;  %v5142_v43 = vperm.slane %v3355_v5, 0  ;;  %v1327_v48 = vmul.f32 %v1319_v16, %v4163_v52 }
 0x181   : > { %v1692_v54 = vmul.f32 %v1690_v3, %v1688_v19  ;;  %v5143_v29 = vperm.slane %v3358_v6, 0  ;;  %v4194_v49 = vmul.f32 %v1787_v14, %v3614_v53  ;;  %v1878_v36 = vrot.slane %v3991_v58, 7 }
 0x182   : > { %3214 = vpow2.f32 %v3078_v45  ;;  %v1232_v39 = vmul.f32 %v4138_v31, %v5142_v43  ;;  %v1421_v3 = vmul.f32 %v1413_v28, %v4160_v35  ;;  %v1328_v62 = vmul.f32 %v1320_v23, %v4163_v52 }
 0x183   : > { %3216 = vrcp.f32 %v4157_v13  ;;  %v1233_v10 = vmul.f32 %v4138_v31, %v5143_v29  ;;  %v1693_v47 = vperm.slane %v1692_v54, 0  ;;  %v1422_v56 = vmul.f32 %v1414_v27, %v4160_v35 }
 0x184   : > { %vm1868_vm2 = vweird.f32 %v4157_v13  ;;  %v1872_v1 = vand.u32 2147483647, %v4157_v13  ;;  %v1874_v4 = vand.u32 2147483648, %v4157_v13  ;;  %v1335_v33 = vadd.f32 %v1327_v48, %v1232_v39 }
 0x185   : > { %v2136_v24 = vpop.f32.mrf.mxu1  ;;  %v1507_v16 = vperm.slane %v4167_v55, 3  ;;  %v1601_v14 = vperm.slane %v4167_v55, 4  ;;  %v4212_v32 = vmul.f32 %v1693_v47, %v3584_v50  ;;  %v1336_v28 = vadd.f32 %v1328_v62, %v1233_v10 }
 0x186   : > { %v2139_v63 = vadd.f32 %v2136_v24, %v3929_v40  ;;  %v1602_v54 = vperm.slane %v4173_v2, 4  ;;  %v5144_v24 = vperm.slane %v3361_v7, 0  ;;  %vm4222_vm4 = vcmp.eq.f32.partialorder %v1872_v1, 8.507059e+37 }
 0x187   : > { %v1875_v50 = vor.u32 1.1754944e-38, %v1874_v4  ;;  %v1429_v29 = vadd.f32 %v1421_v3, %v1335_v33  ;;  %v1515_v7 = vmul.f32 %v1507_v16, %v4181_v59  ;;  %v1430_v62 = vadd.f32 %v1422_v56, %v1336_v28  ;;  %v4246_v16 = vld [vmem:[%s3337_s22 + $0x20] sm:$0xff] }
 0x188   : > { %v3215_v42 = vpop.eup %3214  ;;  %v3084_v11 = vmul.f32 -1.442695, %v2139_v63  ;;  %v4218_v23 = vmul.f32 %v4138_v31, %v5144_v24  ;;  %v1508_v56 = vperm.slane %v4173_v2, 3 }
 0x189   : > { %v4198_v38 = vadd.f32 1.0, %v3215_v42  ;;  %v2041_v5 = vpop.f32.mrf.mxu3  ;;  %v3217_v6 = vpop.eup %3216 }
 0x18a   : > { %3218 = vpow2.f32 %v3084_v11  ;;  %v2044_v45 = vadd.f32 %v2041_v5, %v3929_v40  ;;  %v1864_v0 = vmul.f32 %v3217_v6, %v4157_v13  ;;  %vm1869_vm5 = vweird.f32 %v3217_v6 }
 0x18b   : > { %3220 = vrcp.f32 %v4198_v38  ;;  %v1966_v27 = vand.u32 2147483647, %v4198_v38  ;;  %v1968_v63 = vand.u32 2147483648, %v4198_v38  ;;  %v1609_v11 = vmul.f32 %v1601_v14, %v4178_v57  ;;  %vm1870_vm8 = vmor %vm1868_vm2, %vm1869_vm5 }
 0x18c   : > { %v3081_v19 = vmul.f32 -1.442695, %v2044_v45  ;;  %v1865_v43 = vsub.f32 1.0, %v1864_v0  ;;  %vm1962_vm6 = vweird.f32 %v4198_v38  ;;  %v4233_v45 = vmul.f32 %v1602_v54, %v4178_v57 }
 0x18d   : > { %vm4236_vm7 = vcmp.eq.f32.partialorder %v1966_v27, 8.507059e+37  ;;  %v1969_v4 = vor.u32 1.1754944e-38, %v1968_v63  ;;  %v1321_v14 = vperm.slane %v4246_v16, 1 }
 0x18e   : > { %3222 = vpow2.f32 %v3081_v19  ;;  %v1866_v42 = vmul.f32 %v3217_v6, %v1865_v43  ;;  %v1789_v19 = vperm.slane %v4167_v55, 6  ;;  %v1523_v43 = vadd.f32 %v1515_v7, %v1429_v29 }
 0x18f   : > { %v1790_v29 = vperm.slane %v4173_v2, 6  ;;  %v4262_v39 = vmul.f32 %v1321_v14, %v4163_v52 }
 0x190   : > { %v3219_v10 = vpop.eup %3218  ;;  %v1867_v33 = vadd.f32 %v3217_v6, %v1866_v42  ;;  %v1695_v42 = vperm.slane %v4167_v55, 5 }
 0x191   : > { %v3221_v47 = vpop.eup %3220  ;;  %v4230_v5 = vadd.f32 1.0, %v3219_v10 }
 0x192   : > { %v1958_v1 = vmul.f32 %v3221_v47, %v4198_v38  ;;  %v1871_v24 = vsel %vm1870_vm8, %v3217_v6, %v1867_v33  ;;  %vm1963_vm9 = vweird.f32 %v3221_v47  ;;  %v1516_v6 = vmul.f32 %v1508_v56, %v4181_v59 }
 0x193   : > { %3224 = vrcp.f32 %v4230_v5  ;;  %v2324_v0 = vpop.f32.mrf.mxu1  ;;  %v1876_v13 = vsel %vm4222_vm4, %v1875_v50, %v1871_v24  ;;  %vm1964_vm10 = vmor %vm1962_vm6, %vm1963_vm9  ;;  %v2153_v58 = vand.u32 2147483647, %v4230_v5  ;;  %v2347_v56 = vrot.slane %v4184_v46, 4 }
 0x194   : > { %v3223_v28 = vpop.eup %3222  ;;  %v1959_v54 = vsub.f32 1.0, %v1958_v1  ;;  %v2327_v27 = vadd.f32 %v2324_v0, %v3929_v40  ;;  %v2230_v63 = vpop.f32.mrf.mxu3  ;;  %v1880_v48 = vmul.f32 %v1878_v36, %v1876_v13  ;;  %v2155_v36 = vand.u32 2147483648, %v4230_v5 }
 0x195   : > { %v4252_v10 = vadd.f32 1.0, %v3223_v28  ;;  %v2233_v1 = vadd.f32 %v2230_v63, %v3929_v40  ;;  %v1703_v28 = vmul.f32 %v1695_v42, %v4212_v32  ;;  %v1524_v13 = vadd.f32 %v1516_v6, %v1430_v62 }
 0x196   : > { %v1960_v53 = vmul.f32 %v3221_v47, %v1959_v54  ;;  %v3090_v44 = vmul.f32 -1.442695, %v2327_v27  ;;  %v1881_v7 = vperm.slane %v1880_v48, 0  ;;  %v1797_v48 = vmul.f32 %v1789_v19, %v4194_v49 }
 0x197   : > { %3226 = vrcp.f32 %v4252_v10  ;;  %v3087_v33 = vmul.f32 -1.442695, %v2233_v1  ;;  %v2058_v38 = vand.u32 2147483647, %v4252_v10  ;;  %v2060_v24 = vand.u32 2147483648, %v4252_v10 }
 0x198   : > { %v1961_v50 = vadd.f32 %v3221_v47, %v1960_v53  ;;  %3228 = vpow2.f32 %v3090_v44  ;;  %v1617_v44 = vadd.f32 %v1609_v11, %v1523_v43  ;;  %v4281_v27 = vmul.f32 %v1881_v7, %v3672_v20 }
 0x199   : > { %v4264_v0 = vpop.eup %3224  ;;  %3230 = vpow2.f32 %v3087_v33  ;;  %vm2149_vm11 = vweird.f32 %v4230_v5  ;;  %vm4285_vm12 = vcmp.eq.f32.partialorder %v2153_v58, 8.507059e+37  ;;  %v2156_v3 = vor.u32 1.1754944e-38, %v2155_v36 }
 0x19a   : > { %v1965_v14 = vsel %vm1964_vm10, %v3221_v47, %v1961_v50  ;;  %v2145_v53 = vmul.f32 %v4264_v0, %v4230_v5  ;;  %v1883_v47 = vperm.slane %v4167_v55, 7  ;;  %vm2054_vm13 = vweird.f32 %v4252_v10 }
 0x19b   : > { %v1970_v54 = vsel %vm4236_vm7, %v1969_v4, %v1965_v14  ;;  %v1711_v4 = vadd.f32 %v1703_v28, %v1617_v44  ;;  %vm2150_vm14 = vweird.f32 %v4264_v0  ;;  %vm4294_vm15 = vcmp.eq.f32.partialorder %v2058_v38, 8.507059e+37 }
 0x19c   : > { %v2146_v63 = vsub.f32 1.0, %v2145_v53  ;;  %v1972_v43 = vmul.f32 %v1970_v54, %v4184_v46  ;;  %v2061_v6 = vor.u32 1.1754944e-38, %v2060_v24  ;;  %v1891_v36 = vmul.f32 %v1883_v47, %v4281_v27  ;;  %vm4310_vm0 = vmor %vm2149_vm11, %vm2150_vm14 }
 0x19d   : > { %v3227_v42 = vpop.eup %3226  ;;  %v1805_v14 = vadd.f32 %v1797_v48, %v1711_v4  ;;  %v4305_v53 = vadd.f32 %v4233_v45, %v1524_v13  ;;  %v1696_v44 = vperm.slane %v4173_v2, 5  ;;  %v4320_v45 = vld [vmem:[%s3337_s22 + $0x8] sm:$0xff]  ;;  %v4325_v5 = vmul.f32 %v1790_v29, %v4194_v49 }
 0x19e   : > { %v3229_v19 = vpop.eup %3228  ;;  %v2147_v1 = vmul.f32 %v4264_v0, %v2146_v63  ;;  %v2050_v20 = vmul.f32 %v3227_v42, %v4252_v10  ;;  %v1973_v54 = vperm.slane %v1972_v43, 0  ;;  %vm2055_vm1 = vweird.f32 %v3227_v42 }
 0x19f   : > { %v4298_v50 = vadd.f32 1.0, %v3229_v19  ;;  %v3231_v28 = vpop.eup %3230  ;;  %v228_v13 = vadd.f32 %v4320_v45, %v4167_v55  ;;  %v1884_v4 = vperm.slane %v4173_v2, 7  ;;  %vm2056_vm2 = vmor %vm2054_vm13, %vm2055_vm1  ;;  %v4337_v29 = vmul.f32 %v1696_v44, %v4212_v32 }
 0x1a0   : > { %v2148_v7 = vadd.f32 %v4264_v0, %v2147_v1  ;;  %v2051_v33 = vsub.f32 1.0, %v2050_v20  ;;  %v4314_v63 = vadd.f32 1.0, %v3231_v28  ;;  %v4330_v1 = vadd.f32 %v1891_v36, %v1805_v14 }
 0x1a1   : > { %3232 = vrcp.f32 %v4298_v50  ;;  %v2341_v43 = vand.u32 2147483647, %v4298_v50  ;;  %v229_v20 = vrot.slane %v228_v13, 4  ;;  %v2343_v36 = vand.u32 2147483648, %v4298_v50 }
 0x1a2   : > { %v2052_v24 = vmul.f32 %v3227_v42, %v2051_v33  ;;  %v2152_v48 = vsel %vm4310_vm0, %v4264_v0, %v2148_v7  ;;  %3234 = vrcp.f32 %v4314_v63  ;;  %v4340_v7 = vmul.f32 %v1973_v54, %v3696_v34 }
 0x1a3   : > { %v2512_v47 = vpop.f32.mrf.mxu1  ;;  %v2157_v33 = vsel %vm4285_vm12, %v2156_v3, %v2152_v48  ;;  %vm2337_vm4 = vweird.f32 %v4298_v50  ;;  %v4349_v44 = vmul.f32 %v1884_v4, %v4281_v27  ;;  %v5155_v34 = vrot.slane %v4184_v46, 1 }
 0x1a4   : > { %v2053_v19 = vadd.f32 %v3227_v42, %v2052_v24  ;;  %v2515_v0 = vadd.f32 %v2512_v47, %v3929_v40  ;;  %vm4354_vm5 = vcmp.eq.f32.partialorder %v2341_v43, 8.507059e+37  ;;  %v5158_v62 = vrot.slane %v4184_v46, 2 }
 0x1a5   : > { %v230_v47 = vadd.f32 %v229_v20, %v228_v13  ;;  %v2070_v13 = vperm.slane %v4320_v45, 1  ;;  %vm2243_vm7 = vweird.f32 %v4314_v63 }
 0x1a6   : > { %v2057_v28 = vsel %vm2056_vm2, %v3227_v42, %v2053_v19  ;;  %v3096_v38 = vmul.f32 -1.442695, %v2515_v0  ;;  %v1712_v42 = vadd.f32 %v4337_v29, %v4305_v53 }
 0x1a7   : > { %v3233_v14 = vpop.eup %3232  ;;  %v2062_v10 = vsel %vm4294_vm15, %v2061_v6, %v2057_v28  ;;  %v2418_v24 = vpop.f32.mrf.mxu3  ;;  %v2161_v6 = vmul.f32 %v5158_v62, %v2157_v33  ;;  %v2344_v28 = vor.u32 1.1754944e-38, %v2343_v36  ;;  %v231_v3 = vrot.slane %v230_v47, 2  ;;  %v4374_v62 = vld [vmem:[%s3337_s22 + $0x18] sm:$0xff] }
 0x1a8   : > { %v2067_v54 = vmul.f32 %v5155_v34, %v2062_v10  ;;  %v2333_v11 = vmul.f32 %v3233_v14, %v4298_v50  ;;  %3236 = vpow2.f32 %v3096_v38  ;;  %v2421_v48 = vadd.f32 %v2418_v24, %v3929_v40  ;;  %v3235_v4 = vpop.eup %3234 }
 0x1a9   : > { %v2247_v10 = vand.u32 2147483647, %v4314_v63  ;;  %v2239_v43 = vmul.f32 %v3235_v4, %v4314_v63  ;;  %v2249_v34 = vand.u32 2147483648, %v4314_v63  ;;  %vm2338_vm6 = vweird.f32 %v3233_v14 }
 0x1aa   : > { %v2068_v19 = vperm.slane %v2067_v54, 0  ;;  %v2334_v0 = vsub.f32 1.0, %v2333_v11  ;;  %v3093_v55 = vmul.f32 -1.442695, %v2421_v48  ;;  %v2162_v20 = vperm.slane %v2161_v6, 0  ;;  %vm2339_vm8 = vmor %vm2337_vm4, %vm2338_vm6 }
 0x1ab   : > { %v2240_v38 = vsub.f32 1.0, %v2239_v43  ;;  %v232_v36 = vadd.f32 %v231_v3, %v230_v47  ;;  %v5159_v54 = vperm.slane %v3596_v22, 0  ;;  %vm2244_vm9 = vweird.f32 %v3235_v4 }
 0x1ac   : > { %v4366_v58 = vmul.f32 %v2068_v19, %v3721_v30  ;;  %v2335_v33 = vmul.f32 %v3233_v14, %v2334_v0  ;;  %3238 = vpow2.f32 %v3093_v55  ;;  %v235_v30 = vadd.f32 %v4374_v62, %v4173_v2  ;;  %vm2245_vm11 = vmor %vm2243_vm7, %vm2244_vm9 }
 0x1ad   : > { %v1983_v11 = vmul.f32 %v4340_v7, %v5159_v54  ;;  %v2241_v6 = vmul.f32 %v3235_v4, %v2240_v38  ;;  %vm4380_vm10 = vcmp.eq.f32.partialorder %v2247_v10, 8.507059e+37  ;;  %v233_v3 = vrot.slane %v232_v36, 1 }
 0x1ae   : > { %v2336_v24 = vadd.f32 %v3233_v14, %v2335_v33  ;;  %v3237_v48 = vpop.eup %3236  ;;  %v2250_v22 = vor.u32 1.1754944e-38, %v2249_v34  ;;  %v2078_v0 = vmul.f32 %v2070_v13, %v4366_v58  ;;  %v4388_v43 = vmul.f32 %v2162_v20, %v3754_v9 }
 0x1af   : > { %v4384_v19 = vadd.f32 1.0, %v3237_v48  ;;  %v2242_v50 = vadd.f32 %v3235_v4, %v2241_v6  ;;  %v4392_v33 = vadd.f32 %v233_v3, %v232_v36  ;;  %v236_v34 = vrot.slane %v235_v30, 4 }
 0x1b0   : > { %v2340_v47 = vsel %vm2339_vm8, %v3233_v14, %v2336_v24  ;;  %v1991_v14 = vadd.f32 %v1983_v11, %v4330_v1  ;;  %v2441_v20 = vrot.slane %v4184_v46, 5  ;;  %v5162_v1 = vrot.slane %v4184_v46, 3 }
 0x1b1   : > { %v2345_v2 = vsel %vm4354_vm5, %v2344_v28, %v2340_v47  ;;  %3240 = vrcp.f32 %v4384_v19  ;;  %v2246_v9 = vsel %vm2245_vm11, %v3235_v4, %v2242_v50  ;;  %v2531_v63 = vand.u32 2147483648, %v4384_v19 }
 0x1b2   : > { %v2349_v10 = vmul.f32 %v2347_v56, %v2345_v2  ;;  %v3239_v13 = vpop.eup %3238  ;;  %3242 = vrcp.f32 %v4392_v33  ;;  %v2251_v56 = vsel %vm4380_vm10, %v2250_v22, %v2246_v9  ;;  %v2086_v38 = vadd.f32 %v2078_v0, %v1991_v14 }
 0x1b3   : > { %v4407_v28 = vadd.f32 1.0, %v3239_v13  ;;  %v2255_v36 = vmul.f32 %v5162_v1, %v2251_v56  ;;  %v2529_v4 = vand.u32 2147483647, %v4384_v19  ;;  %v5163_v24 = vperm.slane %v4320_v45, 2 }
 0x1b4   : > { %v2258_v11 = vperm.slane %v4320_v45, 3  ;;  %v2350_v53 = vperm.slane %v2349_v10, 0  ;;  %v2352_v48 = vperm.slane %v4320_v45, 4  ;;  %v237_v6 = vadd.f32 %v236_v34, %v235_v30 }
 0x1b5   : > { %v2172_v54 = vmul.f32 %v5163_v24, %v4388_v43  ;;  %3244 = vrcp.f32 %v4407_v28  ;;  %v2256_v55 = vperm.slane %v2255_v36, 0  ;;  %v5164_v22 = vperm.slane %v3599_v26, 0 }
 0x1b6   : > { %v2606_v29 = vpop.f32.mrf.mxu3  ;;  %vm2525_vm12 = vweird.f32 %v4384_v19  ;;  %v2532_v50 = vor.u32 1.1754944e-38, %v2531_v63  ;;  %v1806_v14 = vadd.f32 %v4325_v5, %v1712_v42  ;;  %vm4428_vm13 = vcmp.eq.f32.partialorder %v2529_v4, 8.507059e+37 }
 0x1b7   : > { %v2609_v3 = vadd.f32 %v2606_v29, %v3929_v40  ;;  %v1984_v0 = vmul.f32 %v4340_v7, %v5164_v22  ;;  %v3241_v2 = vpop.eup %3240  ;;  %v2180_v10 = vadd.f32 %v2172_v54, %v2086_v38  ;;  %v2435_v40 = vand.u32 2147483647, %v4407_v28 }
 0x1b8   : > { %v4425_v13 = vpop.eup %3242  ;;  %v2521_v30 = vmul.f32 %v3241_v2, %v4384_v19  ;;  %v4436_v56 = vmul.f32 %v2350_v53, %v3826_v51  ;;  %v238_v42 = vrot.slane %v237_v6, 2  ;;  %v4441_v38 = vmul.f32 %v2256_v55, %v3776_v21 }
 0x1b9   : > { %v3099_v63 = vmul.f32 -1.442695, %v2609_v3  ;;  %v307_v5 = vmul.f32 %v4425_v13, %v4392_v33  ;;  %vm2526_vm14 = vweird.f32 %v3241_v2  ;;  %vm2431_vm15 = vweird.f32 %v4407_v28 }
 0x1ba   : > { %v2522_v1 = vsub.f32 1.0, %v2521_v30  ;;  %v2437_v36 = vand.u32 2147483648, %v4407_v28  ;;  %vm311_vm0 = vweird.f32 %v4392_v33  ;;  %vm312_vm1 = vweird.f32 %v4425_v13  ;;  %vm2527_vm4 = vmor %vm2525_vm12, %vm2526_vm14 }
 0x1bb   : > { %v3245_v4 = vpop.eup %3244  ;;  %3246 = vpow2.f32 %v3099_v63  ;;  %v308_v24 = vsub.f32 1.0, %v307_v5  ;;  %vm4448_vm2 = vcmp.eq.f32.partialorder %v2435_v40, 8.507059e+37  ;;  %v315_v21 = vand.u32 2147483647, %v4392_v33  ;;  %vm4466_vm6 = vmor %vm311_vm0, %vm312_vm1 }
 0x1bc   : > { %v2523_v51 = vmul.f32 %v3241_v2, %v2522_v1  ;;  %v2427_v54 = vmul.f32 %v3245_v4, %v4407_v28  ;;  %v317_v29 = vand.u32 2147483648, %v4392_v33  ;;  %v2360_v3 = vmul.f32 %v2352_v48, %v4436_v56 }
 0x1bd   : > { %v309_v55 = vmul.f32 %v4425_v13, %v308_v24  ;;  %v239_v22 = vadd.f32 %v238_v42, %v237_v6  ;;  %v2071_v30 = vperm.slane %v4374_v62, 1  ;;  %v2438_v5 = vor.u32 1.1754944e-38, %v2437_v36 }
 0x1be   : > { %v2524_v63 = vadd.f32 %v3241_v2, %v2523_v51  ;;  %v2428_v40 = vsub.f32 1.0, %v2427_v54  ;;  %v1900_v1 = vadd.f32 %v4349_v44, %v1806_v14  ;;  %vm2432_vm5 = vweird.f32 %v3245_v4 }
 0x1bf   : > { %v310_v26 = vadd.f32 %v4425_v13, %v309_v55  ;;  %v2266_v6 = vmul.f32 %v2258_v11, %v4441_v38  ;;  %v240_v42 = vrot.slane %v239_v22, 1  ;;  %vm4471_vm7 = vcmp.eq.f32.partialorder %v315_v21, 8.507059e+37  ;;  %vm2433_vm8 = vmor %vm2431_vm15, %vm2432_vm5 }
 0x1c0   : > { %v2528_v19 = vsel %vm2527_vm4, %v3241_v2, %v2524_v63  ;;  %v2429_v24 = vmul.f32 %v3245_v4, %v2428_v40  ;;  %v318_v44 = vor.u32 1.1754944e-38, %v317_v29  ;;  %v2079_v55 = vmul.f32 %v2071_v30, %v4366_v58 }
 0x1c1   : > { %v3247_v14 = vpop.eup %3246  ;;  %v2533_v51 = vsel %vm4428_vm13, %v2532_v50, %v2528_v19  ;;  %v4477_v54 = vadd.f32 %v240_v42, %v239_v22  ;;  %v2165_v9 = vperm.slane %v4374_v62, 2  ;;  %v5173_v11 = vrot.slane %v4184_v46, 6 }
 0x1c2   : > { %v2430_v2 = vadd.f32 %v3245_v4, %v2429_v24  ;;  %v4483_v63 = vadd.f32 1.0, %v3247_v14  ;;  %v314_v21 = vsel %vm4466_vm6, %v4425_v13, %v310_v26  ;;  %vm298_vm9 = vcmp.ne.f32.partialorder %v4392_v33, 0.0 }
 0x1c3   : > { %v2537_v47 = vmul.f32 %v5173_v11, %v2533_v51  ;;  %3248 = vrcp.f32 %v4477_v54  ;;  %v1992_v50 = vadd.f32 %v1984_v0, %v1900_v1  ;;  %v2259_v34 = vperm.slane %v4374_v62, 3 }
 0x1c4   : > { %v2434_v22 = vsel %vm2433_vm8, %v3245_v4, %v2430_v2  ;;  %3250 = vrcp.f32 %v4483_v63  ;;  %v2274_v30 = vadd.f32 %v2266_v6, %v2180_v10  ;;  %v2625_v13 = vand.u32 2147483648, %v4483_v63 }
 0x1c5   : > { %v2538_v29 = vperm.slane %v2537_v47, 0  ;;  %v2439_v40 = vsel %vm4448_vm2, %v2438_v5, %v2434_v22  ;;  %v319_v28 = vsel %vm4471_vm7, %v318_v44, %v314_v21  ;;  %v2087_v26 = vadd.f32 %v2079_v55, %v1992_v50  ;;  %v4539_v50 = vld [vmem:[%s3337_s22 + $0x28] sm:$0xff] }
 0x1c6   : > { %v2443_v0 = vmul.f32 %v2441_v20, %v2439_v40  ;;  %v2634_v47 = vperm.slane %v4320_v45, 7  ;;  %v2173_v4 = vmul.f32 %v2165_v9, %v4388_v43  ;;  %v2623_v10 = vand.u32 2147483647, %v4483_v63 }
 0x1c7   : > { %v4501_v48 = vmul.f32 %v2538_v29, %v3863_v25  ;;  %v330_v53 = vand.u32 2147483647, %v4477_v54  ;;  %v332_v5 = vand.u32 2147483648, %v4477_v54  ;;  %v2267_v1 = vmul.f32 %v2259_v34, %v4441_v38 }
 0x1c8   : > { %v2444_v6 = vperm.slane %v2443_v0, 0  ;;  %v4513_v25 = vsel %vm298_vm9, %v319_v28, 0.0  ;;  %v2368_v42 = vadd.f32 %v2360_v3, %v2274_v30  ;;  %v2353_v20 = vperm.slane %v4374_v62, 4 }
 0x1c9   : > { %v4516_v19 = vpop.eup %3248  ;;  %vm2619_vm10 = vweird.f32 %v4483_v63  ;;  %v2626_v9 = vor.u32 1.1754944e-38, %v2625_v13  ;;  %vm326_vm11 = vweird.f32 %v4477_v54  ;;  %v2181_v24 = vadd.f32 %v2173_v4, %v2087_v26 }
 0x1ca   : > { %v3251_v36 = vpop.eup %3250  ;;  %v4521_v44 = vmul.f32 %v2444_v6, %v3845_v17  ;;  %v5174_v33 = vperm.slane %v4320_v45, 6  ;;  %v322_v3 = vmul.f32 %v4516_v19, %v4477_v54  ;;  %v2447_v51 = vperm.slane %v4374_v62, 5 }
 0x1cb   : > { %v2615_v55 = vmul.f32 %v3251_v36, %v4483_v63  ;;  %vm4530_vm12 = vcmp.eq.f32.partialorder %v2623_v10, 8.507059e+37  ;;  %vm4534_vm13 = vcmp.eq.f32.partialorder %v330_v53, 8.507059e+37  ;;  %v333_v17 = vor.u32 1.1754944e-38, %v332_v5 }
 0x1cc   : > { %v2548_v14 = vmul.f32 %v5174_v33, %v4501_v48  ;;  %v2275_v21 = vadd.f32 %v2267_v1, %v2181_v24  ;;  %v242_v34 = vadd.f32 %v4539_v50, %v4246_v16  ;;  %vm2620_vm14 = vweird.f32 %v3251_v36 }
 0x1cd   : > { %v323_v29 = vsub.f32 1.0, %v322_v3  ;;  %vm327_vm15 = vweird.f32 %v4516_v19  ;;  %v2361_v22 = vmul.f32 %v2353_v20, %v4436_v56  ;;  %v2616_v30 = vsub.f32 1.0, %v2615_v55  ;;  %vm2621_vm2 = vmor %vm2619_vm10, %vm2620_vm14 }
 0x1ce   : > { %v243_v40 = vrot.slane %v242_v34, 4  ;;  %v1337_v13 = vadd.f32 %v4262_v39, %v4218_v23  ;;  %v1415_v28 = vperm.slane %v4246_v16, 2  ;;  %v5179_v26 = vperm.slane %v4320_v45, 5  ;;  %vm4562_vm1 = vmor %vm326_vm11, %vm327_vm15  ;;  %v4619_v45 = vld [vmem:[%s3337_s22 + $0x38] sm:$0xff] }
 0x1cf   : > { %vm299_vm0 = vcmp.ne.f32.partialorder %v4477_v54, 0.0  ;;  %v324_v4 = vmul.f32 %v4516_v19, %v323_v29  ;;  %v2455_v10 = vmul.f32 %v2447_v51, %v4521_v44  ;;  %v1509_v53 = vperm.slane %v4246_v16, 3 }
 0x1d0   : > { %v2454_v0 = vmul.f32 %v5179_v26, %v4521_v44  ;;  %v2617_v5 = vmul.f32 %v3251_v36, %v2616_v30  ;;  %v244_v1 = vadd.f32 %v243_v40, %v242_v34  ;;  %v1423_v6 = vmul.f32 %v1415_v28, %v4160_v35 }
 0x1d1   : > { %v1603_v23 = vperm.slane %v4246_v16, 4  ;;  %v325_v39 = vadd.f32 %v4516_v19, %v324_v4  ;;  %v2369_v24 = vadd.f32 %v2361_v22, %v2275_v21  ;;  %v2541_v33 = vperm.slane %v4374_v62, 6 }
 0x1d2   : > { %v1517_v3 = vmul.f32 %v1509_v53, %v4181_v59  ;;  %v2618_v51 = vadd.f32 %v3251_v36, %v2617_v5  ;;  %v2635_v55 = vperm.slane %v4374_v62, 7  ;;  %v245_v34 = vrot.slane %v244_v1, 2 }
 0x1d3   : > { %v1431_v29 = vadd.f32 %v1423_v6, %v1337_v13  ;;  %v2462_v30 = vadd.f32 %v2454_v0, %v2368_v42  ;;  %v2463_v40 = vadd.f32 %v2455_v10, %v2369_v24  ;;  %v1611_v28 = vmul.f32 %v1603_v23, %v4178_v57 }
 0x1d4   : > { %v1697_v26 = vperm.slane %v4246_v16, 5  ;;  %v2622_v21 = vsel %vm2621_vm2, %v3251_v36, %v2618_v51  ;;  %v329_v22 = vsel %vm4562_vm1, %v4516_v19, %v325_v39  ;;  %v246_v4 = vadd.f32 %v245_v34, %v244_v1 }
 0x1d5   : > { %v1525_v53 = vadd.f32 %v1517_v3, %v1431_v29  ;;  %v2627_v62 = vsel %vm4530_vm12, %v2626_v9, %v2622_v21  ;;  %v1791_v63 = vperm.slane %v4246_v16, 6  ;;  %v1885_v42 = vperm.slane %v4246_v16, 7 }
 0x1d6   : > { %v1705_v13 = vmul.f32 %v1697_v26, %v4212_v32  ;;  %v5182_v0 = vrot.slane %v4184_v46, 7  ;;  %v2549_v36 = vmul.f32 %v2541_v33, %v4501_v48  ;;  %v247_v5 = vrot.slane %v246_v4, 1 }
 0x1d7   : > { %v1619_v6 = vadd.f32 %v1611_v28, %v1525_v53  ;;  %v2556_v23 = vadd.f32 %v2548_v14, %v2462_v30  ;;  %v334_v19 = vsel %vm4534_vm13, %v333_v17, %v329_v22  ;;  %v2072_v11 = vperm.slane %v4539_v50, 1 }
 0x1d8   : > { %v2631_v10 = vmul.f32 %v5182_v0, %v2627_v62  ;;  %v2166_v9 = vperm.slane %v4539_v50, 2  ;;  %v4589_v39 = vadd.f32 %v247_v5, %v246_v4  ;;  %v2260_v16 = vperm.slane %v4539_v50, 3 }
 0x1d9   : > { %v1713_v20 = vadd.f32 %v1705_v13, %v1619_v6  ;;  %v2557_v46 = vadd.f32 %v2549_v36, %v2463_v40  ;;  %v1799_v24 = vmul.f32 %v1791_v63, %v4194_v49  ;;  %v1893_v33 = vmul.f32 %v1885_v42, %v4281_v27  ;;  %v3278_v13 = vld [vmem:[%s3337_s22 + $0x30] sm:$0xff] }
 0x1da   : > { %v2632_v1 = vperm.slane %v2631_v10, 0  ;;  %v2354_v14 = vperm.slane %v4539_v50, 4  ;;  %v427_v17 = vsel %vm299_vm0, %v334_v19, 0.0  ;;  %3252 = vrcp.f32 %v4589_v39 }
 0x1db   : > { %v2448_v3 = vperm.slane %v4539_v50, 5  ;;  %v1807_v51 = vadd.f32 %v1799_v24, %v1713_v20  ;;  %v5183_v34 = vperm.slane %v3608_v41, 0  ;;  %v2080_v30 = vmul.f32 %v2072_v11, %v4366_v58 }
 0x1dc   : > { %v4596_v2 = vmul.f32 %v2632_v1, %v3869_v15  ;;  %v2174_v40 = vmul.f32 %v2166_v9, %v4388_v43  ;;  %vm341_vm4 = vweird.f32 %v4589_v39  ;;  %v2268_v28 = vmul.f32 %v2260_v16, %v4441_v38 }
 0x1dd   : > { %v1985_v29 = vmul.f32 %v4340_v7, %v5183_v34  ;;  %v345_v26 = vand.u32 2147483647, %v4589_v39  ;;  %v347_v41 = vand.u32 2147483648, %v4589_v39  ;;  %v1901_v21 = vadd.f32 %v1893_v33, %v1807_v51 }
 0x1de   : > { %v2642_v15 = vmul.f32 %v2634_v47, %v4596_v2  ;;  %v2643_v54 = vmul.f32 %v2635_v55, %v4596_v2  ;;  %v2362_v22 = vmul.f32 %v2354_v14, %v4436_v56  ;;  %v2456_v62 = vmul.f32 %v2448_v3, %v4521_v44 }
 0x1df   : > { %v249_v47 = vadd.f32 %v4619_v45, %v3278_v13  ;;  %v1993_v55 = vadd.f32 %v1985_v29, %v1901_v21  ;;  %v2542_v63 = vperm.slane %v4539_v50, 6  ;;  %v5184_v42 = vperm.slane %v3364_v8, 0 }
 0x1e0   : > { %v2650_v4 = vadd.f32 %v2642_v15, %v2556_v23  ;;  %v2651_v53 = vadd.f32 %v2643_v54, %v2557_v46  ;;  %v1322_v10 = vperm.slane %v3278_v13, 1  ;;  %v3253_v36 = vpop.eup %3252  ;;  %v1416_v19 = vperm.slane %v3278_v13, 2 }
 0x1e1   : > { %v1235_v0 = vmul.f32 %v4138_v31, %v5184_v42  ;;  %v250_v23 = vrot.slane %v249_v47, 4  ;;  %v337_v11 = vmul.f32 %v3253_v36, %v4589_v39  ;;  %vm342_vm5 = vweird.f32 %v3253_v36 }
 0x1e2   : > { %v2662_v5 = vmul.f32 %v2650_v4, %v4513_v25  ;;  %v2724_v6 = vmul.f32 %v2651_v53, %v427_v17  ;;  %v2088_v9 = vadd.f32 %v2080_v30, %v1993_v55  ;;  %v1330_v1 = vmul.f32 %v1322_v10, %v4163_v52  ;;  %v4633_v17 = vld [vmem:[%s5080_s2] sm:$0xff]  ;;  %vm4649_vm7 = vmor %vm341_vm4, %vm342_vm5 }
 0x1e3   : > { %v251_v20 = vadd.f32 %v250_v23, %v249_v47  ;;  %v1424_v8 = vmul.f32 %v1416_v19, %v4160_v35  ;;  %v1510_v16 = vperm.slane %v3278_v13, 3  ;;  %v1604_v46 = vperm.slane %v3278_v13, 4  ;;  %2665 = vperm.xlu1 %3174, %v4633_v17  }
 0x1e4   : > { %2706 = vmatpush.msra.mxu0 %v2662_v5  ;;  %2740 = vmatpush.msra.mxu1 %v2724_v6  ;;  %v338_v24 = vsub.f32 1.0, %v337_v11  ;;  %v2182_v33 = vadd.f32 %v2174_v40, %v2088_v9  ;;  %v1338_v14 = vadd.f32 %v1330_v1, %v1235_v0  ;;  %v1698_v25 = vperm.slane %v3278_v13, 5 }
 0x1e5   : > { %vm4635_vm6 = vcmp.eq.f32.partialorder %v345_v26, 8.507059e+37  ;;  %v348_v51 = vor.u32 1.1754944e-38, %v347_v41  ;;  %v252_v34 = vrot.slane %v251_v20, 2  ;;  %v1518_v29 = vmul.f32 %v1510_v16, %v4181_v59  ;;  %3100 = vmatmul.msk.f32.vlgmr.msra.gmra.mxu0 %vm1147_vm3, %v4633_v17  ;;  %3104 = vmatmul.msk.f32.vlgmr.msra.gmra.mxu1 %vm1147_vm3, %v4633_v17 }
 0x1e6   : > { %v339_v30 = vmul.f32 %v3253_v36, %v338_v24  ;;  %v2276_v40 = vadd.f32 %v2268_v28, %v2182_v33  ;;  %v2636_v15 = vperm.slane %v4539_v50, 7  ;;  %v1432_v54 = vadd.f32 %v1424_v8, %v1338_v14 }
 0x1e7   : > { %v253_v41 = vadd.f32 %v252_v34, %v251_v20  ;;  %v1612_v21 = vmul.f32 %v1604_v46, %v4178_v57  ;;  %v1706_v4 = vmul.f32 %v1698_v25, %v4212_v32  ;;  %v1792_v53 = vperm.slane %v3278_v13, 6  ;;  %v4678_v34 = vld [vmem:[%s3337_s22 + $0x40] sm:$0xff] }
 0x1e8   : > { %v340_v47 = vadd.f32 %v3253_v36, %v339_v30  ;;  %v2370_v28 = vadd.f32 %v2362_v22, %v2276_v40  ;;  %v1526_v55 = vadd.f32 %v1518_v29, %v1432_v54  ;;  %v1886_v50 = vperm.slane %v3278_v13, 7  ;;  %v4681_v29 = vld [vmem:[%s3337_s22 + $0x48] sm:$0xff] }
 0x1e9   : > { %vm300_vm8 = vcmp.ne.f32.partialorder %v4589_v39, 0.0  ;;  %v2550_v42 = vmul.f32 %v2542_v63, %v4501_v48  ;;  %v254_v0 = vrot.slane %v253_v41, 1  ;;  %v2644_v6 = vmul.f32 %v2636_v15, %v4596_v2 }
 0x1ea   : > { %v344_v10 = vsel %vm4649_vm7, %v3253_v36, %v340_v47  ;;  %v2464_v5 = vadd.f32 %v2456_v62, %v2370_v28  ;;  %v1620_v23 = vadd.f32 %v1612_v21, %v1526_v55  ;;  %v1800_v22 = vmul.f32 %v1792_v53, %v4194_v49 }
 0x1eb   : > { %v349_v19 = vsel %vm4635_vm6, %v348_v51, %v344_v10  ;;  %v4662_v11 = vadd.f32 %v254_v0, %v253_v41  ;;  %v2073_v13 = vperm.slane %v4619_v45, 1  ;;  %v1894_v9 = vmul.f32 %v1886_v50, %v4281_v27 }
 0x1ec   : > { %v2558_v39 = vadd.f32 %v2550_v42, %v2464_v5  ;;  %v1714_v63 = vadd.f32 %v1706_v4, %v1620_v23  ;;  %v2167_v62 = vperm.slane %v4619_v45, 2  ;;  %v428_v36 = vsel %vm300_vm8, %v349_v19, 0.0 }
 0x1ed   : > { %3254 = vrcp.f32 %v4662_v11  ;;  %v2261_v1 = vperm.slane %v4619_v45, 3  ;;  %v2355_v20 = vperm.slane %v4619_v45, 4  ;;  %v360_v16 = vand.u32 2147483647, %v4662_v11 }
 0x1ee   : > { %v2652_v8 = vadd.f32 %v2644_v6, %v2558_v39  ;;  %v1808_v46 = vadd.f32 %v1800_v22, %v1714_v63  ;;  %v5189_v24 = vperm.slane %v3618_v37, 0  ;;  %v2081_v14 = vmul.f32 %v2073_v13, %v4366_v58 }
 0x1ef   : > { %v362_v3 = vand.u32 2147483648, %v4662_v11  ;;  %v256_v30 = vadd.f32 %v4681_v29, %v4678_v34  ;;  %vm356_vm9 = vweird.f32 %v4662_v11  ;;  %v2175_v40 = vmul.f32 %v2167_v62, %v4388_v43 }
 0x1f0   : > { %v1986_v33 = vmul.f32 %v4340_v7, %v5189_v24  ;;  %v2759_v25 = vmul.f32 %v2652_v8, %v428_v36  ;;  %v1902_v51 = vadd.f32 %v1894_v9, %v1808_v46  ;;  %v2269_v37 = vmul.f32 %v2261_v1, %v4441_v38 }
 0x1f1   : > { %v2363_v15 = vmul.f32 %v2355_v20, %v4436_v56  ;;  %vm4689_vm10 = vcmp.eq.f32.partialorder %v360_v16, 8.507059e+37  ;;  %v2449_v41 = vperm.slane %v4619_v45, 5  ;;  %v257_v21 = vrot.slane %v256_v30, 4 }
 0x1f2   : > { %2775 = vmatpush.msra.mxu2 %v2759_v25  ;;  %v1994_v26 = vadd.f32 %v1986_v33, %v1902_v51  ;;  %v1323_v4 = vperm.slane %v4678_v34, 1  ;;  %v2543_v47 = vperm.slane %v4619_v45, 6  ;;  %v2637_v28 = vperm.slane %v4619_v45, 7 }
 0x1f3   : > { %v3255_v53 = vpop.eup %3254  ;;  %3112 = vmatmul.msk.f32.vlgmr.msra.gmra.mxu2 %vm1147_vm3, %v4633_v17  ;;  %v1417_v55 = vperm.slane %v4678_v34, 2  ;;  %v1511_v50 = vperm.slane %v4678_v34, 3  ;;  %vm301_vm11 = vcmp.ne.f32.partialorder %v4662_v11, 0.0  ;;  %v363_v0 = vor.u32 1.1754944e-38, %v362_v3 }
 0x1f4   : > { %v352_v42 = vmul.f32 %v3255_v53, %v4662_v11  ;;  %v2089_v10 = vadd.f32 %v2081_v14, %v1994_v26  ;;  %v258_v5 = vadd.f32 %v257_v21, %v256_v30  ;;  %v5192_v6 = vperm.slane %v3372_v12, 0 }
 0x1f5   : > { %v1331_v45 = vmul.f32 %v1323_v4, %v4163_v52  ;;  %v1605_v19 = vperm.slane %v4678_v34, 4  ;;  %v1699_v22 = vperm.slane %v4678_v34, 5  ;;  %vm357_vm12 = vweird.f32 %v3255_v53 }
 0x1f6   : > { %v1236_v23 = vmul.f32 %v4138_v31, %v5192_v6  ;;  %v353_v13 = vsub.f32 1.0, %v352_v42  ;;  %v2183_v39 = vadd.f32 %v2175_v40, %v2089_v10  ;;  %v259_v63 = vrot.slane %v258_v5, 2  ;;  %vm4715_vm13 = vmor %vm356_vm9, %vm357_vm12 }
 0x1f7   : > { %v2457_v9 = vmul.f32 %v2449_v41, %v4521_v44  ;;  %v1425_v36 = vmul.f32 %v1417_v55, %v4160_v35  ;;  %v1519_v1 = vmul.f32 %v1511_v50, %v4181_v59  ;;  %v2551_v8 = vmul.f32 %v2543_v47, %v4501_v48 }
 0x1f8   : > { %v1339_v62 = vadd.f32 %v1331_v45, %v1236_v23  ;;  %v354_v12 = vmul.f32 %v3255_v53, %v353_v13  ;;  %v2277_v20 = vadd.f32 %v2269_v37, %v2183_v39  ;;  %v260_v16 = vadd.f32 %v259_v63, %v258_v5  ;;  %v3282_v63 = vld [vmem:[%s3337_s22 + $0x50] sm:$0xff] }
 0x1f9   : > { %v2645_v24 = vmul.f32 %v2637_v28, %v4596_v2  ;;  %v1613_v14 = vmul.f32 %v1605_v19, %v4178_v57  ;;  %v1793_v25 = vperm.slane %v4678_v34, 6  ;;  %v1707_v40 = vmul.f32 %v1699_v22, %v4212_v32 }
 0x1fa   : > { %v1433_v33 = vadd.f32 %v1425_v36, %v1339_v62  ;;  %v355_v3 = vadd.f32 %v3255_v53, %v354_v12  ;;  %v2371_v51 = vadd.f32 %v2363_v15, %v2277_v20  ;;  %v261_v30 = vrot.slane %v260_v16, 1 }
 0x1fb   : > { %v1887_v26 = vperm.slane %v4678_v34, 7  ;;  %v2074_v41 = vperm.slane %v4681_v29, 1  ;;  %v2168_v21 = vperm.slane %v4681_v29, 2  ;;  %v2262_v55 = vperm.slane %v4681_v29, 3 }
 0x1fc   : > { %v1527_v37 = vadd.f32 %v1519_v1, %v1433_v33  ;;  %v359_v4 = vsel %vm4715_vm13, %v3255_v53, %v355_v3  ;;  %v2465_v47 = vadd.f32 %v2457_v9, %v2371_v51  ;;  %v4728_v28 = vadd.f32 %v261_v30, %v260_v16  ;;  %v4749_v9 = vld [vmem:[%s3337_s22 + $0x58] sm:$0xff] }
 0x1fd   : > { %v364_v15 = vsel %vm4689_vm10, %v363_v0, %v359_v4  ;;  %v2356_v42 = vperm.slane %v4681_v29, 4  ;;  %v1801_v10 = vmul.f32 %v1793_v25, %v4194_v49  ;;  %v1895_v6 = vmul.f32 %v1887_v26, %v4281_v27 }
 0x1fe   : > { %v1621_v50 = vadd.f32 %v1613_v14, %v1527_v37  ;;  %v2559_v34 = vadd.f32 %v2551_v8, %v2465_v47  ;;  %3256 = vrcp.f32 %v4728_v28  ;;  %v429_v53 = vsel %vm301_vm11, %v364_v15, 0.0  ;;  %v5196_v14 = vld [vmem:[#allocation2_spill] sm:$0xff] }
 0x1ff   : > { %v5195_v23 = vperm.slane %v3629_v60, 0  ;;  %v2082_v45 = vmul.f32 %v2074_v41, %v4366_v58  ;;  %v2176_v19 = vmul.f32 %v2168_v21, %v4388_v43  ;;  %v2270_v22 = vmul.f32 %v2262_v55, %v4441_v38 }
 0x200   : > { %v1715_v5 = vadd.f32 %v1707_v40, %v1621_v50  ;;  %v2653_v0 = vadd.f32 %v2645_v24, %v2559_v34  ;;  %v2364_v39 = vmul.f32 %v2356_v42, %v4436_v56  ;;  %v2450_v11 = vperm.slane %v4681_v29, 5 }
 0x201   : > { %v1987_v54 = vmul.f32 %v4340_v7, %v5195_v23  ;;  %v263_v62 = vadd.f32 %v4749_v9, %v3282_v63  ;;  %vm371_vm14 = vweird.f32 %v4728_v28  ;;  %v2544_v36 = vperm.slane %v4681_v29, 6 }
 0x202   : > { %v1809_v13 = vadd.f32 %v1801_v10, %v1715_v5  ;;  %v2794_v60 = vmul.f32 %v2653_v0, %v429_v53  ;;  %v1324_v1 = vperm.slane %v3282_v63, 1  ;;  %v1418_v8 = vperm.slane %v3282_v63, 2 }
 0x203   : > { %v264_v20 = vrot.slane %v263_v62, 4  ;;  %v1512_v16 = vperm.slane %v3282_v63, 3  ;;  %v375_v24 = vand.u32 2147483647, %v4728_v28  ;;  %v377_v33 = vand.u32 2147483648, %v4728_v28 }
 0x204   : > { %v1903_v12 = vadd.f32 %v1895_v6, %v1809_v13  ;;  %v3257_v46 = vpop.eup %3256  ;;  %2810 = vmatpush.msra.mxu3 %v2794_v60  ;;  %v5197_v25 = vperm.slane %v5196_v14, 0  ;;  %v1332_v51 = vmul.f32 %v1324_v1, %v4163_v52  ;;  %v1606_v26 = vperm.slane %v3282_v63, 4 }
 0x205   : > { %3120 = vmatmul.msk.f32.vlgmr.msra.gmra.mxu3 %vm1147_vm3, %v4633_v17  ;;  %v367_v30 = vmul.f32 %v3257_v46, %v4728_v28  ;;  %v265_v37 = vadd.f32 %v264_v20, %v263_v62  ;;  %v1426_v21 = vmul.f32 %v1418_v8, %v4160_v35  ;;  %v1520_v4 = vmul.f32 %v1512_v16, %v4181_v59 }
 0x206   : > { %v1237_v3 = vmul.f32 %v4138_v31, %v5197_v25  ;;  %v1995_v40 = vadd.f32 %v1987_v54, %v1903_v12  ;;  %v1700_v47 = vperm.slane %v3282_v63, 5  ;;  %vm302_vm15 = vcmp.ne.f32.partialorder %v4728_v28, 0.0 }
 0x207   : > { %v368_v55 = vsub.f32 1.0, %v367_v30  ;;  %vm372_vm0 = vweird.f32 %v3257_v46  ;;  %v266_v50 = vrot.slane %v265_v37, 2  ;;  %vm4766_vm1 = vcmp.eq.f32.partialorder %v375_v24, 8.507059e+37 }
 0x208   : > { %v1340_v41 = vadd.f32 %v1332_v51, %v1237_v3  ;;  %v2090_v15 = vadd.f32 %v2082_v45, %v1995_v40  ;;  %v2458_v34 = vmul.f32 %v2450_v11, %v4521_v44  ;;  %v2638_v10 = vperm.slane %v4681_v29, 7  ;;  %vm4774_vm2 = vmor %vm371_vm14, %vm372_vm0 }
 0x209   : > { %v369_v5 = vmul.f32 %v3257_v46, %v368_v55  ;;  %v267_v23 = vadd.f32 %v266_v50, %v265_v37  ;;  %v1794_v54 = vperm.slane %v3282_v63, 6  ;;  %v1614_v13 = vmul.f32 %v1606_v26, %v4178_v57 }
 0x20a   : > { %v1434_v53 = vadd.f32 %v1426_v21, %v1340_v41  ;;  %v2184_v6 = vadd.f32 %v2176_v19, %v2090_v15  ;;  %v1708_v62 = vmul.f32 %v1700_v47, %v4212_v32  ;;  %v1888_v60 = vperm.slane %v3282_v63, 7 }
 0x20b   : > { %v370_v11 = vadd.f32 %v3257_v46, %v369_v5  ;;  %v378_v1 = vor.u32 1.1754944e-38, %v377_v33  ;;  %v268_v12 = vrot.slane %v267_v23, 1  ;;  %v2075_v19 = vperm.slane %v4749_v9, 1 }
 0x20c   : > { %v1528_v45 = vadd.f32 %v1520_v4, %v1434_v53  ;;  %v2278_v29 = vadd.f32 %v2270_v22, %v2184_v6  ;;  %v2169_v8 = vperm.slane %v4749_v9, 2  ;;  %v2263_v16 = vperm.slane %v4749_v9, 3 }
 0x20d   : > { %v374_v24 = vsel %vm4774_vm2, %v3257_v46, %v370_v11  ;;  %v4785_v25 = vadd.f32 %v268_v12, %v267_v23  ;;  %v2357_v3 = vperm.slane %v4749_v9, 4  ;;  %v2552_v63 = vmul.f32 %v2544_v36, %v4501_v48 }
 0x20e   : > { %v1622_v20 = vadd.f32 %v1614_v13, %v1528_v45  ;;  %v2372_v14 = vadd.f32 %v2364_v39, %v2278_v29  ;;  %v1802_v22 = vmul.f32 %v1794_v54, %v4194_v49  ;;  %v1896_v51 = vmul.f32 %v1888_v60, %v4281_v27  ;;  %v5203_v60 = vld [vmem:[#allocation3_spill] sm:$0xff] }
 0x20f   : > { %v379_v30 = vsel %vm4766_vm1, %v378_v1, %v374_v24  ;;  %v2646_v46 = vmul.f32 %v2638_v10, %v4596_v2  ;;  %3258 = vrcp.f32 %v4785_v25  ;;  %v5202_v37 = vperm.slane %v3632_v61, 0  ;;  %v3284_v61 = vld [vmem:[%s3337_s22 + $0x60] sm:$0xff] }
 0x210   : > { %v1716_v33 = vadd.f32 %v1708_v62, %v1622_v20  ;;  %v2466_v40 = vadd.f32 %v2458_v34, %v2372_v14  ;;  %v2083_v26 = vmul.f32 %v2075_v19, %v4366_v58  ;;  %v2177_v41 = vmul.f32 %v2169_v8, %v4388_v43  ;;  %v4808_v34 = vld [vmem:[%s3337_s22 + $0x68] sm:$0xff] }
 0x211   : > { %v1988_v36 = vmul.f32 %v4340_v7, %v5202_v37  ;;  %v2271_v4 = vmul.f32 %v2263_v16, %v4441_v38  ;;  %v2365_v47 = vmul.f32 %v2357_v3, %v4436_v56  ;;  %v2451_v55 = vperm.slane %v4749_v9, 5 }
 0x212   : > { %v1810_v39 = vadd.f32 %v1802_v22, %v1716_v33  ;;  %v2560_v21 = vadd.f32 %v2552_v63, %v2466_v40  ;;  %v430_v15 = vsel %vm302_vm15, %v379_v30, 0.0  ;;  %v2545_v42 = vperm.slane %v4749_v9, 6 }
 0x213   : > { %v270_v10 = vadd.f32 %v4808_v34, %v3284_v61  ;;  %vm386_vm4 = vweird.f32 %v4785_v25  ;;  %v390_v5 = vand.u32 2147483647, %v4785_v25  ;;  %v1325_v6 = vperm.slane %v3284_v61, 1 }
 0x214   : > { %v1904_v50 = vadd.f32 %v1896_v51, %v1810_v39  ;;  %v2654_v53 = vadd.f32 %v2646_v46, %v2560_v21  ;;  %v1419_v0 = vperm.slane %v3284_v61, 2  ;;  %v1513_v45 = vperm.slane %v3284_v61, 3 }
 0x215   : > { %v271_v54 = vrot.slane %v270_v10, 4  ;;  %v3259_v28 = vpop.eup %3258  ;;  %v392_v62 = vand.u32 2147483648, %v4785_v25  ;;  %v5204_v11 = vperm.slane %v5203_v60, 0  ;;  %v1333_v29 = vmul.f32 %v1325_v6, %v4163_v52 }
 0x216   : > { %v1996_v23 = vadd.f32 %v1988_v36, %v1904_v50  ;;  %v2829_v13 = vmul.f32 %v2654_v53, %v430_v15  ;;  %vm303_vm5 = vcmp.ne.f32.partialorder %v4785_v25, 0.0  ;;  %v382_v12 = vmul.f32 %v3259_v28, %v4785_v25 }
 0x217   : > { %v1238_v1 = vmul.f32 %v4138_v31, %v5204_v11  ;;  %v272_v19 = vadd.f32 %v271_v54, %v270_v10  ;;  %v1607_v8 = vperm.slane %v3284_v61, 4  ;;  %v1427_v24 = vmul.f32 %v1419_v0, %v4160_v35 }
 0x218   : > { %v2091_v20 = vadd.f32 %v2083_v26, %v1996_v23  ;;  %2845 = vmatpush.msrb.mxu0 %v2829_v13  ;;  %v1521_v14 = vmul.f32 %v1513_v45, %v4181_v59  ;;  %v1701_v3 = vperm.slane %v3284_v61, 5  ;;  %v383_v63 = vsub.f32 1.0, %v382_v12 }
 0x219   : > { %v1341_v16 = vadd.f32 %v1333_v29, %v1238_v1  ;;  %vm387_vm6 = vweird.f32 %v3259_v28  ;;  %v273_v22 = vrot.slane %v272_v19, 2  ;;  %v393_v51 = vor.u32 1.1754944e-38, %v392_v62 }
 0x21a   : > { %v2185_v33 = vadd.f32 %v2177_v41, %v2091_v20  ;;  %v2459_v30 = vmul.f32 %v2451_v55, %v4521_v44  ;;  %v2639_v40 = vperm.slane %v4749_v9, 7  ;;  %v384_v39 = vmul.f32 %v3259_v28, %v383_v63  ;;  %vm4826_vm7 = vmor %vm386_vm4, %vm387_vm6 }
 0x21b   : > { %v1435_v46 = vadd.f32 %v1427_v24, %v1341_v16  ;;  %v274_v36 = vadd.f32 %v273_v22, %v272_v19  ;;  %v1795_v26 = vperm.slane %v3284_v61, 6  ;;  %v1615_v41 = vmul.f32 %v1607_v8, %v4178_v57 }
 0x21c   : > { %v2279_v37 = vadd.f32 %v2271_v4, %v2185_v33  ;;  %v1709_v50 = vmul.f32 %v1701_v3, %v4212_v32  ;;  %v1889_v10 = vperm.slane %v3284_v61, 7  ;;  %v385_v55 = vadd.f32 %v3259_v28, %v384_v39  ;;  %v4856_v3 = vld [vmem:[%s3337_s22 + $0x78] sm:$0xff] }
 0x21d   : > { %v1529_v15 = vadd.f32 %v1521_v14, %v1435_v46  ;;  %vm391_vm8 = vcmp.eq.f32.partialorder %v390_v5, 8.507059e+37  ;;  %v275_v53 = vrot.slane %v274_v36, 1  ;;  %v2553_v4 = vmul.f32 %v2545_v42, %v4501_v48  ;;  %v4853_v14 = vld [vmem:[%s3337_s22 + $0x70] sm:$0xff] }
 0x21e   : > { %v2373_v9 = vadd.f32 %v2365_v47, %v2279_v37  ;;  %v2647_v6 = vmul.f32 %v2639_v40, %v4596_v2  ;;  %v2076_v54 = vperm.slane %v4808_v34, 1  ;;  %v389_v0 = vsel %vm4826_vm7, %v3259_v28, %v385_v55  ;;  %v5208_v55 = vld [vmem:[#allocation4_spill] sm:$0xff] }
 0x21f   : > { %v1623_v23 = vadd.f32 %v1615_v41, %v1529_v15  ;;  %v4837_v13 = vadd.f32 %v275_v53, %v274_v36  ;;  %v1803_v62 = vmul.f32 %v1795_v26, %v4194_v49  ;;  %v394_v61 = vsel %vm391_vm8, %v393_v51, %v389_v0 }
 0x220   : > { %v2467_v45 = vadd.f32 %v2459_v30, %v2373_v9  ;;  %v1897_v5 = vmul.f32 %v1889_v10, %v4281_v27  ;;  %v2170_v42 = vperm.slane %v4808_v34, 2  ;;  %v2264_v11 = vperm.slane %v4808_v34, 3 }
 0x221   : > { %v1717_v47 = vadd.f32 %v1709_v50, %v1623_v23  ;;  %3260 = vrcp.f32 %v4837_v13  ;;  %v2358_v28 = vperm.slane %v4808_v34, 4  ;;  %v431_v1 = vsel %vm303_vm5, %v394_v61, 0.0 }
 0x222   : > { %v2561_v60 = vadd.f32 %v2553_v4, %v2467_v45  ;;  %v5207_v20 = vperm.slane %v3639_v18, 0  ;;  %v2084_v16 = vmul.f32 %v2076_v54, %v4366_v58  ;;  %v2452_v24 = vperm.slane %v4808_v34, 5 }
 0x223   : > { %v1811_v29 = vadd.f32 %v1803_v62, %v1717_v47  ;;  %v277_v63 = vadd.f32 %v4856_v3, %v4853_v14  ;;  %v2178_v33 = vmul.f32 %v2170_v42, %v4388_v43  ;;  %v2272_v22 = vmul.f32 %v2264_v11, %v4441_v38 }
 0x224   : > { %v2655_v12 = vadd.f32 %v2647_v6, %v2561_v60  ;;  %v1989_v19 = vmul.f32 %v4340_v7, %v5207_v20  ;;  %v2366_v18 = vmul.f32 %v2358_v28, %v4436_v56  ;;  %vm401_vm9 = vweird.f32 %v4837_v13 }
 0x225   : > { %v1905_v8 = vadd.f32 %v1897_v5, %v1811_v29  ;;  %v278_v30 = vrot.slane %v277_v63, 4  ;;  %v1326_v40 = vperm.slane %v4853_v14, 1  ;;  %v405_v39 = vand.u32 2147483647, %v4837_v13  ;;  %v4884_v5 = vld [vmem:[%s5080_s2 + $0x8] sm:$0xff] }
 0x226   : > { %v2864_v25 = vmul.f32 %v2655_v12, %v431_v1  ;;  %v407_v37 = vand.u32 2147483648, %v4837_v13  ;;  %v1420_v36 = vperm.slane %v4853_v14, 2  ;;  %v1514_v26 = vperm.slane %v4853_v14, 3  ;;  %3113 = vmatmul.msk.f32.gmra.mxu2 %vm1147_vm3, %v4884_v5  ;;  %3121 = vmatmul.msk.f32.gmra.mxu3 %vm1147_vm3, %v4884_v5  ;;  %v4909_v1 = vld [vmem:[%s5080_s2 + $0x10] sm:$0xff] }
 0x227   : > { %v1997_v51 = vadd.f32 %v1989_v19, %v1905_v8  ;;  %v3261_v46 = vpop.eup %3260  ;;  %vm304_vm10 = vcmp.ne.f32.partialorder %v4837_v13, 0.0  ;;  %v2460_v41 = vmul.f32 %v2452_v24, %v4521_v44  ;;  %v279_v50 = vadd.f32 %v278_v30, %v277_v63  ;;  %3101 = vmatmul.msk.f32.gmra.mxu0 %vm1147_vm3, %v4884_v5  ;;  %3105 = vmatmul.msk.f32.gmra.mxu1 %vm1147_vm3, %v4884_v5 }
 0x228   : > { %2880 = vmatpush.msrb.mxu1 %v2864_v25  ;;  %v397_v21 = vmul.f32 %v3261_v46, %v4837_v13  ;;  %v2546_v10 = vperm.slane %v4808_v34, 6  ;;  %v5209_v9 = vperm.slane %v5208_v55, 0  ;;  %v1334_v4 = vmul.f32 %v1326_v40, %v4163_v52  ;;  %2670 = vperm.xlu1 %3174, %v4884_v5  }
 0x229   : > { %v2092_v15 = vadd.f32 %v2084_v16, %v1997_v51  ;;  %v1608_v6 = vperm.slane %v4853_v14, 4  ;;  %vm402_vm11 = vweird.f32 %v3261_v46  ;;  %v280_v0 = vrot.slane %v279_v50, 2  ;;  %2675 = vperm.xlu2 %3175, %v4909_v1  }
 0x22a   : > { %v1239_v53 = vmul.f32 %v4138_v31, %v5209_v9  ;;  %v398_v23 = vsub.f32 1.0, %v397_v21  ;;  %v1428_v62 = vmul.f32 %v1420_v36, %v4160_v35  ;;  %v1522_v61 = vmul.f32 %v1514_v26, %v4181_v59  ;;  %vm4893_vm12 = vmor %vm401_vm9, %vm402_vm11 }
 0x22b   : > { %v2186_v54 = vadd.f32 %v2178_v33, %v2092_v15  ;;  %v1702_v47 = vperm.slane %v4853_v14, 5  ;;  %v2640_v42 = vperm.slane %v4808_v34, 7  ;;  %v281_v60 = vadd.f32 %v280_v0, %v279_v50  ;;  %v5214_v15 = vld [vmem:[#allocation5_spill] sm:$0xff] }
 0x22c   : > { %v1342_v45 = vadd.f32 %v1334_v4, %v1239_v53  ;;  %v399_v31 = vmul.f32 %v3261_v46, %v398_v23  ;;  %vm4897_vm13 = vcmp.eq.f32.partialorder %v405_v39, 8.507059e+37  ;;  %v408_v11 = vor.u32 1.1754944e-38, %v407_v37 }
 0x22d   : > { %v2280_v52 = vadd.f32 %v2272_v22, %v2186_v54  ;;  %v2554_v34 = vmul.f32 %v2546_v10, %v4501_v48  ;;  %v282_v20 = vrot.slane %v281_v60, 1  ;;  %v1796_v19 = vperm.slane %v4853_v14, 6 }
 0x22e   : > { %v1436_v28 = vadd.f32 %v1428_v62, %v1342_v45  ;;  %v400_v29 = vadd.f32 %v3261_v46, %v399_v31  ;;  %v1616_v16 = vmul.f32 %v1608_v6, %v4178_v57  ;;  %v1710_v24 = vmul.f32 %v1702_v47, %v4212_v32  ;;  %3114 = vmatmul.msk.f32.gmra.mxu2 %vm1147_vm3, %v4909_v1 }
 0x22f   : > { %v2374_v12 = vadd.f32 %v2366_v18, %v2280_v52  ;;  %v1890_v63 = vperm.slane %v4853_v14, 7  ;;  %v2648_v22 = vmul.f32 %v2640_v42, %v4596_v2  ;;  %v4920_v18 = vadd.f32 %v282_v20, %v281_v60  ;;  %3122 = vmatmul.msk.f32.gmra.mxu3 %vm1147_vm3, %v4909_v1  ;;  %3102 = vmatmul.msk.f32.gmra.mxu0 %vm1147_vm3, %v4909_v1 }
 0x230   : > { %v1530_v8 = vadd.f32 %v1522_v61, %v1436_v28  ;;  %v404_v25 = vsel %vm4893_vm12, %v3261_v46, %v400_v29  ;;  %v1804_v57 = vmul.f32 %v1796_v19, %v4194_v49  ;;  %v2077_v39 = vperm.slane %v4856_v3, 1  ;;  %3106 = vmatmul.msk.f32.gmra.mxu1 %vm1147_vm3, %v4909_v1  ;;  %v4942_v49 = vld [vmem:[%s5080_s2 + $0x18] sm:$0xff] }
 0x231   : > { %v2468_v33 = vadd.f32 %v2460_v41, %v2374_v12  ;;  %v409_v51 = vsel %vm4897_vm13, %v408_v11, %v404_v25  ;;  %3262 = vrcp.f32 %v4920_v18  ;;  %v1898_v46 = vmul.f32 %v1890_v63, %v4281_v27  ;;  %2680 = vperm.xlu2 %3175, %v4942_v49  }
 0x232   : > { %v1624_v30 = vadd.f32 %v1616_v16, %v1530_v8  ;;  %v432_v32 = vsel %vm304_vm10, %v409_v51, 0.0  ;;  %v2171_v26 = vperm.slane %v4856_v3, 2  ;;  %v2265_v13 = vperm.slane %v4856_v3, 3 }
 0x233   : > { %v2562_v40 = vadd.f32 %v2554_v34, %v2468_v33  ;;  %v5215_v41 = vperm.slane %v5214_v15, 0  ;;  %v2085_v10 = vmul.f32 %v2077_v39, %v4366_v58  ;;  %vm416_vm14 = vweird.f32 %v4920_v18 }
 0x234   : > { %v1718_v14 = vadd.f32 %v1710_v24, %v1624_v30  ;;  %v2179_v4 = vmul.f32 %v2171_v26, %v4388_v43  ;;  %v2273_v6 = vmul.f32 %v2265_v13, %v4441_v38  ;;  %v2359_v23 = vperm.slane %v4856_v3, 4 }
 0x235   : > { %v2656_v37 = vadd.f32 %v2648_v22, %v2562_v40  ;;  %v1990_v50 = vmul.f32 %v4340_v7, %v5215_v41  ;;  %v2453_v54 = vperm.slane %v4856_v3, 5  ;;  %v422_v7 = vand.u32 2147483648, %v4920_v18 }
 0x236   : > { %v1812_v36 = vadd.f32 %v1804_v57, %v1718_v14  ;;  %v420_v45 = vand.u32 2147483647, %v4920_v18  ;;  %3115 = vmatmul.msk.f32.gmra.mxu2 %vm1147_vm3, %v4942_v49  ;;  %v2367_v38 = vmul.f32 %v2359_v23, %v4436_v56  ;;  %v2547_v47 = vperm.slane %v4856_v3, 6 }
 0x237   : > { %v2899_v27 = vmul.f32 %v2656_v37, %v432_v32  ;;  %v3263_v55 = vpop.eup %3262  ;;  %3123 = vmatmul.msk.f32.gmra.mxu3 %vm1147_vm3, %v4942_v49  ;;  %3103 = vmatmul.msk.f32.gmra.mxu0 %vm1147_vm3, %v4942_v49  ;;  %v2461_v61 = vmul.f32 %v2453_v54, %v4521_v44  ;;  %v423_v52 = vor.u32 1.1754944e-38, %v422_v7  ;;  %v2641_v60 = vperm.slane %v4856_v3, 7 }
 0x238   : > { %v1906_v21 = vadd.f32 %v1898_v46, %v1812_v36  ;;  %v412_v9 = vmul.f32 %v3263_v55, %v4920_v18  ;;  %vm417_vm15 = vweird.f32 %v3263_v55  ;;  %3107 = vmatmul.msk.f32.gmra.mxu1 %vm1147_vm3, %v4942_v49  ;;  %vm421_vm1 = vcmp.eq.f32.partialorder %v420_v45, 8.507059e+37 }
 0x239   : > { %2915 = vmatpush.msrb.mxu2 %v2899_v27  ;;  %vm418_vm0 = vmor %vm416_vm14, %vm417_vm15  ;;  %vm305_vm2 = vcmp.ne.f32.partialorder %v4920_v18, 0.0  ;;  %v2555_v28 = vmul.f32 %v2547_v47, %v4501_v48  ;;  %v2649_v56 = vmul.f32 %v2641_v60, %v4596_v2 }
 0x23a   : > { %v1998_v53 = vadd.f32 %v1990_v50, %v1906_v21  ;;  %v413_v0 = vsub.f32 1.0, %v412_v9 }
 0x23c   : > { %v2093_v58 = vadd.f32 %v2085_v10, %v1998_v53  ;;  %v414_v43 = vmul.f32 %v3263_v55, %v413_v0 }
 0x23e   : > { %v2187_v62 = vadd.f32 %v2179_v4, %v2093_v58  ;;  %v415_v31 = vadd.f32 %v3263_v55, %v414_v43  ;;  %3144 = vmatmul.msk.f32.vlgmr.msrb.gmra.mxu2 %vm1147_vm3, %v4633_v17 }
 0x23f   : > { %3128 = vmatmul.msk.f32.vlgmr.msrb.gmra.mxu0 %vm1147_vm3, %v4633_v17 }
 0x240   : > { %v2281_v42 = vadd.f32 %v2273_v6, %v2187_v62  ;;  %v419_v35 = vsel %vm418_vm0, %v3263_v55, %v415_v31  ;;  %3136 = vmatmul.msk.f32.vlgmr.msrb.gmra.mxu1 %vm1147_vm3, %v4633_v17 }
 0x241   : > { %v424_v11 = vsel %vm421_vm1, %v423_v52, %v419_v35 }
 0x242   : > { %v2375_v59 = vadd.f32 %v2367_v38, %v2281_v42  ;;  %v433_v3 = vsel %vm305_vm2, %v424_v11, 0.0 }
 0x244   : > { %v2469_v34 = vadd.f32 %v2461_v61, %v2375_v59 }
 0x246   : > { %v2563_v44 = vadd.f32 %v2555_v28, %v2469_v34  ;;  %3145 = vmatmul.msk.f32.gmra.mxu2 %vm1147_vm3, %v4884_v5 }
 0x247   : > { %3129 = vmatmul.msk.f32.gmra.mxu0 %vm1147_vm3, %v4884_v5 }
 0x248   : > { %v2657_v29 = vadd.f32 %v2649_v56, %v2563_v44  ;;  %3137 = vmatmul.msk.f32.gmra.mxu1 %vm1147_vm3, %v4884_v5 }
 0x24a   : > { %v2934_v12 = vmul.f32 %v2657_v29, %v433_v3 }
 0x24c   : > { %2950 = vmatpush.msrb.mxu3 %v2934_v12 }
 0x24d   : > { %3152 = vmatmul.msk.f32.vlgmr.msrb.gmra.mxu3 %vm1147_vm3, %v4633_v17 }
 0x24e   : > { %3146 = vmatmul.msk.f32.gmra.mxu2 %vm1147_vm3, %v4909_v1 }
 0x24f   : > { %3130 = vmatmul.msk.f32.gmra.mxu0 %vm1147_vm3, %v4909_v1 }
 0x250   : > { %3138 = vmatmul.msk.f32.gmra.mxu1 %vm1147_vm3, %v4909_v1 }
 0x255   : > { %3153 = vmatmul.msk.f32.gmra.mxu3 %vm1147_vm3, %v4884_v5  ;;  %v5013_v17 = vpop.permute.xlu1 %2665 }
 0x256   : > { %3147 = vmatmul.msk.f32.gmra.mxu2 %vm1147_vm3, %v4942_v49 }
 0x257   : > { %3131 = vmatmul.msk.f32.gmra.mxu0 %vm1147_vm3, %v4942_v49 }
 0x258   : > { %3139 = vmatmul.msk.f32.gmra.mxu1 %vm1147_vm3, %v4942_v49 }
 0x25d   : > { %3154 = vmatmul.msk.f32.gmra.mxu3 %vm1147_vm3, %v4909_v1 }
 0x262   : > { %v2708_v48 = vpop.f32.mrf.mxu0  ;;  %v2742_v2 = vpop.f32.mrf.mxu1 }
 0x263   : > { %v2709_v5 = vadd.f32 %v2708_v48, %v5013_v17  ;;  %v2743_v1 = vadd.f32 %v2742_v2, %v5013_v17 }
 0x265   : > { %3155 = vmatmul.msk.f32.gmra.mxu3 %vm1147_vm3, %v4942_v49  ;;  %2720 = vst [vmem:[%s5011_s15] sm:$0xff] %v2709_v5 }
 0x266   : > { %3108 = vst [vmem:[%s5011_s15 + $0x20] sm:$0xff] %v2743_v1 }
 0x276   : > { %v2777_v20 = vpop.f32.mrf.mxu2 }
 0x277   : > { %v2778_v19 = vadd.f32 %v2777_v20, %v5013_v17 }
 0x279   : > { %3116 = vst [vmem:[%s5011_s15 + $0x40] sm:$0xff] %v2778_v19 }
 0x283   : > { %v5029_v18 = vpop.permute.xlu2 %2675 }
 0x288   : > { %v2812_v8 = vpop.f32.mrf.mxu3 }
 0x289   : > { %v2813_v16 = vadd.f32 %v2812_v8, %v5013_v17 }
 0x28b   : > { %3124 = vst [vmem:[%s5011_s15 + $0x60] sm:$0xff] %v2813_v16  ;;  %v2681_v27 = vpop.permute.xlu2 %2680 }
 0x29a   : > { %v5023_v24 = vpop.permute.xlu1 %2670 }
 0x2a4   : > { %v2711_v63 = vpop.f32.mrf.mxu0  ;;  %v2745_v25 = vpop.f32.mrf.mxu1 }
 0x2a5   : > { %v2712_v33 = vadd.f32 %v2711_v63, %v5023_v24  ;;  %v2746_v22 = vadd.f32 %v2745_v25, %v5023_v24 }
 0x2a7   : > { %2721 = vst [vmem:[%s5011_s15 + $0x8] sm:$0xff] %v2712_v33 }
 0x2a8   : > { %3109 = vst [vmem:[%s5011_s15 + $0x28] sm:$0xff] %v2746_v22 }
 0x2a9   : > { %v2780_v51 = vpop.f32.mrf.mxu2  ;;  %v2815_v30 = vpop.f32.mrf.mxu3 }
 0x2aa   : > { %v2781_v40 = vadd.f32 %v2780_v51, %v5023_v24  ;;  %v2816_v57 = vadd.f32 %v2815_v30, %v5023_v24 }
 0x2ac   : > { %3117 = vst [vmem:[%s5011_s15 + $0x48] sm:$0xff] %v2781_v40  ;;  %v2714_v32 = vpop.f32.mrf.mxu0 }
 0x2ad   : > { %v2748_v14 = vpop.f32.mrf.mxu1  ;;  %3125 = vst [vmem:[%s5011_s15 + $0x68] sm:$0xff] %v2816_v57  ;;  %v2715_v46 = vadd.f32 %v2714_v32, %v5029_v18 }
 0x2ae   : > { %v2749_v39 = vadd.f32 %v2748_v14, %v5029_v18 }
 0x2af   : > { %2722 = vst [vmem:[%s5011_s15 + $0x10] sm:$0xff] %v2715_v46 }
 0x2b0   : > { %3110 = vst [vmem:[%s5011_s15 + $0x30] sm:$0xff] %v2749_v39 }
 0x2b1   : > { %v2783_v37 = vpop.f32.mrf.mxu2 }
 0x2b2   : > { %v2818_v36 = vpop.f32.mrf.mxu3  ;;  %v2784_v26 = vadd.f32 %v2783_v37, %v5029_v18 }
 0x2b3   : > { %v2819_v49 = vadd.f32 %v2818_v36, %v5029_v18 }
 0x2b4   : > { %3118 = vst [vmem:[%s5011_s15 + $0x50] sm:$0xff] %v2784_v26  ;;  %v2717_v13 = vpop.f32.mrf.mxu0 }
 0x2b5   : > { %v2751_v21 = vpop.f32.mrf.mxu1  ;;  %3126 = vst [vmem:[%s5011_s15 + $0x70] sm:$0xff] %v2819_v49  ;;  %v2718_v15 = vadd.f32 %v2717_v13, %v2681_v27 }
 0x2b6   : > { %v2752_v41 = vadd.f32 %v2751_v21, %v2681_v27 }
 0x2b7   : > { %2723 = vst [vmem:[%s5011_s15 + $0x18] sm:$0xff] %v2718_v15 }
 0x2b8   : > { %3111 = vst [vmem:[%s5011_s15 + $0x38] sm:$0xff] %v2752_v41 }
 0x2b9   : > { %v2786_v50 = vpop.f32.mrf.mxu2 }
 0x2ba   : > { %v2821_v10 = vpop.f32.mrf.mxu3  ;;  %v2787_v55 = vadd.f32 %v2786_v50, %v2681_v27 }
 0x2bb   : > { %v2822_v9 = vadd.f32 %v2821_v10, %v2681_v27 }
 0x2bc   : > { %3119 = vst [vmem:[%s5011_s15 + $0x58] sm:$0xff] %v2787_v55  ;;  %v2847_v53 = vpop.f32.mrf.mxu0 }
 0x2bd   : > { %v2882_v4 = vpop.f32.mrf.mxu1  ;;  %3127 = vst [vmem:[%s5011_s15 + $0x78] sm:$0xff] %v2822_v9  ;;  %v2848_v6 = vadd.f32 %v2847_v53, %v5013_v17 }
 0x2be   : > { %v2883_v23 = vadd.f32 %v2882_v4, %v5013_v17 }
 0x2bf   : > { %3132 = vst [vmem:[%s5011_s15 + $0x80] sm:$0xff] %v2848_v6 }
 0x2c0   : > { %3140 = vst [vmem:[%s5011_s15 + $0xa0] sm:$0xff] %v2883_v23 }
 0x2c1   : > { %v2917_v54 = vpop.f32.mrf.mxu2 }
 0x2c2   : > { %v2918_v0 = vadd.f32 %v2917_v54, %v5013_v17 }
 0x2c4   : > { %3148 = vst [vmem:[%s5011_s15 + $0xc0] sm:$0xff] %v2918_v0  ;;  %v2850_v7 = vpop.f32.mrf.mxu0 }
 0x2c5   : > { %v2885_v58 = vpop.f32.mrf.mxu1  ;;  %v2851_v45 = vadd.f32 %v2850_v7, %v5023_v24 }
 0x2c6   : > { %v2886_v43 = vadd.f32 %v2885_v58, %v5023_v24 }
 0x2c7   : > { %3133 = vst [vmem:[%s5011_s15 + $0x88] sm:$0xff] %v2851_v45 }
 0x2c8   : > { %3141 = vst [vmem:[%s5011_s15 + $0xa8] sm:$0xff] %v2886_v43 }
 0x2c9   : > { %v2920_v38 = vpop.f32.mrf.mxu2 }
 0x2ca   : > { %v2921_v47 = vadd.f32 %v2920_v38, %v5023_v24 }
 0x2cc   : > { %v2853_v31 = vpop.f32.mrf.mxu0  ;;  %3149 = vst [vmem:[%s5011_s15 + $0xc8] sm:$0xff] %v2921_v47 }
 0x2cd   : > { %v2888_v52 = vpop.f32.mrf.mxu1  ;;  %v2854_v42 = vadd.f32 %v2853_v31, %v5029_v18 }
 0x2ce   : > { %v2889_v60 = vadd.f32 %v2888_v52, %v5029_v18 }
 0x2cf   : > { %3134 = vst [vmem:[%s5011_s15 + $0x90] sm:$0xff] %v2854_v42 }
 0x2d0   : > { %v2952_v62 = vpop.f32.mrf.mxu3  ;;  %3142 = vst [vmem:[%s5011_s15 + $0xb0] sm:$0xff] %v2889_v60 }
 0x2d1   : > { %v2953_v61 = vadd.f32 %v2952_v62, %v5013_v17  ;;  %v2923_v59 = vpop.f32.mrf.mxu2 }
 0x2d2   : > { %v2924_v34 = vadd.f32 %v2923_v59, %v5029_v18 }
 0x2d3   : > { %3156 = vst [vmem:[%s5011_s15 + $0xe0] sm:$0xff] %v2953_v61 }
 0x2d4   : > { %v2856_v28 = vpop.f32.mrf.mxu0  ;;  %3150 = vst [vmem:[%s5011_s15 + $0xd0] sm:$0xff] %v2924_v34 }
 0x2d5   : > { %v2891_v56 = vpop.f32.mrf.mxu1  ;;  %v2857_v44 = vadd.f32 %v2856_v28, %v2681_v27 }
 0x2d6   : > { %v2892_v3 = vadd.f32 %v2891_v56, %v2681_v27 }
 0x2d7   : > { %3135 = vst [vmem:[%s5011_s15 + $0x98] sm:$0xff] %v2857_v44 }
 0x2d8   : > { %v2955_v35 = vpop.f32.mrf.mxu3  ;;  %3143 = vst [vmem:[%s5011_s15 + $0xb8] sm:$0xff] %v2892_v3 }
 0x2d9   : > { %v2956_v11 = vadd.f32 %v2955_v35, %v5023_v24  ;;  %v2926_v12 = vpop.f32.mrf.mxu2 }
 0x2da   : > { %v2927_v2 = vadd.f32 %v2926_v12, %v2681_v27 }
 0x2db   : > { %3157 = vst [vmem:[%s5011_s15 + $0xe8] sm:$0xff] %v2956_v11 }
 0x2dc   : > { %3151 = vst [vmem:[%s5011_s15 + $0xd8] sm:$0xff] %v2927_v2 }
 0x2e0   : > { %v2958_v29 = vpop.f32.mrf.mxu3 }
 0x2e1   : > { %v2959_v48 = vadd.f32 %v2958_v29, %v5029_v18 }
 0x2e3   : > { %3158 = vst [vmem:[%s5011_s15 + $0xf0] sm:$0xff] %v2959_v48 }
 0x2e8   : > { %v2961_v17 = vpop.f32.mrf.mxu3 }
 0x2e9   : > { %v2962_v5 = vadd.f32 %v2961_v17, %v2681_v27 }
 0x2eb   : > { %3159 = vst [vmem:[%s5011_s15 + $0xf8] sm:$0xff] %v2962_v5 }
 0x2ec PF: > { %s13_s12 = sadd.s32 1, %s3294_s12  }
 0x2ed   : > { %p10_p4 = scmp.ge.s32.totalorder %s13_s12, 6  }
 0x2ef   :  { %12 = sbr.rel (!%p10_p4) target bundleno = 1 (0x1), region = 72 }

</bundles_post_ra>
